<compile_context>
chip_gen: v6e
topology: v6e:2x2x1
jax: 0.10.0
libtpu: 0.0.40
codegen_flags: <defaults>
</compile_context>

<pallas_src>
import functools

import jax
import jax.numpy as jnp
from jax import lax
from jax.experimental import pallas as pl
from jax.experimental.pallas import tpu as pltpu

_EPS = 1e-8
_VMEM_LIMIT_CACHE = [None]


def _vmem_limit_bytes():
    # Generation-aware scoped-VMEM limit: ~3/4 of per-core physical VMEM, capped at
    # 96 MiB (v5e/v6e: 128 MiB -> 96 MiB, v7x: 64 MiB -> 48 MiB).
    if _VMEM_LIMIT_CACHE[0] is None:
        try:
            cap = int(pltpu.get_tpu_info().vmem_capacity_bytes)
        except Exception:
            cap = 128 * 1024 * 1024
        _VMEM_LIMIT_CACHE[0] = int(max(32 * 2**20, min(96 * 2**20, (3 * cap) // 4)))
    return _VMEM_LIMIT_CACHE[0]


def _cparams(*sems):
    return pltpu.CompilerParams(dimension_semantics=sems,
                                vmem_limit_bytes=_vmem_limit_bytes())


# ---------------------------- tiling helpers ----------------------------

def _pick_tile(n, target, mult=8):
    """Largest tile <= target dividing n that is a multiple of `mult` (else n)."""
    if n <= target:
        return n
    d = (target // mult) * mult
    while d >= mult:
        if n % d == 0:
            return d
        d -= mult
    # TODO(synk): rows with no aligned divisor fall back to the full dim; pad rows
    #             upstream if this ever exceeds the VMEM budget.
    return n


def _pick_div(n, target):
    if n <= target:
        return n
    for d in range(target, 0, -1):
        if n % d == 0:
            return d
    return n


def _row_tiles(rows, per_row_bytes, budget=4 * 1024 * 1024, cap=1024, mult=8):
    t = max(mult, min(cap, budget // max(per_row_bytes, 1)))
    t = max(mult, (t // mult) * mult)
    return _pick_tile(rows, t, mult)


def _fori(lo, hi, body, init, unroll):
    try:
        return lax.fori_loop(lo, hi, body, init, unroll=unroll)
    except TypeError:            # older jax without `unroll=` on fori_loop
        return lax.fori_loop(lo, hi, body, init)


# ---------------------------- Pallas kernels ----------------------------

def _lstm_kernel(x_ref, wx_ref, b_ref, wh_ref, y_ref, g_ref, h_ref, c_ref, *,
                 unroll):
    # Fused LSTM: in-VMEM x-projection GEMM + fused-gate recurrence.
    #   x_ref : [TC, TR, Fin] f32 time-major input chunk
    #   wx_ref: [Fin, 4F] bf16   b_ref: [1, 4F] f32   wh_ref: [F, 4F] bf16
    #   y_ref : [TC, TR, F] bf16 hidden-state output
    #   g_ref : [TC, TR, 4F] f32 VMEM gate scratch (never touches HBM)
    #   h_ref : [TR, F] bf16 / c_ref: [TR, F] f32 state across time chunks.
    # NOTE: the time axis MUST stay the innermost 'arbitrary' grid axis; otherwise
    #       the h/c scratch carry silently corrupts the recurrence.
    @pl.when(pl.program_id(1) == 0)
    def _():
        h_ref[...] = jnp.zeros_like(h_ref)
        c_ref[...] = jnp.zeros_like(c_ref)

    tc, tr, fin = x_ref.shape
    f4 = wx_ref.shape[1]
    f = f4 // 4

    # Hoisted input projection: one GEMM per (row-tile, time-chunk), kept in VMEM.
    xf = x_ref[...].reshape(tc * tr, fin).astype(jnp.bfloat16)
    g = jnp.dot(xf, wx_ref[...], preferred_element_type=jnp.float32) + b_ref[...]
    g_ref[...] = g.reshape(tc, tr, f4)

    wh = wh_ref[...]

    def step(t, carry):
        h, c = carry
        gt = g_ref[t] + jnp.dot(h, wh, preferred_element_type=jnp.float32)
        i_g = jax.nn.sigmoid(gt[:, 0 * f:1 * f])
        f_g = jax.nn.sigmoid(gt[:, 1 * f:2 * f])
        g_g = jnp.tanh(gt[:, 2 * f:3 * f])
        o_g = jax.nn.sigmoid(gt[:, 3 * f:4 * f])
        c = f_g * c + i_g * g_g
        h = (o_g * jnp.tanh(c)).astype(jnp.bfloat16)
        y_ref[t] = h
        return (h, c)

    h, c = _fori(0, tc, step, (h_ref[...], c_ref[...]), unroll)
    h_ref[...] = h
    c_ref[...] = c


def _lin_stats_kernel(count, eps, y_ref, w_ref, b_ref, z_ref, mean_ref, rstd_ref,
                      acc_ref):
    # Fused Linear (grouped via block-diagonal W) + per-batch GroupNorm statistics.
    i = pl.program_id(1)

    @pl.when(i == 0)
    def _():
        acc_ref[0] = jnp.float32(0.0)
        acc_ref[1] = jnp.float32(0.0)

    z = (jnp.dot(y_ref[0].astype(jnp.bfloat16), w_ref[...],
                 preferred_element_type=jnp.float32) + b_ref[...])
    z_ref[0] = z
    acc_ref[0] += jnp.sum(z)
    acc_ref[1] += jnp.sum(z * z)

    @pl.when(i == pl.num_programs(1) - 1)
    def _():
        mean = acc_ref[0] / count
        var = jnp.maximum(acc_ref[1] / count - mean * mean, 0.0)
        mean_ref[...] = jnp.full((1, 1, 1), mean, jnp.float32)
        rstd_ref[...] = jnp.full((1, 1, 1), lax.rsqrt(var + eps), jnp.float32)


def _stats_kernel(count, eps, x_ref, mean_ref, rstd_ref, acc_ref):
    # Tiled single-pass sum / sum-of-squares GroupNorm(1, C) statistics.
    i = pl.program_id(1)

    @pl.when(i == 0)
    def _():
        acc_ref[0] = jnp.float32(0.0)
        acc_ref[1] = jnp.float32(0.0)

    x = x_ref[...]
    acc_ref[0] += jnp.sum(x)
    acc_ref[1] += jnp.sum(x * x)

    @pl.when(i == pl.num_programs(1) - 1)
    def _():
        mean = acc_ref[0] / count
        var = jnp.maximum(acc_ref[1] / count - mean * mean, 0.0)
        mean_ref[...] = jnp.full((1, 1, 1), mean, jnp.float32)
        rstd_ref[...] = jnp.full((1, 1, 1), lax.rsqrt(var + eps), jnp.float32)


def _gn_res_kernel(z_ref, mean_ref, rstd_ref, g_ref, bta_ref, res_ref, o_ref):
    # GroupNorm apply (precomputed stats) + per-channel affine + residual add.
    o_ref[0] = ((z_ref[0] - mean_ref[0]) * rstd_ref[0] * g_ref[...]
                + bta_ref[...] + res_ref[0])


def _gn_mm_kernel(x_ref, mean_ref, rstd_ref, g_ref, bta_ref, w_ref, o_ref):
    # Fused GroupNorm-apply + 1x1 conv (channel-last matmul).
    xn = (x_ref[0] - mean_ref[0]) * rstd_ref[0] * g_ref[...] + bta_ref[...]
    o_ref[0] = jnp.dot(xn.astype(jnp.bfloat16), w_ref[...],
                       preferred_element_type=jnp.float32)


def _prelu_conv_kernel(x_ref, a_ref, w_ref, b_ref, o_ref):
    # Fused PReLU + 1x1 conv2d (per-speaker output slice chosen by the grid).
    x = x_ref[0]
    a = a_ref[...]
    xp = jnp.where(x >= 0.0, x, a * x)
    o_ref[0] = (jnp.dot(xp.astype(jnp.bfloat16), w_ref[0],
                        preferred_element_type=jnp.float32) + b_ref[0])


def _gated_end_kernel(x_ref, wog_ref, bog_ref, we_ref, o_ref):
    # Fused tanh(xWo+bo) * sigmoid(xWg+bg) (single [N,2N] GEMM), end conv, ReLU.
    x = x_ref[...].astype(jnp.bfloat16)
    n = wog_ref.shape[1] // 2
    tg = (jnp.dot(x, wog_ref[...], preferred_element_type=jnp.float32)
          + bog_ref[...])
    y = (jnp.tanh(tg[:, :n]) * jax.nn.sigmoid(tg[:, n:])).astype(jnp.bfloat16)
    o_ref[...] = jnp.maximum(
        jnp.dot(y, we_ref[...], preferred_element_type=jnp.float32), 0.0)


# ---------------------------- kernel wrappers ----------------------------

def lstm_time_major(x_tm, wx, wh, b):
    """x_tm: [T, R, Fin] (time-major).  Returns hidden states [T, R, F] in bf16."""
    T, R, Fin = x_tm.shape
    F4 = wx.shape[1]
    F = F4 // 4
    TC = _pick_div(T, 32)
    per_row = TC * (8 * Fin + 4 * F4 + 4 * F) + 8 * F
    tr_t = max(16, min(1024, (6 * 1024 * 1024) // max(per_row, 1)))
    tr_t = max(16, (tr_t // 16) * 16)
    TR = _pick_tile(R, tr_t, mult=16)
    if TR == R and R >= 32 and (R // 2) % 16 == 0:
        TR = R // 2                 # >=2 row tiles so both v7x TensorCores are used
    unroll = TC if TC <= 8 else 4
    kern = functools.partial(_lstm_kernel, unroll=unroll)
    return pl.pallas_call(
        kern,
        out_shape=jax.ShapeDtypeStruct((T, R, F), jnp.bfloat16),
        grid=(R // TR, T // TC),
        in_specs=[pl.BlockSpec((TC, TR, Fin), lambda i, j: (j, i, 0)),
                  pl.BlockSpec((Fin, F4), lambda i, j: (0, 0)),
                  pl.BlockSpec((1, F4), lambda i, j: (0, 0)),
                  pl.BlockSpec((F, F4), lambda i, j: (0, 0))],
        out_specs=pl.BlockSpec((TC, TR, F), lambda i, j: (j, i, 0)),
        scratch_shapes=[pltpu.VMEM((TC, TR, F4), jnp.float32),
                        pltpu.VMEM((TR, F), jnp.bfloat16),
                        pltpu.VMEM((TR, F), jnp.float32)],
        # time axis carries h/c state -> must stay innermost & "arbitrary"
        compiler_params=_cparams("parallel", "arbitrary"),
    )(x_tm, wx, b, wh)


def lin_stats(y_cl, w, b, eps=_EPS):
    """z = y_cl @ w + b (row-tiled) plus per-batch mean / rstd of z."""
    B, ST, F = y_cl.shape
    N = w.shape[1]
    TR = _row_tiles(ST, (F + N) * 4, mult=16)
    kern = functools.partial(_lin_stats_kernel, float(ST * N), float(eps))
    return pl.pallas_call(
        kern,
        out_shape=(jax.ShapeDtypeStruct((B, ST, N), jnp.float32),
                   jax.ShapeDtypeStruct((B, 1, 1), jnp.float32),
                   jax.ShapeDtypeStruct((B, 1, 1), jnp.float32)),
        grid=(B, ST // TR),
        in_specs=[pl.BlockSpec((1, TR, F), lambda b_, i: (b_, i, 0)),
                  pl.BlockSpec((F, N), lambda b_, i: (0, 0)),
                  pl.BlockSpec((1, N), lambda b_, i: (0, 0))],
        out_specs=(pl.BlockSpec((1, TR, N), lambda b_, i: (b_, i, 0)),
                   pl.BlockSpec((1, 1, 1), lambda b_, i: (b_, 0, 0)),
                   pl.BlockSpec((1, 1, 1), lambda b_, i: (b_, 0, 0))),
        scratch_shapes=[pltpu.SMEM((2,), jnp.float32)],
        compiler_params=_cparams("parallel", "arbitrary"),
    )(y_cl, w, b)


def gn_stats(x_cl, eps=_EPS):
    B, L, C = x_cl.shape
    TR = _row_tiles(L, C * 4)
    kern = functools.partial(_stats_kernel, float(L * C), float(eps))
    return pl.pallas_call(
        kern,
        out_shape=(jax.ShapeDtypeStruct((B, 1, 1), jnp.float32),
                   jax.ShapeDtypeStruct((B, 1, 1), jnp.float32)),
        grid=(B, L // TR),
        in_specs=[pl.BlockSpec((1, TR, C), lambda b_, i: (b_, i, 0))],
        out_specs=(pl.BlockSpec((1, 1, 1), lambda b_, i: (b_, 0, 0)),
                   pl.BlockSpec((1, 1, 1), lambda b_, i: (b_, 0, 0))),
        scratch_shapes=[pltpu.SMEM((2,), jnp.float32)],
        compiler_params=_cparams("parallel", "arbitrary"),
    )(x_cl)


def gn_apply_matmul(x_cl, mean, rstd, gamma, beta, w):
    B, L, C = x_cl.shape
    N = w.shape[1]
    TR = _row_tiles(L, (C + N) * 4)
    return pl.pallas_call(
        _gn_mm_kernel,
        out_shape=jax.ShapeDtypeStruct((B, L, N), jnp.float32),
        grid=(B, L // TR),
        in_specs=[pl.BlockSpec((1, TR, C), lambda b_, i: (b_, i, 0)),
                  pl.BlockSpec((1, 1, 1), lambda b_, i: (b_, 0, 0)),
                  pl.BlockSpec((1, 1, 1), lambda b_, i: (b_, 0, 0)),
                  pl.BlockSpec((1, C), lambda b_, i: (0, 0)),
                  pl.BlockSpec((1, C), lambda b_, i: (0, 0)),
                  pl.BlockSpec((C, N), lambda b_, i: (0, 0))],
        out_specs=pl.BlockSpec((1, TR, N), lambda b_, i: (b_, i, 0)),
        compiler_params=_cparams("parallel", "parallel"),
    )(x_cl, mean, rstd, gamma, beta, w)


def gn_residual(z, mean, rstd, gamma, beta, res):
    B, ST, N = z.shape
    TR = _row_tiles(ST, 3 * N * 4)
    return pl.pallas_call(
        _gn_res_kernel,
        out_shape=jax.ShapeDtypeStruct((B, ST, N), jnp.float32),
        grid=(B, ST // TR),
        in_specs=[pl.BlockSpec((1, TR, N), lambda b_, i: (b_, i, 0)),
                  pl.BlockSpec((1, 1, 1), lambda b_, i: (b_, 0, 0)),
                  pl.BlockSpec((1, 1, 1), lambda b_, i: (b_, 0, 0)),
                  pl.BlockSpec((1, N), lambda b_, i: (0, 0)),
                  pl.BlockSpec((1, N), lambda b_, i: (0, 0)),
                  pl.BlockSpec((1, TR, N), lambda b_, i: (b_, i, 0))],
        out_specs=pl.BlockSpec((1, TR, N), lambda b_, i: (b_, i, 0)),
        compiler_params=_cparams("parallel", "parallel"),
    )(z, mean, rstd, gamma, beta, res)


def prelu_conv2d(x_cl, a, w3, b3, num_spks):
    """Fused PReLU + 1x1 conv2d.  x_cl: [B, ST, N] -> [B*spks, ST, Nout]."""
    B, ST, N = x_cl.shape
    Nout = w3.shape[2]
    TR = _row_tiles(ST, (N + Nout) * 4)
    return pl.pallas_call(
        _prelu_conv_kernel,
        out_shape=jax.ShapeDtypeStruct((B * num_spks, ST, Nout), jnp.float32),
        grid=(B, num_spks, ST // TR),
        in_specs=[pl.BlockSpec((1, TR, N), lambda b_, s, i: (b_, i, 0)),
                  pl.BlockSpec((1, 1), lambda b_, s, i: (0, 0)),
                  pl.BlockSpec((1, N, Nout), lambda b_, s, i: (s, 0, 0)),
                  pl.BlockSpec((1, 1, Nout), lambda b_, s, i: (s, 0, 0))],
        out_specs=pl.BlockSpec(
            (1, TR, Nout), lambda b_, s, i: (b_ * num_spks + s, i, 0)),
        compiler_params=_cparams("parallel", "parallel", "parallel"),
    )(x_cl, a, w3, b3)


def gated_end(x, wog, bog, we):
    """Fused tanh/sigmoid gated output + end 1x1 conv + ReLU."""
    R, N = x.shape
    N2 = wog.shape[1]
    Cout = we.shape[1]
    TR = _row_tiles(R, (N + N2 + Cout) * 4)
    return pl.pallas_call(
        _gated_end_kernel,
        out_shape=jax.ShapeDtypeStruct((R, Cout), jnp.float32),
        grid=(R // TR,),
        in_specs=[pl.BlockSpec((TR, N), lambda i: (i, 0)),
                  pl.BlockSpec((N, N2), lambda i: (0, 0)),
                  pl.BlockSpec((1, N2), lambda i: (0, 0)),
                  pl.BlockSpec((N, Cout), lambda i: (0, 0))],
        out_specs=pl.BlockSpec((TR, Cout), lambda i: (i, 0)),
        compiler_params=_cparams("parallel"),
    )(x, wog, bog, we)


# ---------------------------- weight packing (done once, outside the forward) ----------------------------

def _block_diag(w, k):
    a, b = w.shape
    eye = jnp.eye(k, dtype=w.dtype)
    return (eye[:, None, :, None] * w[None, :, None, :]).reshape(k * a, k * b)


def _pack_lstm_dense(p):
    wx = jnp.concatenate([p['wxi'], p['wxf'], p['wxg'], p['wxo']], axis=1)
    wh = jnp.concatenate([p['whi'], p['whf'], p['whg'], p['who']], axis=1)
    b = jnp.concatenate([p['bi'], p['bf'], p['bg'], p['bo']], axis=1)
    return wx, wh, b


def _pack_lstm_bd(p, k):
    """Block-diagonal packing: all k groups run in the lane axis of one LSTM."""
    wx = jnp.concatenate([_block_diag(p[n], k) for n in ('wxi', 'wxf', 'wxg', 'wxo')],
                         axis=1)
    wh = jnp.concatenate([_block_diag(p[n], k) for n in ('whi', 'whf', 'whg', 'who')],
                         axis=1)
    b = jnp.concatenate([jnp.tile(p[n], (1, k)) for n in ('bi', 'bf', 'bg', 'bo')],
                        axis=1)
    return wx, wh, b


def pack_params(raw, group_num, num_spks):
    """Pre-pack / pre-cast every weight once so the jitted forward does zero prep."""
    Kg = group_num

    def pack_path(lstm, lin_w, lin_b, norm_w, norm_b, block_diag_lstm):
        if block_diag_lstm:
            wx, wh, b = _pack_lstm_bd(lstm, Kg)
        else:
            wx, wh, b = _pack_lstm_dense(lstm)
        return dict(
            wx=wx.astype(jnp.bfloat16), wh=wh.astype(jnp.bfloat16),
            b=b.astype(jnp.float32),
            lin_w=_block_diag(lin_w, Kg).astype(jnp.bfloat16),
            lin_b=jnp.tile(lin_b.reshape(1, -1), (1, Kg)).astype(jnp.float32),
            gamma=norm_w.reshape(1, -1).astype(jnp.float32),
            beta=norm_b.reshape(1, -1).astype(jnp.float32))

    blocks = []
    for bp in raw['blocks']:
        blocks.append(dict(
            a=pack_path(bp['ig_lstm'], bp['ig_lin_w'], bp['ig_lin_b'],
                        bp['ig_norm_w'], bp['ig_norm_b'], False),
            b=pack_path(bp['ib_lstm'], bp['ib_lin_w'], bp['ib_lin_b'],
                        bp['ib_norm_w'], bp['ib_norm_b'], True),
            c=pack_path(bp['ir_lstm'], bp['ir_lin_w'], bp['ir_lin_b'],
                        bp['ir_norm_w'], bp['ir_norm_b'], True)))

    out_ch = raw['conv1d_w'].shape[1]
    nout = raw['conv2d_w'].shape[1] // num_spks
    w2 = jnp.transpose(raw['conv2d_w'].reshape(out_ch, num_spks, nout), (1, 0, 2))
    return dict(
        norm_w=raw['norm_w'].reshape(1, -1).astype(jnp.float32),
        norm_b=raw['norm_b'].reshape(1, -1).astype(jnp.float32),
        conv1d_w=raw['conv1d_w'].astype(jnp.bfloat16),
        blocks=blocks,
        prelu_a=jnp.reshape(raw['prelu_a'], (1, 1)).astype(jnp.float32),
        conv2d_w=w2.astype(jnp.bfloat16),
        conv2d_b=raw['conv2d_b'].reshape(num_spks, 1, nout).astype(jnp.float32),
        out_gate_w=jnp.concatenate([raw['out_w'], raw['gate_w']],
                                   axis=1).astype(jnp.bfloat16),
        out_gate_b=jnp.concatenate([raw['out_b'], raw['gate_b']]).reshape(1, -1)
            .astype(jnp.float32),
        end_w=raw['end_w'].astype(jnp.bfloat16))


# ---------------------------- model glue (channel-last) ----------------------------

def _segmentation_cl(x, K):
    """x: [B, L, N] channel-last -> ([B, S, K, N], gap)."""
    B, L, N = x.shape
    P = K // 2
    gap = K - (P + L % K) % K
    if gap > 0:
        x = jnp.pad(x, ((0, 0), (0, gap), (0, 0)))
    x = jnp.pad(x, ((0, 0), (P, P), (0, 0)))
    s2 = (x.shape[1] - P) // K
    x1 = x[:, :-P, :].reshape(B, s2, K, N)
    x2 = x[:, P:, :].reshape(B, s2, K, N)
    seg = jnp.concatenate([x1[:, :, None], x2[:, :, None]], axis=2)
    return seg.reshape(B, 2 * s2, K, N), gap


def _over_add_cl(x, gap):
    """x: [B', S, K, N] channel-last -> [B', L, N]."""
    Bp, S, K, N = x.shape
    P = K // 2
    x = x.reshape(Bp, S // 2, 2 * K, N)
    p1 = x[:, :, :K, :].reshape(Bp, -1, N)[:, P:, :]
    p2 = x[:, :, K:, :].reshape(Bp, -1, N)[:, :-P, :]
    out = p1 + p2
    if gap > 0:
        out = out[:, :-gap, :]
    return out


def block_forward(xc, p, B, S, T, Kg):
    """Grouo_Comm_Dual_RNN_Block.  xc: [B, S*T, N] channel-last -> same shape."""
    N = xc.shape[-1]
    M = N // Kg
    ST = S * T

    def run_path(x_tm, pp, res, reorder):
        y = lstm_time_major(x_tm, pp['wx'], pp['wh'], pp['b'])       # fused x-proj + LSTM
        y_cl = reorder(y)                                            # [B, ST, F] (bf16)
        z, mean, rstd = lin_stats(y_cl, pp['lin_w'], pp['lin_b'])    # linear + GN stats
        return gn_residual(z, mean, rstd, pp['gamma'], pp['beta'], res)

    # ---- inter-group path: sequence over the Kg groups -------------------------
    x_tm = jnp.transpose(xc.reshape(B * ST, Kg, M), (1, 0, 2))       # [Kg, B*ST, M]
    out_a = run_path(x_tm, p['a'], xc,
                     lambda y: jnp.transpose(y, (1, 0, 2)).reshape(B, ST, -1))

    # ---- intra-block path: sequence over T (groups packed into lanes) ----------
    x_tm = jnp.transpose(out_a.reshape(B, S, T, N), (2, 0, 1, 3)).reshape(T, B * S, N)
    out_b = run_path(x_tm, p['b'], out_a,
                     lambda y: jnp.transpose(y, (1, 0, 2)).reshape(B, ST, -1))

    # ---- inter-block path: sequence over S (groups packed into lanes) ----------
    x_tm = jnp.transpose(out_b.reshape(B, S, T, N), (1, 0, 2, 3)).reshape(S, B * T, N)
    out_c = run_path(x_tm, p['c'], out_b,
                     lambda y: jnp.transpose(
                         y.reshape(S, B, T, -1), (1, 0, 2, 3)).reshape(B, ST, -1))
    return out_c


def dprnn_forward(params, x, *, K_chunk, num_spks, group_num):
    """Dual_Path_RNN forward.  x: [B, in_ch, L] -> [num_spks, B, in_ch, L]."""
    B, Cin, L = x.shape
    x_cl = jnp.transpose(x, (0, 2, 1))                               # [B, L, Cin]
    mean, rstd = gn_stats(x_cl)                                      # GroupNorm(1,Cin)
    x_cl = gn_apply_matmul(x_cl, mean, rstd, params['norm_w'], params['norm_b'],
                           params['conv1d_w'])                       # fused norm + conv1d
    xseg, gap = _segmentation_cl(x_cl, K_chunk)                      # [B, S, K, N]
    _, S, T, N = xseg.shape
    xc = xseg.reshape(B, S * T, N)

    for bp in params['blocks']:
        xc = block_forward(xc, bp, B, S, T, group_num)

    y = prelu_conv2d(xc, params['prelu_a'], params['conv2d_w'],
                     params['conv2d_b'], num_spks)                   # [B*spks, S*T, N]
    y = _over_add_cl(y.reshape(B * num_spks, S, T, N), gap)          # [B*spks, L, N]
    Bp, L2, _ = y.shape
    y = gated_end(y.reshape(Bp * L2, N), params['out_gate_w'], params['out_gate_b'],
                  params['end_w'])
    y = y.reshape(B, num_spks, L2, Cin)
    return jnp.transpose(y, (1, 0, 3, 2))                            # [spks, B, Cin, L]


# ---------------------------- deterministic parameter init ----------------------------

def init_params(key, in_ch, out_ch, hid_ch, group_num, num_layers, num_spks):
    counter = [0]

    def rnd(shape, scale=0.1):
        counter[0] += 1
        k = jax.random.fold_in(key, counter[0])
        return (scale * jax.random.normal(k, shape)).astype(jnp.float32)

    M = out_ch // group_num
    H = hid_ch // group_num

    def init_lstm():
        return dict(
            wxi=rnd((M, H)), wxf=rnd((M, H)), wxg=rnd((M, H)), wxo=rnd((M, H)),
            whi=rnd((H, H)), whf=rnd((H, H)), whg=rnd((H, H)), who=rnd((H, H)),
            bi=rnd((1, H)), bf=rnd((1, H)), bg=rnd((1, H)), bo=rnd((1, H)))

    def init_block():
        return dict(
            ig_lstm=init_lstm(), ig_lin_w=rnd((H, M)), ig_lin_b=rnd((M,)),
            ig_norm_w=jnp.ones((out_ch,), jnp.float32) + rnd((out_ch,), 0.01),
            ig_norm_b=rnd((out_ch,), 0.01),
            ib_lstm=init_lstm(), ib_lin_w=rnd((H, M)), ib_lin_b=rnd((M,)),
            ib_norm_w=jnp.ones((out_ch,), jnp.float32) + rnd((out_ch,), 0.01),
            ib_norm_b=rnd((out_ch,), 0.01),
            ir_lstm=init_lstm(), ir_lin_w=rnd((H, M)), ir_lin_b=rnd((M,)),
            ir_norm_w=jnp.ones((out_ch,), jnp.float32) + rnd((out_ch,), 0.01),
            ir_norm_b=rnd((out_ch,), 0.01))

    return dict(
        norm_w=jnp.ones((in_ch,), jnp.float32) + rnd((in_ch,), 0.01),
        norm_b=rnd((in_ch,), 0.01),
        conv1d_w=rnd((in_ch, out_ch)),                 # conv1d 1x1, bias=False
        blocks=[init_block() for _ in range(num_layers)],
        prelu_a=jnp.float32(0.25),                     # PReLU default init
        conv2d_w=rnd((out_ch, out_ch * num_spks)),     # conv2d 1x1 + bias
        conv2d_b=rnd((out_ch * num_spks,)),
        out_w=rnd((out_ch, out_ch)), out_b=rnd((out_ch,)),
        gate_w=rnd((out_ch, out_ch)), gate_b=rnd((out_ch,)),
        end_w=rnd((out_ch, in_ch)))                    # end_conv1x1, bias=False


# ---------------------------- main ----------------------------

if __name__ == "__main__":
    # Small, module-consistent shapes.
    B, IN_CH, L = 2, 8, 20
    OUT_CH, HID_CH = 16, 16
    GROUP_NUM, NUM_LAYERS, K_CHUNK, NUM_SPKS = 4, 2, 8, 2

    key = jax.random.PRNGKey(0)
    kx, kp = jax.random.split(key)
    x = jax.random.normal(kx, (B, IN_CH, L), dtype=jnp.float32)
    raw = init_params(kp, IN_CH, OUT_CH, HID_CH, GROUP_NUM, NUM_LAYERS, NUM_SPKS)
    params = pack_params(raw, GROUP_NUM, NUM_SPKS)     # packed / bf16 weights, once

    fwd = jax.jit(functools.partial(dprnn_forward, K_chunk=K_CHUNK,
                                    num_spks=NUM_SPKS, group_num=GROUP_NUM))
    out = jax.block_until_ready(fwd(params, x))

    assert out.shape == (NUM_SPKS, B, IN_CH, L), out.shape
    assert bool(jnp.all(jnp.isfinite(out)))
    print("KERNEL_OK")
</pallas_src>

<mosaic_0001>
module attributes {stable_mosaic.version = 11 : i64} {
  func.func @_stats_kernel(%arg0: i32, %arg1: i32, %arg2: memref<1x20x8xf32, #tpu.memory_space<vmem>>, %arg3: memref<1x1x1xf32, #tpu.memory_space<vmem>>, %arg4: memref<1x1x1xf32, #tpu.memory_space<vmem>>, %arg5: memref<2xf32, #tpu.memory_space<smem>>) attributes {dimension_semantics = [#tpu.dimension_semantics<parallel>, #tpu.dimension_semantics<arbitrary>], iteration_bounds = array<i64: 2, 1>, scalar_prefetch = 0 : i64, scratch_operands = 1 : i64, tpu.core_type = #tpu.core_type<tc>, window_params = [{transform_indices = @transform_0, window_bounds = array<i64: 1, 20, 8>}, {transform_indices = @transform_1, window_bounds = array<i64: 1, 1, 1>}, {transform_indices = @transform_2, window_bounds = array<i64: 1, 1, 1>}]} {
    %c0_i32 = arith.constant 0 : i32
    %0 = arith.cmpi eq, %arg1, %c0_i32 : i32
    %1 = arith.extui %0 : i1 to i32
    %c0_i32_0 = arith.constant 0 : i32
    %2 = arith.cmpi ne, %1, %c0_i32_0 : i32
    scf.if %2 {
      %cst_9 = arith.constant 0.000000e+00 : f32
      %c0_10 = arith.constant 0 : index
      %22 = memref.load %arg5[%c0_10] : memref<2xf32, #tpu.memory_space<smem>>
      memref.store %cst_9, %arg5[%c0_10] : memref<2xf32, #tpu.memory_space<smem>>
      %cst_11 = arith.constant 0.000000e+00 : f32
      %c1_12 = arith.constant 1 : index
      %23 = memref.load %arg5[%c1_12] : memref<2xf32, #tpu.memory_space<smem>>
      memref.store %cst_11, %arg5[%c1_12] : memref<2xf32, #tpu.memory_space<smem>>
    } else {
    }
    %c0 = arith.constant 0 : index
    %c0_1 = arith.constant 0 : index
    %c0_2 = arith.constant 0 : index
    %3 = vector.load %arg2[%c0, %c0_1, %c0_2] : memref<1x20x8xf32, #tpu.memory_space<vmem>>, vector<1x20x8xf32>
    %c0_3 = arith.constant 0 : index
    %4 = memref.load %arg5[%c0_3] : memref<2xf32, #tpu.memory_space<smem>>
    %5 = vector.shape_cast %3 : vector<1x20x8xf32> to vector<1x1x20x8xf32>
    %cst = arith.constant dense<0.000000e+00> : vector<1xf32>
    %6 = vector.multi_reduction <add>, %5, %cst [1, 2, 3] : vector<1x1x20x8xf32> to vector<1xf32>
    %7 = vector.shape_cast %6 : vector<1xf32> to vector<1x1x1x1xf32>
    %8 = vector.extract %7[0, 0, 0, 0] : f32 from vector<1x1x1x1xf32>
    %9 = arith.addf %4, %8 : f32
    %c0_4 = arith.constant 0 : index
    %10 = memref.load %arg5[%c0_4] : memref<2xf32, #tpu.memory_space<smem>>
    memref.store %9, %arg5[%c0_4] : memref<2xf32, #tpu.memory_space<smem>>
    %c1 = arith.constant 1 : index
    %11 = memref.load %arg5[%c1] : memref<2xf32, #tpu.memory_space<smem>>
    %12 = arith.mulf %3, %3 : vector<1x20x8xf32>
    %13 = vector.shape_cast %12 : vector<1x20x8xf32> to vector<1x1x20x8xf32>
    %cst_5 = arith.constant dense<0.000000e+00> : vector<1xf32>
    %14 = vector.multi_reduction <add>, %13, %cst_5 [1, 2, 3] : vector<1x1x20x8xf32> to vector<1xf32>
    %15 = vector.shape_cast %14 : vector<1xf32> to vector<1x1x1x1xf32>
    %16 = vector.extract %15[0, 0, 0, 0] : f32 from vector<1x1x1x1xf32>
    %17 = arith.addf %11, %16 : f32
    %c1_6 = arith.constant 1 : index
    %18 = memref.load %arg5[%c1_6] : memref<2xf32, #tpu.memory_space<smem>>
    memref.store %17, %arg5[%c1_6] : memref<2xf32, #tpu.memory_space<smem>>
    %c0_i32_7 = arith.constant 0 : i32
    %19 = arith.cmpi eq, %arg1, %c0_i32_7 : i32
    %20 = arith.extui %19 : i1 to i32
    %c0_i32_8 = arith.constant 0 : i32
    %21 = arith.cmpi ne, %20, %c0_i32_8 : i32
    scf.if %21 {
      %c0_9 = arith.constant 0 : index
      %22 = memref.load %arg5[%c0_9] : memref<2xf32, #tpu.memory_space<smem>>
      %cst_10 = arith.constant 1.600000e+02 : f32
      %23 = arith.divf %22, %cst_10 : f32
      %c1_11 = arith.constant 1 : index
      %24 = memref.load %arg5[%c1_11] : memref<2xf32, #tpu.memory_space<smem>>
      %cst_12 = arith.constant 1.600000e+02 : f32
      %25 = arith.divf %24, %cst_12 : f32
      %26 = arith.mulf %23, %23 : f32
      %27 = arith.subf %25, %26 : f32
      %cst_13 = arith.constant 0.000000e+00 : f32
      %28 = arith.maximumf %27, %cst_13 : f32
      %29 = vector.broadcast %23 : f32 to vector<1x1x1xf32>
      %c0_14 = arith.constant 0 : index
      %c0_15 = arith.constant 0 : index
      %c0_16 = arith.constant 0 : index
      %30 = vector.load %arg3[%c0_14, %c0_15, %c0_16] : memref<1x1x1xf32, #tpu.memory_space<vmem>>, vector<1x1x1xf32>
      tpu.vector_store %arg3[%c0_14, %c0_15, %c0_16], %29 {strides = array<i32>} : memref<1x1x1xf32, #tpu.memory_space<vmem>>, vector<1x1x1xf32>,
      %cst_17 = arith.constant 9.99999993E-9 : f32
      %31 = arith.addf %28, %cst_17 : f32
      %32 = math.rsqrt %31 : f32
      %33 = vector.broadcast %32 : f32 to vector<1x1x1xf32>
      %c0_18 = arith.constant 0 : index
      %c0_19 = arith.constant 0 : index
      %c0_20 = arith.constant 0 : index
      %34 = vector.load %arg4[%c0_18, %c0_19, %c0_20] : memref<1x1x1xf32, #tpu.memory_space<vmem>>, vector<1x1x1xf32>
      tpu.vector_store %arg4[%c0_18, %c0_19, %c0_20], %33 {strides = array<i32>} : memref<1x1x1xf32, #tpu.memory_space<vmem>>, vector<1x1x1xf32>,
    } else {
    }
    return
  }
  func.func @transform_0(%arg0: i32, %arg1: i32) -> (i32, i32, i32) {
    %c0_i32 = arith.constant 0 : i32
    %c0_i32_0 = arith.constant 0 : i32
    return %arg0, %arg1, %c0_i32 : i32, i32, i32
  }
  func.func @transform_1(%arg0: i32, %arg1: i32) -> (i32, i32, i32) {
    %c0_i32 = arith.constant 0 : i32
    %c0_i32_0 = arith.constant 0 : i32
    %c0_i32_1 = arith.constant 0 : i32
    return %arg0, %c0_i32, %c0_i32_0 : i32, i32, i32
  }
  func.func @transform_2(%arg0: i32, %arg1: i32) -> (i32, i32, i32) {
    %c0_i32 = arith.constant 0 : i32
    %c0_i32_0 = arith.constant 0 : i32
    %c0_i32_1 = arith.constant 0 : i32
    return %arg0, %c0_i32, %c0_i32_0 : i32, i32, i32
  }
}

module attributes {stable_mosaic.version = 11 : i64} {
  func.func @_gn_mm_kernel(%arg0: i32, %arg1: i32, %arg2: memref<1x20x8xf32, #tpu.memory_space<vmem>>, %arg3: memref<1x1x1xf32, #tpu.memory_space<vmem>>, %arg4: memref<1x1x1xf32, #tpu.memory_space<vmem>>, %arg5: memref<1x8xf32, #tpu.memory_space<vmem>>, %arg6: memref<1x8xf32, #tpu.memory_space<vmem>>, %arg7: memref<8x16xbf16, #tpu.memory_space<vmem>>, %arg8: memref<1x20x16xf32, #tpu.memory_space<vmem>>) attributes {dimension_semantics = [#tpu.dimension_semantics<parallel>, #tpu.dimension_semantics<parallel>], iteration_bounds = array<i64: 2, 1>, scalar_prefetch = 0 : i64, scratch_operands = 0 : i64, tpu.core_type = #tpu.core_type<tc>, window_params = [{transform_indices = @transform_0, window_bounds = array<i64: 1, 20, 8>}, {transform_indices = @transform_1, window_bounds = array<i64: 1, 1, 1>}, {transform_indices = @transform_2, window_bounds = array<i64: 1, 1, 1>}, {pipeline_mode = #tpu.pipeline_mode<synchronous>, transform_indices = @transform_3, window_bounds = array<i64: 1, 8>}, {pipeline_mode = #tpu.pipeline_mode<synchronous>, transform_indices = @transform_4, window_bounds = array<i64: 1, 8>}, {pipeline_mode = #tpu.pipeline_mode<synchronous>, transform_indices = @transform_5, window_bounds = array<i64: 8, 16>}, {transform_indices = @transform_6, window_bounds = array<i64: 1, 20, 16>}]} {
    %c0 = arith.constant 0 : index
    %c0_0 = arith.constant 0 : index
    %c0_1 = arith.constant 0 : index
    %0 = vector.load %arg2[%c0, %c0_0, %c0_1] : memref<1x20x8xf32, #tpu.memory_space<vmem>>, vector<1x20x8xf32>
    %1 = vector.shape_cast %0 : vector<1x20x8xf32> to vector<20x8xf32>
    %c0_2 = arith.constant 0 : index
    %c0_3 = arith.constant 0 : index
    %c0_4 = arith.constant 0 : index
    %2 = vector.load %arg3[%c0_2, %c0_3, %c0_4] : memref<1x1x1xf32, #tpu.memory_space<vmem>>, vector<1x1x1xf32>
    %3 = vector.shape_cast %2 : vector<1x1x1xf32> to vector<1x1xf32>
    %4 = vector.broadcast %3 : vector<1x1xf32> to vector<20x8xf32>
    %5 = arith.subf %1, %4 : vector<20x8xf32>
    %c0_5 = arith.constant 0 : index
    %c0_6 = arith.constant 0 : index
    %c0_7 = arith.constant 0 : index
    %6 = vector.load %arg4[%c0_5, %c0_6, %c0_7] : memref<1x1x1xf32, #tpu.memory_space<vmem>>, vector<1x1x1xf32>
    %7 = vector.shape_cast %6 : vector<1x1x1xf32> to vector<1x1xf32>
    %8 = vector.broadcast %7 : vector<1x1xf32> to vector<20x8xf32>
    %9 = arith.mulf %5, %8 : vector<20x8xf32>
    %c0_8 = arith.constant 0 : index
    %c0_9 = arith.constant 0 : index
    %10 = vector.load %arg5[%c0_8, %c0_9] : memref<1x8xf32, #tpu.memory_space<vmem>>, vector<1x8xf32>
    %11 = vector.broadcast %10 : vector<1x8xf32> to vector<20x8xf32>
    %12 = arith.mulf %9, %11 : vector<20x8xf32>
    %c0_10 = arith.constant 0 : index
    %c0_11 = arith.constant 0 : index
    %13 = vector.load %arg6[%c0_10, %c0_11] : memref<1x8xf32, #tpu.memory_space<vmem>>, vector<1x8xf32>
    %14 = vector.broadcast %13 : vector<1x8xf32> to vector<20x8xf32>
    %15 = arith.addf %12, %14 : vector<20x8xf32>
    %16 = arith.truncf %15 : vector<20x8xf32> to vector<20x8xbf16>
    %c0_12 = arith.constant 0 : index
    %c0_13 = arith.constant 0 : index
    %17 = vector.load %arg7[%c0_12, %c0_13] : memref<8x16xbf16, #tpu.memory_space<vmem>>, vector<8x16xbf16>
    %cst = arith.constant dense<0.000000e+00> : vector<20x16xf32>
    %18 = tpu.matmul %16, %17, %cst {dimension_numbers = #tpu.dot_dimension_numbers<[1], [0], [0], [1], [0, 0, 1, 1], [], []>} : vector<20x8xbf16>, vector<8x16xbf16>, vector<20x16xf32> -> vector<20x16xf32>
    %c0_14 = arith.constant 0 : index
    %c0_15 = arith.constant 0 : index
    %c0_16 = arith.constant 0 : index
    %19 = vector.load %arg8[%c0_14, %c0_15, %c0_16] : memref<1x20x16xf32, #tpu.memory_space<vmem>>, vector<1x20x16xf32>
    %20 = vector.shape_cast %19 : vector<1x20x16xf32> to vector<20x16xf32>
    %21 = vector.shape_cast %18 : vector<20x16xf32> to vector<1x20x16xf32>
    tpu.vector_store %arg8[%c0_14, %c0_15, %c0_16], %21 {strides = array<i32>} : memref<1x20x16xf32, #tpu.memory_space<vmem>>, vector<1x20x16xf32>,
    return
  }
  func.func @transform_0(%arg0: i32, %arg1: i32) -> (i32, i32, i32) {
    %c0_i32 = arith.constant 0 : i32
    %c0_i32_0 = arith.constant 0 : i32
    return %arg0, %arg1, %c0_i32 : i32, i32, i32
  }
  func.func @transform_1(%arg0: i32, %arg1: i32) -> (i32, i32, i32) {
    %c0_i32 = arith.constant 0 : i32
    %c0_i32_0 = arith.constant 0 : i32
    %c0_i32_1 = arith.constant 0 : i32
    return %arg0, %c0_i32, %c0_i32_0 : i32, i32, i32
  }
  func.func @transform_2(%arg0: i32, %arg1: i32) -> (i32, i32, i32) {
    %c0_i32 = arith.constant 0 : i32
    %c0_i32_0 = arith.constant 0 : i32
    %c0_i32_1 = arith.constant 0 : i32
    return %arg0, %c0_i32, %c0_i32_0 : i32, i32, i32
  }
  func.func @transform_3(%arg0: i32, %arg1: i32) -> (i32, i32) {
    %c0_i32 = arith.constant 0 : i32
    %c0_i32_0 = arith.constant 0 : i32
    %c0_i32_1 = arith.constant 0 : i32
    return %c0_i32, %c0_i32_0 : i32, i32
  }
  func.func @transform_4(%arg0: i32, %arg1: i32) -> (i32, i32) {
    %c0_i32 = arith.constant 0 : i32
    %c0_i32_0 = arith.constant 0 : i32
    %c0_i32_1 = arith.constant 0 : i32
    return %c0_i32, %c0_i32_0 : i32, i32
  }
  func.func @transform_5(%arg0: i32, %arg1: i32) -> (i32, i32) {
    %c0_i32 = arith.constant 0 : i32
    %c0_i32_0 = arith.constant 0 : i32
    %c0_i32_1 = arith.constant 0 : i32
    return %c0_i32, %c0_i32_0 : i32, i32
  }
  func.func @transform_6(%arg0: i32, %arg1: i32) -> (i32, i32, i32) {
    %c0_i32 = arith.constant 0 : i32
    %c0_i32_0 = arith.constant 0 : i32
    return %arg0, %arg1, %c0_i32 : i32, i32, i32
  }
}

module attributes {stable_mosaic.version = 11 : i64} {
  func.func @_lstm_kernel(%arg0: i32, %arg1: i32, %arg2: memref<4x64x4xf32, #tpu.memory_space<vmem>>, %arg3: memref<4x16xbf16, #tpu.memory_space<vmem>>, %arg4: memref<1x16xf32, #tpu.memory_space<vmem>>, %arg5: memref<4x16xbf16, #tpu.memory_space<vmem>>, %arg6: memref<4x64x4xbf16, #tpu.memory_space<vmem>>, %arg7: memref<4x64x16xf32, #tpu.memory_space<vmem>>, %arg8: memref<64x4xbf16, #tpu.memory_space<vmem>>, %arg9: memref<64x4xf32, #tpu.memory_space<vmem>>) attributes {dimension_semantics = [#tpu.dimension_semantics<parallel>, #tpu.dimension_semantics<arbitrary>], iteration_bounds = array<i64: 2, 1>, scalar_prefetch = 0 : i64, scratch_operands = 3 : i64, tpu.core_type = #tpu.core_type<tc>, window_params = [{transform_indices = @transform_0, window_bounds = array<i64: 4, 64, 4>}, {pipeline_mode = #tpu.pipeline_mode<synchronous>, transform_indices = @transform_1, window_bounds = array<i64: 4, 16>}, {pipeline_mode = #tpu.pipeline_mode<synchronous>, transform_indices = @transform_2, window_bounds = array<i64: 1, 16>}, {pipeline_mode = #tpu.pipeline_mode<synchronous>, transform_indices = @transform_3, window_bounds = array<i64: 4, 16>}, {transform_indices = @transform_4, window_bounds = array<i64: 4, 64, 4>}]} {
    %c0_i32 = arith.constant 0 : i32
    %0 = arith.cmpi eq, %arg1, %c0_i32 : i32
    %1 = arith.extui %0 : i1 to i32
    %c0_i32_0 = arith.constant 0 : i32
    %2 = arith.cmpi ne, %1, %c0_i32_0 : i32
    scf.if %2 {
      %cst_53 = arith.constant 0.000000e+00 : bf16
      %158 = vector.broadcast %cst_53 : bf16 to vector<64x4xbf16>
      %c0_54 = arith.constant 0 : index
      %c0_55 = arith.constant 0 : index
      %159 = vector.load %arg8[%c0_54, %c0_55] : memref<64x4xbf16, #tpu.memory_space<vmem>>, vector<64x4xbf16>
      tpu.vector_store %arg8[%c0_54, %c0_55], %158 {strides = array<i32>} : memref<64x4xbf16, #tpu.memory_space<vmem>>, vector<64x4xbf16>,
      %cst_56 = arith.constant 0.000000e+00 : f32
      %160 = vector.broadcast %cst_56 : f32 to vector<64x4xf32>
      %c0_57 = arith.constant 0 : index
      %c0_58 = arith.constant 0 : index
      %161 = vector.load %arg9[%c0_57, %c0_58] : memref<64x4xf32, #tpu.memory_space<vmem>>, vector<64x4xf32>
      tpu.vector_store %arg9[%c0_57, %c0_58], %160 {strides = array<i32>} : memref<64x4xf32, #tpu.memory_space<vmem>>, vector<64x4xf32>,
    } else {
    }
    %c0 = arith.constant 0 : index
    %c0_1 = arith.constant 0 : index
    %c0_2 = arith.constant 0 : index
    %3 = vector.load %arg2[%c0, %c0_1, %c0_2] : memref<4x64x4xf32, #tpu.memory_space<vmem>>, vector<4x64x4xf32>
    %4 = vector.shape_cast %3 : vector<4x64x4xf32> to vector<256x4xf32>
    %5 = arith.truncf %4 : vector<256x4xf32> to vector<256x4xbf16>
    %c0_3 = arith.constant 0 : index
    %c0_4 = arith.constant 0 : index
    %6 = vector.load %arg3[%c0_3, %c0_4] : memref<4x16xbf16, #tpu.memory_space<vmem>>, vector<4x16xbf16>
    %cst = arith.constant dense<0.000000e+00> : vector<256x16xf32>
    %7 = tpu.matmul %5, %6, %cst {dimension_numbers = #tpu.dot_dimension_numbers<[1], [0], [0], [1], [0, 0, 1, 1], [], []>} : vector<256x4xbf16>, vector<4x16xbf16>, vector<256x16xf32> -> vector<256x16xf32>
    %c0_5 = arith.constant 0 : index
    %c0_6 = arith.constant 0 : index
    %8 = vector.load %arg4[%c0_5, %c0_6] : memref<1x16xf32, #tpu.memory_space<vmem>>, vector<1x16xf32>
    %9 = vector.broadcast %8 : vector<1x16xf32> to vector<256x16xf32>
    %10 = arith.addf %7, %9 : vector<256x16xf32>
    %11 = vector.shape_cast %10 : vector<256x16xf32> to vector<4x64x16xf32>
    %c0_7 = arith.constant 0 : index
    %c0_8 = arith.constant 0 : index
    %c0_9 = arith.constant 0 : index
    %12 = vector.load %arg7[%c0_7, %c0_8, %c0_9] : memref<4x64x16xf32, #tpu.memory_space<vmem>>, vector<4x64x16xf32>
    tpu.vector_store %arg7[%c0_7, %c0_8, %c0_9], %11 {strides = array<i32>} : memref<4x64x16xf32, #tpu.memory_space<vmem>>, vector<4x64x16xf32>,
    %c0_10 = arith.constant 0 : index
    %c0_11 = arith.constant 0 : index
    %13 = vector.load %arg5[%c0_10, %c0_11] : memref<4x16xbf16, #tpu.memory_space<vmem>>, vector<4x16xbf16>
    %c0_12 = arith.constant 0 : index
    %c0_13 = arith.constant 0 : index
    %14 = vector.load %arg8[%c0_12, %c0_13] : memref<64x4xbf16, #tpu.memory_space<vmem>>, vector<64x4xbf16>
    %c0_14 = arith.constant 0 : index
    %c0_15 = arith.constant 0 : index
    %15 = vector.load %arg9[%c0_14, %c0_15] : memref<64x4xf32, #tpu.memory_space<vmem>>, vector<64x4xf32>
    %c0_i32_16 = arith.constant 0 : i32
    %16 = arith.index_cast %c0_i32_16 : i32 to index
    %c0_17 = arith.constant 0 : index
    %c0_18 = arith.constant 0 : index
    %17 = vector.load %arg7[%16, %c0_17, %c0_18] : memref<4x64x16xf32, #tpu.memory_space<vmem>>, vector<1x64x16xf32>
    %18 = vector.shape_cast %17 : vector<1x64x16xf32> to vector<64x16xf32>
    %cst_19 = arith.constant dense<0.000000e+00> : vector<64x16xf32>
    %19 = tpu.matmul %14, %13, %cst_19 {dimension_numbers = #tpu.dot_dimension_numbers<[1], [0], [0], [1], [0, 0, 1, 1], [], []>} : vector<64x4xbf16>, vector<4x16xbf16>, vector<64x16xf32> -> vector<64x16xf32>
    %20 = arith.addf %18, %19 : vector<64x16xf32>
    %21 = vector.extract_strided_slice %20 {offsets = [0, 0], sizes = [64, 4], strides = [1, 1]} : vector<64x16xf32> to vector<64x4xf32>
    %22 = arith.negf %21 : vector<64x4xf32>
    %23 = math.exp %22 : vector<64x4xf32>
    %cst_20 = arith.constant 1.000000e+00 : f32
    %24 = vector.broadcast %cst_20 : f32 to vector<64x4xf32>
    %25 = arith.addf %24, %23 : vector<64x4xf32>
    %26 = arith.divf %24, %25 : vector<64x4xf32>
    %27 = vector.extract_strided_slice %20 {offsets = [0, 4], sizes = [64, 4], strides = [1, 1]} : vector<64x16xf32> to vector<64x4xf32>
    %28 = arith.negf %27 : vector<64x4xf32>
    %29 = math.exp %28 : vector<64x4xf32>
    %cst_21 = arith.constant 1.000000e+00 : f32
    %30 = vector.broadcast %cst_21 : f32 to vector<64x4xf32>
    %31 = arith.addf %30, %29 : vector<64x4xf32>
    %32 = arith.divf %30, %31 : vector<64x4xf32>
    %33 = vector.extract_strided_slice %20 {offsets = [0, 8], sizes = [64, 4], strides = [1, 1]} : vector<64x16xf32> to vector<64x4xf32>
    %34 = math.tanh %33 : vector<64x4xf32>
    %35 = vector.extract_strided_slice %20 {offsets = [0, 12], sizes = [64, 4], strides = [1, 1]} : vector<64x16xf32> to vector<64x4xf32>
    %36 = arith.negf %35 : vector<64x4xf32>
    %37 = math.exp %36 : vector<64x4xf32>
    %cst_22 = arith.constant 1.000000e+00 : f32
    %38 = vector.broadcast %cst_22 : f32 to vector<64x4xf32>
    %39 = arith.addf %38, %37 : vector<64x4xf32>
    %40 = arith.divf %38, %39 : vector<64x4xf32>
    %41 = arith.mulf %32, %15 : vector<64x4xf32>
    %42 = arith.mulf %26, %34 : vector<64x4xf32>
    %43 = arith.addf %41, %42 : vector<64x4xf32>
    %44 = math.tanh %43 : vector<64x4xf32>
    %45 = arith.mulf %40, %44 : vector<64x4xf32>
    %46 = arith.truncf %45 : vector<64x4xf32> to vector<64x4xbf16>
    %47 = arith.index_cast %c0_i32_16 : i32 to index
    %c0_23 = arith.constant 0 : index
    %c0_24 = arith.constant 0 : index
    %48 = vector.load %arg6[%47, %c0_23, %c0_24] : memref<4x64x4xbf16, #tpu.memory_space<vmem>>, vector<1x64x4xbf16>
    %49 = vector.shape_cast %48 : vector<1x64x4xbf16> to vector<64x4xbf16>
    %50 = vector.shape_cast %46 : vector<64x4xbf16> to vector<1x64x4xbf16>
    tpu.vector_store %arg6[%47, %c0_23, %c0_24], %50 {strides = array<i32>} : memref<4x64x4xbf16, #tpu.memory_space<vmem>>, vector<1x64x4xbf16>,
    %c1_i32 = arith.constant 1 : i32
    %51 = arith.index_cast %c1_i32 : i32 to index
    %c0_25 = arith.constant 0 : index
    %c0_26 = arith.constant 0 : index
    %52 = vector.load %arg7[%51, %c0_25, %c0_26] : memref<4x64x16xf32, #tpu.memory_space<vmem>>, vector<1x64x16xf32>
    %53 = vector.shape_cast %52 : vector<1x64x16xf32> to vector<64x16xf32>
    %cst_27 = arith.constant dense<0.000000e+00> : vector<64x16xf32>
    %54 = tpu.matmul %46, %13, %cst_27 {dimension_numbers = #tpu.dot_dimension_numbers<[1], [0], [0], [1], [0, 0, 1, 1], [], []>} : vector<64x4xbf16>, vector<4x16xbf16>, vector<64x16xf32> -> vector<64x16xf32>
    %55 = arith.addf %53, %54 : vector<64x16xf32>
    %56 = vector.extract_strided_slice %55 {offsets = [0, 0], sizes = [64, 4], strides = [1, 1]} : vector<64x16xf32> to vector<64x4xf32>
    %57 = arith.negf %56 : vector<64x4xf32>
    %58 = math.exp %57 : vector<64x4xf32>
    %cst_28 = arith.constant 1.000000e+00 : f32
    %59 = vector.broadcast %cst_28 : f32 to vector<64x4xf32>
    %60 = arith.addf %59, %58 : vector<64x4xf32>
    %61 = arith.divf %59, %60 : vector<64x4xf32>
    %62 = vector.extract_strided_slice %55 {offsets = [0, 4], sizes = [64, 4], strides = [1, 1]} : vector<64x16xf32> to vector<64x4xf32>
    %63 = arith.negf %62 : vector<64x4xf32>
    %64 = math.exp %63 : vector<64x4xf32>
    %cst_29 = arith.constant 1.000000e+00 : f32
    %65 = vector.broadcast %cst_29 : f32 to vector<64x4xf32>
    %66 = arith.addf %65, %64 : vector<64x4xf32>
    %67 = arith.divf %65, %66 : vector<64x4xf32>
    %68 = vector.extract_strided_slice %55 {offsets = [0, 8], sizes = [64, 4], strides = [1, 1]} : vector<64x16xf32> to vector<64x4xf32>
    %69 = math.tanh %68 : vector<64x4xf32>
    %70 = vector.extract_strided_slice %55 {offsets = [0, 12], sizes = [64, 4], strides = [1, 1]} : vector<64x16xf32> to vector<64x4xf32>
    %71 = arith.negf %70 : vector<64x4xf32>
    %72 = math.exp %71 : vector<64x4xf32>
    %cst_30 = arith.constant 1.000000e+00 : f32
    %73 = vector.broadcast %cst_30 : f32 to vector<64x4xf32>
    %74 = arith.addf %73, %72 : vector<64x4xf32>
    %75 = arith.divf %73, %74 : vector<64x4xf32>
    %76 = arith.mulf %67, %43 : vector<64x4xf32>
    %77 = arith.mulf %61, %69 : vector<64x4xf32>
    %78 = arith.addf %76, %77 : vector<64x4xf32>
    %79 = math.tanh %78 : vector<64x4xf32>
    %80 = arith.mulf %75, %79 : vector<64x4xf32>
    %81 = arith.truncf %80 : vector<64x4xf32> to vector<64x4xbf16>
    %82 = arith.index_cast %c1_i32 : i32 to index
    %c0_31 = arith.constant 0 : index
    %c0_32 = arith.constant 0 : index
    %83 = vector.load %arg6[%82, %c0_31, %c0_32] : memref<4x64x4xbf16, #tpu.memory_space<vmem>>, vector<1x64x4xbf16>
    %84 = vector.shape_cast %83 : vector<1x64x4xbf16> to vector<64x4xbf16>
    %85 = vector.shape_cast %81 : vector<64x4xbf16> to vector<1x64x4xbf16>
    tpu.vector_store %arg6[%82, %c0_31, %c0_32], %85 {strides = array<i32>} : memref<4x64x4xbf16, #tpu.memory_space<vmem>>, vector<1x64x4xbf16>,
    %c2_i32 = arith.constant 2 : i32
    %86 = arith.index_cast %c2_i32 : i32 to index
    %c0_33 = arith.constant 0 : index
    %c0_34 = arith.constant 0 : index
    %87 = vector.load %arg7[%86, %c0_33, %c0_34] : memref<4x64x16xf32, #tpu.memory_space<vmem>>, vector<1x64x16xf32>
    %88 = vector.shape_cast %87 : vector<1x64x16xf32> to vector<64x16xf32>
    %cst_35 = arith.constant dense<0.000000e+00> : vector<64x16xf32>
    %89 = tpu.matmul %81, %13, %cst_35 {dimension_numbers = #tpu.dot_dimension_numbers<[1], [0], [0], [1], [0, 0, 1, 1], [], []>} : vector<64x4xbf16>, vector<4x16xbf16>, vector<64x16xf32> -> vector<64x16xf32>
    %90 = arith.addf %88, %89 : vector<64x16xf32>
    %91 = vector.extract_strided_slice %90 {offsets = [0, 0], sizes = [64, 4], strides = [1, 1]} : vector<64x16xf32> to vector<64x4xf32>
    %92 = arith.negf %91 : vector<64x4xf32>
    %93 = math.exp %92 : vector<64x4xf32>
    %cst_36 = arith.constant 1.000000e+00 : f32
    %94 = vector.broadcast %cst_36 : f32 to vector<64x4xf32>
    %95 = arith.addf %94, %93 : vector<64x4xf32>
    %96 = arith.divf %94, %95 : vector<64x4xf32>
    %97 = vector.extract_strided_slice %90 {offsets = [0, 4], sizes = [64, 4], strides = [1, 1]} : vector<64x16xf32> to vector<64x4xf32>
    %98 = arith.negf %97 : vector<64x4xf32>
    %99 = math.exp %98 : vector<64x4xf32>
    %cst_37 = arith.constant 1.000000e+00 : f32
    %100 = vector.broadcast %cst_37 : f32 to vector<64x4xf32>
    %101 = arith.addf %100, %99 : vector<64x4xf32>
    %102 = arith.divf %100, %101 : vector<64x4xf32>
    %103 = vector.extract_strided_slice %90 {offsets = [0, 8], sizes = [64, 4], strides = [1, 1]} : vector<64x16xf32> to vector<64x4xf32>
    %104 = math.tanh %103 : vector<64x4xf32>
    %105 = vector.extract_strided_slice %90 {offsets = [0, 12], sizes = [64, 4], strides = [1, 1]} : vector<64x16xf32> to vector<64x4xf32>
    %106 = arith.negf %105 : vector<64x4xf32>
    %107 = math.exp %106 : vector<64x4xf32>
    %cst_38 = arith.constant 1.000000e+00 : f32
    %108 = vector.broadcast %cst_38 : f32 to vector<64x4xf32>
    %109 = arith.addf %108, %107 : vector<64x4xf32>
    %110 = arith.divf %108, %109 : vector<64x4xf32>
    %111 = arith.mulf %102, %78 : vector<64x4xf32>
    %112 = arith.mulf %96, %104 : vector<64x4xf32>
    %113 = arith.addf %111, %112 : vector<64x4xf32>
    %114 = math.tanh %113 : vector<64x4xf32>
    %115 = arith.mulf %110, %114 : vector<64x4xf32>
    %116 = arith.truncf %115 : vector<64x4xf32> to vector<64x4xbf16>
    %117 = arith.index_cast %c2_i32 : i32 to index
    %c0_39 = arith.constant 0 : index
    %c0_40 = arith.constant 0 : index
    %118 = vector.load %arg6[%117, %c0_39, %c0_40] : memref<4x64x4xbf16, #tpu.memory_space<vmem>>, vector<1x64x4xbf16>
    %119 = vector.shape_cast %118 : vector<1x64x4xbf16> to vector<64x4xbf16>
    %120 = vector.shape_cast %116 : vector<64x4xbf16> to vector<1x64x4xbf16>
    tpu.vector_store %arg6[%117, %c0_39, %c0_40], %120 {strides = array<i32>} : memref<4x64x4xbf16, #tpu.memory_space<vmem>>, vector<1x64x4xbf16>,
    %c3_i32 = arith.constant 3 : i32
    %121 = arith.index_cast %c3_i32 : i32 to index
    %c0_41 = arith.constant 0 : index
    %c0_42 = arith.constant 0 : index
    %122 = vector.load %arg7[%121, %c0_41, %c0_42] : memref<4x64x16xf32, #tpu.memory_space<vmem>>, vector<1x64x16xf32>
    %123 = vector.shape_cast %122 : vector<1x64x16xf32> to vector<64x16xf32>
    %cst_43 = arith.constant dense<0.000000e+00> : vector<64x16xf32>
    %124 = tpu.matmul %116, %13, %cst_43 {dimension_numbers = #tpu.dot_dimension_numbers<[1], [0], [0], [1], [0, 0, 1, 1], [], []>} : vector<64x4xbf16>, vector<4x16xbf16>, vector<64x16xf32> -> vector<64x16xf32>
    %125 = arith.addf %123, %124 : vector<64x16xf32>
    %126 = vector.extract_strided_slice %125 {offsets = [0, 0], sizes = [64, 4], strides = [1, 1]} : vector<64x16xf32> to vector<64x4xf32>
    %127 = arith.negf %126 : vector<64x4xf32>
    %128 = math.exp %127 : vector<64x4xf32>
    %cst_44 = arith.constant 1.000000e+00 : f32
    %129 = vector.broadcast %cst_44 : f32 to vector<64x4xf32>
    %130 = arith.addf %129, %128 : vector<64x4xf32>
    %131 = arith.divf %129, %130 : vector<64x4xf32>
    %132 = vector.extract_strided_slice %125 {offsets = [0, 4], sizes = [64, 4], strides = [1, 1]} : vector<64x16xf32> to vector<64x4xf32>
    %133 = arith.negf %132 : vector<64x4xf32>
    %134 = math.exp %133 : vector<64x4xf32>
    %cst_45 = arith.constant 1.000000e+00 : f32
    %135 = vector.broadcast %cst_45 : f32 to vector<64x4xf32>
    %136 = arith.addf %135, %134 : vector<64x4xf32>
    %137 = arith.divf %135, %136 : vector<64x4xf32>
    %138 = vector.extract_strided_slice %125 {offsets = [0, 8], sizes = [64, 4], strides = [1, 1]} : vector<64x16xf32> to vector<64x4xf32>
    %139 = math.tanh %138 : vector<64x4xf32>
    %140 = vector.extract_strided_slice %125 {offsets = [0, 12], sizes = [64, 4], strides = [1, 1]} : vector<64x16xf32> to vector<64x4xf32>
    %141 = arith.negf %140 : vector<64x4xf32>
    %142 = math.exp %141 : vector<64x4xf32>
    %cst_46 = arith.constant 1.000000e+00 : f32
    %143 = vector.broadcast %cst_46 : f32 to vector<64x4xf32>
    %144 = arith.addf %143, %142 : vector<64x4xf32>
    %145 = arith.divf %143, %144 : vector<64x4xf32>
    %146 = arith.mulf %137, %113 : vector<64x4xf32>
    %147 = arith.mulf %131, %139 : vector<64x4xf32>
    %148 = arith.addf %146, %147 : vector<64x4xf32>
    %149 = math.tanh %148 : vector<64x4xf32>
    %150 = arith.mulf %145, %149 : vector<64x4xf32>
    %151 = arith.truncf %150 : vector<64x4xf32> to vector<64x4xbf16>
    %152 = arith.index_cast %c3_i32 : i32 to index
    %c0_47 = arith.constant 0 : index
    %c0_48 = arith.constant 0 : index
    %153 = vector.load %arg6[%152, %c0_47, %c0_48] : memref<4x64x4xbf16, #tpu.memory_space<vmem>>, vector<1x64x4xbf16>
    %154 = vector.shape_cast %153 : vector<1x64x4xbf16> to vector<64x4xbf16>
    %155 = vector.shape_cast %151 : vector<64x4xbf16> to vector<1x64x4xbf16>
    tpu.vector_store %arg6[%152, %c0_47, %c0_48], %155 {strides = array<i32>} : memref<4x64x4xbf16, #tpu.memory_space<vmem>>, vector<1x64x4xbf16>,
    %c4_i32 = arith.constant 4 : i32
    %c0_49 = arith.constant 0 : index
    %c0_50 = arith.constant 0 : index
    %156 = vector.load %arg8[%c0_49, %c0_50] : memref<64x4xbf16, #tpu.memory_space<vmem>>, vector<64x4xbf16>
    tpu.vector_store %arg8[%c0_49, %c0_50], %151 {strides = array<i32>} : memref<64x4xbf16, #tpu.memory_space<vmem>>, vector<64x4xbf16>,
    %c0_51 = arith.constant 0 : index
    %c0_52 = arith.constant 0 : index
    %157 = vector.load %arg9[%c0_51, %c0_52] : memref<64x4xf32, #tpu.memory_space<vmem>>, vector<64x4xf32>
    tpu.vector_store %arg9[%c0_51, %c0_52], %148 {strides = array<i32>} : memref<64x4xf32, #tpu.memory_space<vmem>>, vector<64x4xf32>,
    return
  }
  func.func @transform_0(%arg0: i32, %arg1: i32) -> (i32, i32, i32) {
    %c0_i32 = arith.constant 0 : i32
    %c0_i32_0 = arith.constant 0 : i32
    return %arg1, %arg0, %c0_i32 : i32, i32, i32
  }
  func.func @transform_1(%arg0: i32, %arg1: i32) -> (i32, i32) {
    %c0_i32 = arith.constant 0 : i32
    %c0_i32_0 = arith.constant 0 : i32
    %c0_i32_1 = arith.constant 0 : i32
    return %c0_i32, %c0_i32_0 : i32, i32
  }
  func.func @transform_2(%arg0: i32, %arg1: i32) -> (i32, i32) {
    %c0_i32 = arith.constant 0 : i32
    %c0_i32_0 = arith.constant 0 : i32
    %c0_i32_1 = arith.constant 0 : i32
    return %c0_i32, %c0_i32_0 : i32, i32
  }
  func.func @transform_3(%arg0: i32, %arg1: i32) -> (i32, i32) {
    %c0_i32 = arith.constant 0 : i32
    %c0_i32_0 = arith.constant 0 : i32
    %c0_i32_1 = arith.constant 0 : i32
    return %c0_i32, %c0_i32_0 : i32, i32
  }
  func.func @transform_4(%arg0: i32, %arg1: i32) -> (i32, i32, i32) {
    %c0_i32 = arith.constant 0 : i32
    %c0_i32_0 = arith.constant 0 : i32
    return %arg1, %arg0, %c0_i32 : i32, i32, i32
  }
}

module attributes {stable_mosaic.version = 11 : i64} {
  func.func @_lin_stats_kernel(%arg0: i32, %arg1: i32, %arg2: memref<1x64x16xbf16, #tpu.memory_space<vmem>>, %arg3: memref<16x16xbf16, #tpu.memory_space<vmem>>, %arg4: memref<1x16xf32, #tpu.memory_space<vmem>>, %arg5: memref<1x64x16xf32, #tpu.memory_space<vmem>>, %arg6: memref<1x1x1xf32, #tpu.memory_space<vmem>>, %arg7: memref<1x1x1xf32, #tpu.memory_space<vmem>>, %arg8: memref<2xf32, #tpu.memory_space<smem>>) attributes {dimension_semantics = [#tpu.dimension_semantics<parallel>, #tpu.dimension_semantics<arbitrary>], iteration_bounds = array<i64: 2, 1>, scalar_prefetch = 0 : i64, scratch_operands = 1 : i64, tpu.core_type = #tpu.core_type<tc>, window_params = [{transform_indices = @transform_0, window_bounds = array<i64: 1, 64, 16>}, {pipeline_mode = #tpu.pipeline_mode<synchronous>, transform_indices = @transform_1, window_bounds = array<i64: 16, 16>}, {pipeline_mode = #tpu.pipeline_mode<synchronous>, transform_indices = @transform_2, window_bounds = array<i64: 1, 16>}, {transform_indices = @transform_3, window_bounds = array<i64: 1, 64, 16>}, {transform_indices = @transform_4, window_bounds = array<i64: 1, 1, 1>}, {transform_indices = @transform_5, window_bounds = array<i64: 1, 1, 1>}]} {
    %c0_i32 = arith.constant 0 : i32
    %0 = arith.cmpi eq, %arg1, %c0_i32 : i32
    %1 = arith.extui %0 : i1 to i32
    %c0_i32_0 = arith.constant 0 : i32
    %2 = arith.cmpi ne, %1, %c0_i32_0 : i32
    scf.if %2 {
      %cst_17 = arith.constant 0.000000e+00 : f32
      %c0_18 = arith.constant 0 : index
      %31 = memref.load %arg8[%c0_18] : memref<2xf32, #tpu.memory_space<smem>>
      memref.store %cst_17, %arg8[%c0_18] : memref<2xf32, #tpu.memory_space<smem>>
      %cst_19 = arith.constant 0.000000e+00 : f32
      %c1_20 = arith.constant 1 : index
      %32 = memref.load %arg8[%c1_20] : memref<2xf32, #tpu.memory_space<smem>>
      memref.store %cst_19, %arg8[%c1_20] : memref<2xf32, #tpu.memory_space<smem>>
    } else {
    }
    %c0 = arith.constant 0 : index
    %c0_1 = arith.constant 0 : index
    %c0_2 = arith.constant 0 : index
    %3 = vector.load %arg2[%c0, %c0_1, %c0_2] : memref<1x64x16xbf16, #tpu.memory_space<vmem>>, vector<1x64x16xbf16>
    %4 = vector.shape_cast %3 : vector<1x64x16xbf16> to vector<64x16xbf16>
    %c0_3 = arith.constant 0 : index
    %c0_4 = arith.constant 0 : index
    %5 = vector.load %arg3[%c0_3, %c0_4] : memref<16x16xbf16, #tpu.memory_space<vmem>>, vector<16x16xbf16>
    %cst = arith.constant dense<0.000000e+00> : vector<64x16xf32>
    %6 = tpu.matmul %4, %5, %cst {dimension_numbers = #tpu.dot_dimension_numbers<[1], [0], [0], [1], [0, 0, 1, 1], [], []>} : vector<64x16xbf16>, vector<16x16xbf16>, vector<64x16xf32> -> vector<64x16xf32>
    %c0_5 = arith.constant 0 : index
    %c0_6 = arith.constant 0 : index
    %7 = vector.load %arg4[%c0_5, %c0_6] : memref<1x16xf32, #tpu.memory_space<vmem>>, vector<1x16xf32>
    %8 = vector.broadcast %7 : vector<1x16xf32> to vector<64x16xf32>
    %9 = arith.addf %6, %8 : vector<64x16xf32>
    %c0_7 = arith.constant 0 : index
    %c0_8 = arith.constant 0 : index
    %c0_9 = arith.constant 0 : index
    %10 = vector.load %arg5[%c0_7, %c0_8, %c0_9] : memref<1x64x16xf32, #tpu.memory_space<vmem>>, vector<1x64x16xf32>
    %11 = vector.shape_cast %10 : vector<1x64x16xf32> to vector<64x16xf32>
    %12 = vector.shape_cast %9 : vector<64x16xf32> to vector<1x64x16xf32>
    tpu.vector_store %arg5[%c0_7, %c0_8, %c0_9], %12 {strides = array<i32>} : memref<1x64x16xf32, #tpu.memory_space<vmem>>, vector<1x64x16xf32>,
    %c0_10 = arith.constant 0 : index
    %13 = memref.load %arg8[%c0_10] : memref<2xf32, #tpu.memory_space<smem>>
    %14 = vector.shape_cast %9 : vector<64x16xf32> to vector<1x64x16xf32>
    %cst_11 = arith.constant dense<0.000000e+00> : vector<1xf32>
    %15 = vector.multi_reduction <add>, %14, %cst_11 [1, 2] : vector<1x64x16xf32> to vector<1xf32>
    %16 = vector.shape_cast %15 : vector<1xf32> to vector<1x1x1xf32>
    %17 = vector.extract %16[0, 0, 0] : f32 from vector<1x1x1xf32>
    %18 = arith.addf %13, %17 : f32
    %c0_12 = arith.constant 0 : index
    %19 = memref.load %arg8[%c0_12] : memref<2xf32, #tpu.memory_space<smem>>
    memref.store %18, %arg8[%c0_12] : memref<2xf32, #tpu.memory_space<smem>>
    %c1 = arith.constant 1 : index
    %20 = memref.load %arg8[%c1] : memref<2xf32, #tpu.memory_space<smem>>
    %21 = arith.mulf %9, %9 : vector<64x16xf32>
    %22 = vector.shape_cast %21 : vector<64x16xf32> to vector<1x64x16xf32>
    %cst_13 = arith.constant dense<0.000000e+00> : vector<1xf32>
    %23 = vector.multi_reduction <add>, %22, %cst_13 [1, 2] : vector<1x64x16xf32> to vector<1xf32>
    %24 = vector.shape_cast %23 : vector<1xf32> to vector<1x1x1xf32>
    %25 = vector.extract %24[0, 0, 0] : f32 from vector<1x1x1xf32>
    %26 = arith.addf %20, %25 : f32
    %c1_14 = arith.constant 1 : index
    %27 = memref.load %arg8[%c1_14] : memref<2xf32, #tpu.memory_space<smem>>
    memref.store %26, %arg8[%c1_14] : memref<2xf32, #tpu.memory_space<smem>>
    %c0_i32_15 = arith.constant 0 : i32
    %28 = arith.cmpi eq, %arg1, %c0_i32_15 : i32
    %29 = arith.extui %28 : i1 to i32
    %c0_i32_16 = arith.constant 0 : i32
    %30 = arith.cmpi ne, %29, %c0_i32_16 : i32
    scf.if %30 {
      %c0_17 = arith.constant 0 : index
      %31 = memref.load %arg8[%c0_17] : memref<2xf32, #tpu.memory_space<smem>>
      %cst_18 = arith.constant 1.024000e+03 : f32
      %32 = arith.divf %31, %cst_18 : f32
      %c1_19 = arith.constant 1 : index
      %33 = memref.load %arg8[%c1_19] : memref<2xf32, #tpu.memory_space<smem>>
      %cst_20 = arith.constant 1.024000e+03 : f32
      %34 = arith.divf %33, %cst_20 : f32
      %35 = arith.mulf %32, %32 : f32
      %36 = arith.subf %34, %35 : f32
      %cst_21 = arith.constant 0.000000e+00 : f32
      %37 = arith.maximumf %36, %cst_21 : f32
      %38 = vector.broadcast %32 : f32 to vector<1x1x1xf32>
      %c0_22 = arith.constant 0 : index
      %c0_23 = arith.constant 0 : index
      %c0_24 = arith.constant 0 : index
      %39 = vector.load %arg6[%c0_22, %c0_23, %c0_24] : memref<1x1x1xf32, #tpu.memory_space<vmem>>, vector<1x1x1xf32>
      tpu.vector_store %arg6[%c0_22, %c0_23, %c0_24], %38 {strides = array<i32>} : memref<1x1x1xf32, #tpu.memory_space<vmem>>, vector<1x1x1xf32>,
      %cst_25 = arith.constant 9.99999993E-9 : f32
      %40 = arith.addf %37, %cst_25 : f32
      %41 = math.rsqrt %40 : f32
      %42 = vector.broadcast %41 : f32 to vector<1x1x1xf32>
      %c0_26 = arith.constant 0 : index
      %c0_27 = arith.constant 0 : index
      %c0_28 = arith.constant 0 : index
      %43 = vector.load %arg7[%c0_26, %c0_27, %c0_28] : memref<1x1x1xf32, #tpu.memory_space<vmem>>, vector<1x1x1xf32>
      tpu.vector_store %arg7[%c0_26, %c0_27, %c0_28], %42 {strides = array<i32>} : memref<1x1x1xf32, #tpu.memory_space<vmem>>, vector<1x1x1xf32>,
    } else {
    }
    return
  }
  func.func @transform_0(%arg0: i32, %arg1: i32) -> (i32, i32, i32) {
    %c0_i32 = arith.constant 0 : i32
    %c0_i32_0 = arith.constant 0 : i32
    return %arg0, %arg1, %c0_i32 : i32, i32, i32
  }
  func.func @transform_1(%arg0: i32, %arg1: i32) -> (i32, i32) {
    %c0_i32 = arith.constant 0 : i32
    %c0_i32_0 = arith.constant 0 : i32
    %c0_i32_1 = arith.constant 0 : i32
    return %c0_i32, %c0_i32_0 : i32, i32
  }
  func.func @transform_2(%arg0: i32, %arg1: i32) -> (i32, i32) {
    %c0_i32 = arith.constant 0 : i32
    %c0_i32_0 = arith.constant 0 : i32
    %c0_i32_1 = arith.constant 0 : i32
    return %c0_i32, %c0_i32_0 : i32, i32
  }
  func.func @transform_3(%arg0: i32, %arg1: i32) -> (i32, i32, i32) {
    %c0_i32 = arith.constant 0 : i32
    %c0_i32_0 = arith.constant 0 : i32
    return %arg0, %arg1, %c0_i32 : i32, i32, i32
  }
  func.func @transform_4(%arg0: i32, %arg1: i32) -> (i32, i32, i32) {
    %c0_i32 = arith.constant 0 : i32
    %c0_i32_0 = arith.constant 0 : i32
    %c0_i32_1 = arith.constant 0 : i32
    return %arg0, %c0_i32, %c0_i32_0 : i32, i32, i32
  }
  func.func @transform_5(%arg0: i32, %arg1: i32) -> (i32, i32, i32) {
    %c0_i32 = arith.constant 0 : i32
    %c0_i32_0 = arith.constant 0 : i32
    %c0_i32_1 = arith.constant 0 : i32
    return %arg0, %c0_i32, %c0_i32_0 : i32, i32, i32
  }
}

module attributes {stable_mosaic.version = 11 : i64} {
  func.func @_gn_res_kernel(%arg0: i32, %arg1: i32, %arg2: memref<1x64x16xf32, #tpu.memory_space<vmem>>, %arg3: memref<1x1x1xf32, #tpu.memory_space<vmem>>, %arg4: memref<1x1x1xf32, #tpu.memory_space<vmem>>, %arg5: memref<1x16xf32, #tpu.memory_space<vmem>>, %arg6: memref<1x16xf32, #tpu.memory_space<vmem>>, %arg7: memref<1x64x16xf32, #tpu.memory_space<vmem>>, %arg8: memref<1x64x16xf32, #tpu.memory_space<vmem>>) attributes {dimension_semantics = [#tpu.dimension_semantics<parallel>, #tpu.dimension_semantics<parallel>], iteration_bounds = array<i64: 2, 1>, scalar_prefetch = 0 : i64, scratch_operands = 0 : i64, tpu.core_type = #tpu.core_type<tc>, window_params = [{transform_indices = @transform_0, window_bounds = array<i64: 1, 64, 16>}, {transform_indices = @transform_1, window_bounds = array<i64: 1, 1, 1>}, {transform_indices = @transform_2, window_bounds = array<i64: 1, 1, 1>}, {pipeline_mode = #tpu.pipeline_mode<synchronous>, transform_indices = @transform_3, window_bounds = array<i64: 1, 16>}, {pipeline_mode = #tpu.pipeline_mode<synchronous>, transform_indices = @transform_4, window_bounds = array<i64: 1, 16>}, {transform_indices = @transform_5, window_bounds = array<i64: 1, 64, 16>}, {transform_indices = @transform_6, window_bounds = array<i64: 1, 64, 16>}]} {
    %c0 = arith.constant 0 : index
    %c0_0 = arith.constant 0 : index
    %c0_1 = arith.constant 0 : index
    %0 = vector.load %arg2[%c0, %c0_0, %c0_1] : memref<1x64x16xf32, #tpu.memory_space<vmem>>, vector<1x64x16xf32>
    %1 = vector.shape_cast %0 : vector<1x64x16xf32> to vector<64x16xf32>
    %c0_2 = arith.constant 0 : index
    %c0_3 = arith.constant 0 : index
    %c0_4 = arith.constant 0 : index
    %2 = vector.load %arg3[%c0_2, %c0_3, %c0_4] : memref<1x1x1xf32, #tpu.memory_space<vmem>>, vector<1x1x1xf32>
    %3 = vector.shape_cast %2 : vector<1x1x1xf32> to vector<1x1xf32>
    %4 = vector.broadcast %3 : vector<1x1xf32> to vector<64x16xf32>
    %5 = arith.subf %1, %4 : vector<64x16xf32>
    %c0_5 = arith.constant 0 : index
    %c0_6 = arith.constant 0 : index
    %c0_7 = arith.constant 0 : index
    %6 = vector.load %arg4[%c0_5, %c0_6, %c0_7] : memref<1x1x1xf32, #tpu.memory_space<vmem>>, vector<1x1x1xf32>
    %7 = vector.shape_cast %6 : vector<1x1x1xf32> to vector<1x1xf32>
    %8 = vector.broadcast %7 : vector<1x1xf32> to vector<64x16xf32>
    %9 = arith.mulf %5, %8 : vector<64x16xf32>
    %c0_8 = arith.constant 0 : index
    %c0_9 = arith.constant 0 : index
    %10 = vector.load %arg5[%c0_8, %c0_9] : memref<1x16xf32, #tpu.memory_space<vmem>>, vector<1x16xf32>
    %11 = vector.broadcast %10 : vector<1x16xf32> to vector<64x16xf32>
    %12 = arith.mulf %9, %11 : vector<64x16xf32>
    %c0_10 = arith.constant 0 : index
    %c0_11 = arith.constant 0 : index
    %13 = vector.load %arg6[%c0_10, %c0_11] : memref<1x16xf32, #tpu.memory_space<vmem>>, vector<1x16xf32>
    %14 = vector.broadcast %13 : vector<1x16xf32> to vector<64x16xf32>
    %15 = arith.addf %12, %14 : vector<64x16xf32>
    %c0_12 = arith.constant 0 : index
    %c0_13 = arith.constant 0 : index
    %c0_14 = arith.constant 0 : index
    %16 = vector.load %arg7[%c0_12, %c0_13, %c0_14] : memref<1x64x16xf32, #tpu.memory_space<vmem>>, vector<1x64x16xf32>
    %17 = vector.shape_cast %16 : vector<1x64x16xf32> to vector<64x16xf32>
    %18 = arith.addf %15, %17 : vector<64x16xf32>
    %c0_15 = arith.constant 0 : index
    %c0_16 = arith.constant 0 : index
    %c0_17 = arith.constant 0 : index
    %19 = vector.load %arg8[%c0_15, %c0_16, %c0_17] : memref<1x64x16xf32, #tpu.memory_space<vmem>>, vector<1x64x16xf32>
    %20 = vector.shape_cast %19 : vector<1x64x16xf32> to vector<64x16xf32>
    %21 = vector.shape_cast %18 : vector<64x16xf32> to vector<1x64x16xf32>
    tpu.vector_store %arg8[%c0_15, %c0_16, %c0_17], %21 {strides = array<i32>} : memref<1x64x16xf32, #tpu.memory_space<vmem>>, vector<1x64x16xf32>,
    return
  }
  func.func @transform_0(%arg0: i32, %arg1: i32) -> (i32, i32, i32) {
    %c0_i32 = arith.constant 0 : i32
    %c0_i32_0 = arith.constant 0 : i32
    return %arg0, %arg1, %c0_i32 : i32, i32, i32
  }
  func.func @transform_1(%arg0: i32, %arg1: i32) -> (i32, i32, i32) {
    %c0_i32 = arith.constant 0 : i32
    %c0_i32_0 = arith.constant 0 : i32
    %c0_i32_1 = arith.constant 0 : i32
    return %arg0, %c0_i32, %c0_i32_0 : i32, i32, i32
  }
  func.func @transform_2(%arg0: i32, %arg1: i32) -> (i32, i32, i32) {
    %c0_i32 = arith.constant 0 : i32
    %c0_i32_0 = arith.constant 0 : i32
    %c0_i32_1 = arith.constant 0 : i32
    return %arg0, %c0_i32, %c0_i32_0 : i32, i32, i32
  }
  func.func @transform_3(%arg0: i32, %arg1: i32) -> (i32, i32) {
    %c0_i32 = arith.constant 0 : i32
    %c0_i32_0 = arith.constant 0 : i32
    %c0_i32_1 = arith.constant 0 : i32
    return %c0_i32, %c0_i32_0 : i32, i32
  }
  func.func @transform_4(%arg0: i32, %arg1: i32) -> (i32, i32) {
    %c0_i32 = arith.constant 0 : i32
    %c0_i32_0 = arith.constant 0 : i32
    %c0_i32_1 = arith.constant 0 : i32
    return %c0_i32, %c0_i32_0 : i32, i32
  }
  func.func @transform_5(%arg0: i32, %arg1: i32) -> (i32, i32, i32) {
    %c0_i32 = arith.constant 0 : i32
    %c0_i32_0 = arith.constant 0 : i32
    return %arg0, %arg1, %c0_i32 : i32, i32, i32
  }
  func.func @transform_6(%arg0: i32, %arg1: i32) -> (i32, i32, i32) {
    %c0_i32 = arith.constant 0 : i32
    %c0_i32_0 = arith.constant 0 : i32
    return %arg0, %arg1, %c0_i32 : i32, i32, i32
  }
}

module attributes {stable_mosaic.version = 11 : i64} {
  func.func @_lstm_kernel(%arg0: i32, %arg1: i32, %arg2: memref<8x16x16xf32, #tpu.memory_space<vmem>>, %arg3: memref<16x64xbf16, #tpu.memory_space<vmem>>, %arg4: memref<1x64xf32, #tpu.memory_space<vmem>>, %arg5: memref<16x64xbf16, #tpu.memory_space<vmem>>, %arg6: memref<8x16x16xbf16, #tpu.memory_space<vmem>>, %arg7: memref<8x16x64xf32, #tpu.memory_space<vmem>>, %arg8: memref<16x16xbf16, #tpu.memory_space<vmem>>, %arg9: memref<16x16xf32, #tpu.memory_space<vmem>>) attributes {dimension_semantics = [#tpu.dimension_semantics<parallel>, #tpu.dimension_semantics<arbitrary>], iteration_bounds = array<i64: 1, 1>, scalar_prefetch = 0 : i64, scratch_operands = 3 : i64, tpu.core_type = #tpu.core_type<tc>, window_params = [{transform_indices = @transform_0, window_bounds = array<i64: 8, 16, 16>}, {pipeline_mode = #tpu.pipeline_mode<synchronous>, transform_indices = @transform_1, window_bounds = array<i64: 16, 64>}, {pipeline_mode = #tpu.pipeline_mode<synchronous>, transform_indices = @transform_2, window_bounds = array<i64: 1, 64>}, {pipeline_mode = #tpu.pipeline_mode<synchronous>, transform_indices = @transform_3, window_bounds = array<i64: 16, 64>}, {transform_indices = @transform_4, window_bounds = array<i64: 8, 16, 16>}]} {
    %c0_i32 = arith.constant 0 : i32
    %0 = arith.cmpi eq, %arg1, %c0_i32 : i32
    %1 = arith.extui %0 : i1 to i32
    %c0_i32_0 = arith.constant 0 : i32
    %2 = arith.cmpi ne, %1, %c0_i32_0 : i32
    scf.if %2 {
      %cst_85 = arith.constant 0.000000e+00 : bf16
      %298 = vector.broadcast %cst_85 : bf16 to vector<16x16xbf16>
      %c0_86 = arith.constant 0 : index
      %c0_87 = arith.constant 0 : index
      %299 = vector.load %arg8[%c0_86, %c0_87] : memref<16x16xbf16, #tpu.memory_space<vmem>>, vector<16x16xbf16>
      tpu.vector_store %arg8[%c0_86, %c0_87], %298 {strides = array<i32>} : memref<16x16xbf16, #tpu.memory_space<vmem>>, vector<16x16xbf16>,
      %cst_88 = arith.constant 0.000000e+00 : f32
      %300 = vector.broadcast %cst_88 : f32 to vector<16x16xf32>
      %c0_89 = arith.constant 0 : index
      %c0_90 = arith.constant 0 : index
      %301 = vector.load %arg9[%c0_89, %c0_90] : memref<16x16xf32, #tpu.memory_space<vmem>>, vector<16x16xf32>
      tpu.vector_store %arg9[%c0_89, %c0_90], %300 {strides = array<i32>} : memref<16x16xf32, #tpu.memory_space<vmem>>, vector<16x16xf32>,
    } else {
    }
    %c0 = arith.constant 0 : index
    %c0_1 = arith.constant 0 : index
    %c0_2 = arith.constant 0 : index
    %3 = vector.load %arg2[%c0, %c0_1, %c0_2] : memref<8x16x16xf32, #tpu.memory_space<vmem>>, vector<8x16x16xf32>
    %4 = vector.shape_cast %3 : vector<8x16x16xf32> to vector<128x16xf32>
    %5 = arith.truncf %4 : vector<128x16xf32> to vector<128x16xbf16>
    %c0_3 = arith.constant 0 : index
    %c0_4 = arith.constant 0 : index
    %6 = vector.load %arg3[%c0_3, %c0_4] : memref<16x64xbf16, #tpu.memory_space<vmem>>, vector<16x64xbf16>
    %cst = arith.constant dense<0.000000e+00> : vector<128x64xf32>
    %7 = tpu.matmul %5, %6, %cst {dimension_numbers = #tpu.dot_dimension_numbers<[1], [0], [0], [1], [0, 0, 1, 1], [], []>} : vector<128x16xbf16>, vector<16x64xbf16>, vector<128x64xf32> -> vector<128x64xf32>
    %c0_5 = arith.constant 0 : index
    %c0_6 = arith.constant 0 : index
    %8 = vector.load %arg4[%c0_5, %c0_6] : memref<1x64xf32, #tpu.memory_space<vmem>>, vector<1x64xf32>
    %9 = vector.broadcast %8 : vector<1x64xf32> to vector<128x64xf32>
    %10 = arith.addf %7, %9 : vector<128x64xf32>
    %11 = vector.shape_cast %10 : vector<128x64xf32> to vector<8x16x64xf32>
    %c0_7 = arith.constant 0 : index
    %c0_8 = arith.constant 0 : index
    %c0_9 = arith.constant 0 : index
    %12 = vector.load %arg7[%c0_7, %c0_8, %c0_9] : memref<8x16x64xf32, #tpu.memory_space<vmem>>, vector<8x16x64xf32>
    tpu.vector_store %arg7[%c0_7, %c0_8, %c0_9], %11 {strides = array<i32>} : memref<8x16x64xf32, #tpu.memory_space<vmem>>, vector<8x16x64xf32>,
    %c0_10 = arith.constant 0 : index
    %c0_11 = arith.constant 0 : index
    %13 = vector.load %arg5[%c0_10, %c0_11] : memref<16x64xbf16, #tpu.memory_space<vmem>>, vector<16x64xbf16>
    %c0_12 = arith.constant 0 : index
    %c0_13 = arith.constant 0 : index
    %14 = vector.load %arg8[%c0_12, %c0_13] : memref<16x16xbf16, #tpu.memory_space<vmem>>, vector<16x16xbf16>
    %c0_14 = arith.constant 0 : index
    %c0_15 = arith.constant 0 : index
    %15 = vector.load %arg9[%c0_14, %c0_15] : memref<16x16xf32, #tpu.memory_space<vmem>>, vector<16x16xf32>
    %c0_i32_16 = arith.constant 0 : i32
    %16 = arith.index_cast %c0_i32_16 : i32 to index
    %c0_17 = arith.constant 0 : index
    %c0_18 = arith.constant 0 : index
    %17 = vector.load %arg7[%16, %c0_17, %c0_18] : memref<8x16x64xf32, #tpu.memory_space<vmem>>, vector<1x16x64xf32>
    %18 = vector.shape_cast %17 : vector<1x16x64xf32> to vector<16x64xf32>
    %cst_19 = arith.constant dense<0.000000e+00> : vector<16x64xf32>
    %19 = tpu.matmul %14, %13, %cst_19 {dimension_numbers = #tpu.dot_dimension_numbers<[1], [0], [0], [1], [0, 0, 1, 1], [], []>} : vector<16x16xbf16>, vector<16x64xbf16>, vector<16x64xf32> -> vector<16x64xf32>
    %20 = arith.addf %18, %19 : vector<16x64xf32>
    %21 = vector.extract_strided_slice %20 {offsets = [0, 0], sizes = [16, 16], strides = [1, 1]} : vector<16x64xf32> to vector<16x16xf32>
    %22 = arith.negf %21 : vector<16x16xf32>
    %23 = math.exp %22 : vector<16x16xf32>
    %cst_20 = arith.constant 1.000000e+00 : f32
    %24 = vector.broadcast %cst_20 : f32 to vector<16x16xf32>
    %25 = arith.addf %24, %23 : vector<16x16xf32>
    %26 = arith.divf %24, %25 : vector<16x16xf32>
    %27 = vector.extract_strided_slice %20 {offsets = [0, 16], sizes = [16, 16], strides = [1, 1]} : vector<16x64xf32> to vector<16x16xf32>
    %28 = arith.negf %27 : vector<16x16xf32>
    %29 = math.exp %28 : vector<16x16xf32>
    %cst_21 = arith.constant 1.000000e+00 : f32
    %30 = vector.broadcast %cst_21 : f32 to vector<16x16xf32>
    %31 = arith.addf %30, %29 : vector<16x16xf32>
    %32 = arith.divf %30, %31 : vector<16x16xf32>
    %33 = vector.extract_strided_slice %20 {offsets = [0, 32], sizes = [16, 16], strides = [1, 1]} : vector<16x64xf32> to vector<16x16xf32>
    %34 = math.tanh %33 : vector<16x16xf32>
    %35 = vector.extract_strided_slice %20 {offsets = [0, 48], sizes = [16, 16], strides = [1, 1]} : vector<16x64xf32> to vector<16x16xf32>
    %36 = arith.negf %35 : vector<16x16xf32>
    %37 = math.exp %36 : vector<16x16xf32>
    %cst_22 = arith.constant 1.000000e+00 : f32
    %38 = vector.broadcast %cst_22 : f32 to vector<16x16xf32>
    %39 = arith.addf %38, %37 : vector<16x16xf32>
    %40 = arith.divf %38, %39 : vector<16x16xf32>
    %41 = arith.mulf %32, %15 : vector<16x16xf32>
    %42 = arith.mulf %26, %34 : vector<16x16xf32>
    %43 = arith.addf %41, %42 : vector<16x16xf32>
    %44 = math.tanh %43 : vector<16x16xf32>
    %45 = arith.mulf %40, %44 : vector<16x16xf32>
    %46 = arith.truncf %45 : vector<16x16xf32> to vector<16x16xbf16>
    %47 = arith.index_cast %c0_i32_16 : i32 to index
    %c0_23 = arith.constant 0 : index
    %c0_24 = arith.constant 0 : index
    %48 = vector.load %arg6[%47, %c0_23, %c0_24] : memref<8x16x16xbf16, #tpu.memory_space<vmem>>, vector<1x16x16xbf16>
    %49 = vector.shape_cast %48 : vector<1x16x16xbf16> to vector<16x16xbf16>
    %50 = vector.shape_cast %46 : vector<16x16xbf16> to vector<1x16x16xbf16>
    tpu.vector_store %arg6[%47, %c0_23, %c0_24], %50 {strides = array<i32>} : memref<8x16x16xbf16, #tpu.memory_space<vmem>>, vector<1x16x16xbf16>,
    %c1_i32 = arith.constant 1 : i32
    %51 = arith.index_cast %c1_i32 : i32 to index
    %c0_25 = arith.constant 0 : index
    %c0_26 = arith.constant 0 : index
    %52 = vector.load %arg7[%51, %c0_25, %c0_26] : memref<8x16x64xf32, #tpu.memory_space<vmem>>, vector<1x16x64xf32>
    %53 = vector.shape_cast %52 : vector<1x16x64xf32> to vector<16x64xf32>
    %cst_27 = arith.constant dense<0.000000e+00> : vector<16x64xf32>
    %54 = tpu.matmul %46, %13, %cst_27 {dimension_numbers = #tpu.dot_dimension_numbers<[1], [0], [0], [1], [0, 0, 1, 1], [], []>} : vector<16x16xbf16>, vector<16x64xbf16>, vector<16x64xf32> -> vector<16x64xf32>
    %55 = arith.addf %53, %54 : vector<16x64xf32>
    %56 = vector.extract_strided_slice %55 {offsets = [0, 0], sizes = [16, 16], strides = [1, 1]} : vector<16x64xf32> to vector<16x16xf32>
    %57 = arith.negf %56 : vector<16x16xf32>
    %58 = math.exp %57 : vector<16x16xf32>
    %cst_28 = arith.constant 1.000000e+00 : f32
    %59 = vector.broadcast %cst_28 : f32 to vector<16x16xf32>
    %60 = arith.addf %59, %58 : vector<16x16xf32>
    %61 = arith.divf %59, %60 : vector<16x16xf32>
    %62 = vector.extract_strided_slice %55 {offsets = [0, 16], sizes = [16, 16], strides = [1, 1]} : vector<16x64xf32> to vector<16x16xf32>
    %63 = arith.negf %62 : vector<16x16xf32>
    %64 = math.exp %63 : vector<16x16xf32>
    %cst_29 = arith.constant 1.000000e+00 : f32
    %65 = vector.broadcast %cst_29 : f32 to vector<16x16xf32>
    %66 = arith.addf %65, %64 : vector<16x16xf32>
    %67 = arith.divf %65, %66 : vector<16x16xf32>
    %68 = vector.extract_strided_slice %55 {offsets = [0, 32], sizes = [16, 16], strides = [1, 1]} : vector<16x64xf32> to vector<16x16xf32>
    %69 = math.tanh %68 : vector<16x16xf32>
    %70 = vector.extract_strided_slice %55 {offsets = [0, 48], sizes = [16, 16], strides = [1, 1]} : vector<16x64xf32> to vector<16x16xf32>
    %71 = arith.negf %70 : vector<16x16xf32>
    %72 = math.exp %71 : vector<16x16xf32>
    %cst_30 = arith.constant 1.000000e+00 : f32
    %73 = vector.broadcast %cst_30 : f32 to vector<16x16xf32>
    %74 = arith.addf %73, %72 : vector<16x16xf32>
    %75 = arith.divf %73, %74 : vector<16x16xf32>
    %76 = arith.mulf %67, %43 : vector<16x16xf32>
    %77 = arith.mulf %61, %69 : vector<16x16xf32>
    %78 = arith.addf %76, %77 : vector<16x16xf32>
    %79 = math.tanh %78 : vector<16x16xf32>
    %80 = arith.mulf %75, %79 : vector<16x16xf32>
    %81 = arith.truncf %80 : vector<16x16xf32> to vector<16x16xbf16>
    %82 = arith.index_cast %c1_i32 : i32 to index
    %c0_31 = arith.constant 0 : index
    %c0_32 = arith.constant 0 : index
    %83 = vector.load %arg6[%82, %c0_31, %c0_32] : memref<8x16x16xbf16, #tpu.memory_space<vmem>>, vector<1x16x16xbf16>
    %84 = vector.shape_cast %83 : vector<1x16x16xbf16> to vector<16x16xbf16>
    %85 = vector.shape_cast %81 : vector<16x16xbf16> to vector<1x16x16xbf16>
    tpu.vector_store %arg6[%82, %c0_31, %c0_32], %85 {strides = array<i32>} : memref<8x16x16xbf16, #tpu.memory_space<vmem>>, vector<1x16x16xbf16>,
    %c2_i32 = arith.constant 2 : i32
    %86 = arith.index_cast %c2_i32 : i32 to index
    %c0_33 = arith.constant 0 : index
    %c0_34 = arith.constant 0 : index
    %87 = vector.load %arg7[%86, %c0_33, %c0_34] : memref<8x16x64xf32, #tpu.memory_space<vmem>>, vector<1x16x64xf32>
    %88 = vector.shape_cast %87 : vector<1x16x64xf32> to vector<16x64xf32>
    %cst_35 = arith.constant dense<0.000000e+00> : vector<16x64xf32>
    %89 = tpu.matmul %81, %13, %cst_35 {dimension_numbers = #tpu.dot_dimension_numbers<[1], [0], [0], [1], [0, 0, 1, 1], [], []>} : vector<16x16xbf16>, vector<16x64xbf16>, vector<16x64xf32> -> vector<16x64xf32>
    %90 = arith.addf %88, %89 : vector<16x64xf32>
    %91 = vector.extract_strided_slice %90 {offsets = [0, 0], sizes = [16, 16], strides = [1, 1]} : vector<16x64xf32> to vector<16x16xf32>
    %92 = arith.negf %91 : vector<16x16xf32>
    %93 = math.exp %92 : vector<16x16xf32>
    %cst_36 = arith.constant 1.000000e+00 : f32
    %94 = vector.broadcast %cst_36 : f32 to vector<16x16xf32>
    %95 = arith.addf %94, %93 : vector<16x16xf32>
    %96 = arith.divf %94, %95 : vector<16x16xf32>
    %97 = vector.extract_strided_slice %90 {offsets = [0, 16], sizes = [16, 16], strides = [1, 1]} : vector<16x64xf32> to vector<16x16xf32>
    %98 = arith.negf %97 : vector<16x16xf32>
    %99 = math.exp %98 : vector<16x16xf32>
    %cst_37 = arith.constant 1.000000e+00 : f32
    %100 = vector.broadcast %cst_37 : f32 to vector<16x16xf32>
    %101 = arith.addf %100, %99 : vector<16x16xf32>
    %102 = arith.divf %100, %101 : vector<16x16xf32>
    %103 = vector.extract_strided_slice %90 {offsets = [0, 32], sizes = [16, 16], strides = [1, 1]} : vector<16x64xf32> to vector<16x16xf32>
    %104 = math.tanh %103 : vector<16x16xf32>
    %105 = vector.extract_strided_slice %90 {offsets = [0, 48], sizes = [16, 16], strides = [1, 1]} : vector<16x64xf32> to vector<16x16xf32>
    %106 = arith.negf %105 : vector<16x16xf32>
    %107 = math.exp %106 : vector<16x16xf32>
    %cst_38 = arith.constant 1.000000e+00 : f32
    %108 = vector.broadcast %cst_38 : f32 to vector<16x16xf32>
    %109 = arith.addf %108, %107 : vector<16x16xf32>
    %110 = arith.divf %108, %109 : vector<16x16xf32>
    %111 = arith.mulf %102, %78 : vector<16x16xf32>
    %112 = arith.mulf %96, %104 : vector<16x16xf32>
    %113 = arith.addf %111, %112 : vector<16x16xf32>
    %114 = math.tanh %113 : vector<16x16xf32>
    %115 = arith.mulf %110, %114 : vector<16x16xf32>
    %116 = arith.truncf %115 : vector<16x16xf32> to vector<16x16xbf16>
    %117 = arith.index_cast %c2_i32 : i32 to index
    %c0_39 = arith.constant 0 : index
    %c0_40 = arith.constant 0 : index
    %118 = vector.load %arg6[%117, %c0_39, %c0_40] : memref<8x16x16xbf16, #tpu.memory_space<vmem>>, vector<1x16x16xbf16>
    %119 = vector.shape_cast %118 : vector<1x16x16xbf16> to vector<16x16xbf16>
    %120 = vector.shape_cast %116 : vector<16x16xbf16> to vector<1x16x16xbf16>
    tpu.vector_store %arg6[%117, %c0_39, %c0_40], %120 {strides = array<i32>} : memref<8x16x16xbf16, #tpu.memory_space<vmem>>, vector<1x16x16xbf16>,
    %c3_i32 = arith.constant 3 : i32
    %121 = arith.index_cast %c3_i32 : i32 to index
    %c0_41 = arith.constant 0 : index
    %c0_42 = arith.constant 0 : index
    %122 = vector.load %arg7[%121, %c0_41, %c0_42] : memref<8x16x64xf32, #tpu.memory_space<vmem>>, vector<1x16x64xf32>
    %123 = vector.shape_cast %122 : vector<1x16x64xf32> to vector<16x64xf32>
    %cst_43 = arith.constant dense<0.000000e+00> : vector<16x64xf32>
    %124 = tpu.matmul %116, %13, %cst_43 {dimension_numbers = #tpu.dot_dimension_numbers<[1], [0], [0], [1], [0, 0, 1, 1], [], []>} : vector<16x16xbf16>, vector<16x64xbf16>, vector<16x64xf32> -> vector<16x64xf32>
    %125 = arith.addf %123, %124 : vector<16x64xf32>
    %126 = vector.extract_strided_slice %125 {offsets = [0, 0], sizes = [16, 16], strides = [1, 1]} : vector<16x64xf32> to vector<16x16xf32>
    %127 = arith.negf %126 : vector<16x16xf32>
    %128 = math.exp %127 : vector<16x16xf32>
    %cst_44 = arith.constant 1.000000e+00 : f32
    %129 = vector.broadcast %cst_44 : f32 to vector<16x16xf32>
    %130 = arith.addf %129, %128 : vector<16x16xf32>
    %131 = arith.divf %129, %130 : vector<16x16xf32>
    %132 = vector.extract_strided_slice %125 {offsets = [0, 16], sizes = [16, 16], strides = [1, 1]} : vector<16x64xf32> to vector<16x16xf32>
    %133 = arith.negf %132 : vector<16x16xf32>
    %134 = math.exp %133 : vector<16x16xf32>
    %cst_45 = arith.constant 1.000000e+00 : f32
    %135 = vector.broadcast %cst_45 : f32 to vector<16x16xf32>
    %136 = arith.addf %135, %134 : vector<16x16xf32>
    %137 = arith.divf %135, %136 : vector<16x16xf32>
    %138 = vector.extract_strided_slice %125 {offsets = [0, 32], sizes = [16, 16], strides = [1, 1]} : vector<16x64xf32> to vector<16x16xf32>
    %139 = math.tanh %138 : vector<16x16xf32>
    %140 = vector.extract_strided_slice %125 {offsets = [0, 48], sizes = [16, 16], strides = [1, 1]} : vector<16x64xf32> to vector<16x16xf32>
    %141 = arith.negf %140 : vector<16x16xf32>
    %142 = math.exp %141 : vector<16x16xf32>
    %cst_46 = arith.constant 1.000000e+00 : f32
    %143 = vector.broadcast %cst_46 : f32 to vector<16x16xf32>
    %144 = arith.addf %143, %142 : vector<16x16xf32>
    %145 = arith.divf %143, %144 : vector<16x16xf32>
    %146 = arith.mulf %137, %113 : vector<16x16xf32>
    %147 = arith.mulf %131, %139 : vector<16x16xf32>
    %148 = arith.addf %146, %147 : vector<16x16xf32>
    %149 = math.tanh %148 : vector<16x16xf32>
    %150 = arith.mulf %145, %149 : vector<16x16xf32>
    %151 = arith.truncf %150 : vector<16x16xf32> to vector<16x16xbf16>
    %152 = arith.index_cast %c3_i32 : i32 to index
    %c0_47 = arith.constant 0 : index
    %c0_48 = arith.constant 0 : index
    %153 = vector.load %arg6[%152, %c0_47, %c0_48] : memref<8x16x16xbf16, #tpu.memory_space<vmem>>, vector<1x16x16xbf16>
    %154 = vector.shape_cast %153 : vector<1x16x16xbf16> to vector<16x16xbf16>
    %155 = vector.shape_cast %151 : vector<16x16xbf16> to vector<1x16x16xbf16>
    tpu.vector_store %arg6[%152, %c0_47, %c0_48], %155 {strides = array<i32>} : memref<8x16x16xbf16, #tpu.memory_space<vmem>>, vector<1x16x16xbf16>,
    %c4_i32 = arith.constant 4 : i32
    %156 = arith.index_cast %c4_i32 : i32 to index
    %c0_49 = arith.constant 0 : index
    %c0_50 = arith.constant 0 : index
    %157 = vector.load %arg7[%156, %c0_49, %c0_50] : memref<8x16x64xf32, #tpu.memory_space<vmem>>, vector<1x16x64xf32>
    %158 = vector.shape_cast %157 : vector<1x16x64xf32> to vector<16x64xf32>
    %cst_51 = arith.constant dense<0.000000e+00> : vector<16x64xf32>
    %159 = tpu.matmul %151, %13, %cst_51 {dimension_numbers = #tpu.dot_dimension_numbers<[1], [0], [0], [1], [0, 0, 1, 1], [], []>} : vector<16x16xbf16>, vector<16x64xbf16>, vector<16x64xf32> -> vector<16x64xf32>
    %160 = arith.addf %158, %159 : vector<16x64xf32>
    %161 = vector.extract_strided_slice %160 {offsets = [0, 0], sizes = [16, 16], strides = [1, 1]} : vector<16x64xf32> to vector<16x16xf32>
    %162 = arith.negf %161 : vector<16x16xf32>
    %163 = math.exp %162 : vector<16x16xf32>
    %cst_52 = arith.constant 1.000000e+00 : f32
    %164 = vector.broadcast %cst_52 : f32 to vector<16x16xf32>
    %165 = arith.addf %164, %163 : vector<16x16xf32>
    %166 = arith.divf %164, %165 : vector<16x16xf32>
    %167 = vector.extract_strided_slice %160 {offsets = [0, 16], sizes = [16, 16], strides = [1, 1]} : vector<16x64xf32> to vector<16x16xf32>
    %168 = arith.negf %167 : vector<16x16xf32>
    %169 = math.exp %168 : vector<16x16xf32>
    %cst_53 = arith.constant 1.000000e+00 : f32
    %170 = vector.broadcast %cst_53 : f32 to vector<16x16xf32>
    %171 = arith.addf %170, %169 : vector<16x16xf32>
    %172 = arith.divf %170, %171 : vector<16x16xf32>
    %173 = vector.extract_strided_slice %160 {offsets = [0, 32], sizes = [16, 16], strides = [1, 1]} : vector<16x64xf32> to vector<16x16xf32>
    %174 = math.tanh %173 : vector<16x16xf32>
    %175 = vector.extract_strided_slice %160 {offsets = [0, 48], sizes = [16, 16], strides = [1, 1]} : vector<16x64xf32> to vector<16x16xf32>
    %176 = arith.negf %175 : vector<16x16xf32>
    %177 = math.exp %176 : vector<16x16xf32>
    %cst_54 = arith.constant 1.000000e+00 : f32
    %178 = vector.broadcast %cst_54 : f32 to vector<16x16xf32>
    %179 = arith.addf %178, %177 : vector<16x16xf32>
    %180 = arith.divf %178, %179 : vector<16x16xf32>
    %181 = arith.mulf %172, %148 : vector<16x16xf32>
    %182 = arith.mulf %166, %174 : vector<16x16xf32>
    %183 = arith.addf %181, %182 : vector<16x16xf32>
    %184 = math.tanh %183 : vector<16x16xf32>
    %185 = arith.mulf %180, %184 : vector<16x16xf32>
    %186 = arith.truncf %185 : vector<16x16xf32> to vector<16x16xbf16>
    %187 = arith.index_cast %c4_i32 : i32 to index
    %c0_55 = arith.constant 0 : index
    %c0_56 = arith.constant 0 : index
    %188 = vector.load %arg6[%187, %c0_55, %c0_56] : memref<8x16x16xbf16, #tpu.memory_space<vmem>>, vector<1x16x16xbf16>
    %189 = vector.shape_cast %188 : vector<1x16x16xbf16> to vector<16x16xbf16>
    %190 = vector.shape_cast %186 : vector<16x16xbf16> to vector<1x16x16xbf16>
    tpu.vector_store %arg6[%187, %c0_55, %c0_56], %190 {strides = array<i32>} : memref<8x16x16xbf16, #tpu.memory_space<vmem>>, vector<1x16x16xbf16>,
    %c5_i32 = arith.constant 5 : i32
    %191 = arith.index_cast %c5_i32 : i32 to index
    %c0_57 = arith.constant 0 : index
    %c0_58 = arith.constant 0 : index
    %192 = vector.load %arg7[%191, %c0_57, %c0_58] : memref<8x16x64xf32, #tpu.memory_space<vmem>>, vector<1x16x64xf32>
    %193 = vector.shape_cast %192 : vector<1x16x64xf32> to vector<16x64xf32>
    %cst_59 = arith.constant dense<0.000000e+00> : vector<16x64xf32>
    %194 = tpu.matmul %186, %13, %cst_59 {dimension_numbers = #tpu.dot_dimension_numbers<[1], [0], [0], [1], [0, 0, 1, 1], [], []>} : vector<16x16xbf16>, vector<16x64xbf16>, vector<16x64xf32> -> vector<16x64xf32>
    %195 = arith.addf %193, %194 : vector<16x64xf32>
    %196 = vector.extract_strided_slice %195 {offsets = [0, 0], sizes = [16, 16], strides = [1, 1]} : vector<16x64xf32> to vector<16x16xf32>
    %197 = arith.negf %196 : vector<16x16xf32>
    %198 = math.exp %197 : vector<16x16xf32>
    %cst_60 = arith.constant 1.000000e+00 : f32
    %199 = vector.broadcast %cst_60 : f32 to vector<16x16xf32>
    %200 = arith.addf %199, %198 : vector<16x16xf32>
    %201 = arith.divf %199, %200 : vector<16x16xf32>
    %202 = vector.extract_strided_slice %195 {offsets = [0, 16], sizes = [16, 16], strides = [1, 1]} : vector<16x64xf32> to vector<16x16xf32>
    %203 = arith.negf %202 : vector<16x16xf32>
    %204 = math.exp %203 : vector<16x16xf32>
    %cst_61 = arith.constant 1.000000e+00 : f32
    %205 = vector.broadcast %cst_61 : f32 to vector<16x16xf32>
    %206 = arith.addf %205, %204 : vector<16x16xf32>
    %207 = arith.divf %205, %206 : vector<16x16xf32>
    %208 = vector.extract_strided_slice %195 {offsets = [0, 32], sizes = [16, 16], strides = [1, 1]} : vector<16x64xf32> to vector<16x16xf32>
    %209 = math.tanh %208 : vector<16x16xf32>
    %210 = vector.extract_strided_slice %195 {offsets = [0, 48], sizes = [16, 16], strides = [1, 1]} : vector<16x64xf32> to vector<16x16xf32>
    %211 = arith.negf %210 : vector<16x16xf32>
    %212 = math.exp %211 : vector<16x16xf32>
    %cst_62 = arith.constant 1.000000e+00 : f32
    %213 = vector.broadcast %cst_62 : f32 to vector<16x16xf32>
    %214 = arith.addf %213, %212 : vector<16x16xf32>
    %215 = arith.divf %213, %214 : vector<16x16xf32>
    %216 = arith.mulf %207, %183 : vector<16x16xf32>
    %217 = arith.mulf %201, %209 : vector<16x16xf32>
    %218 = arith.addf %216, %217 : vector<16x16xf32>
    %219 = math.tanh %218 : vector<16x16xf32>
    %220 = arith.mulf %215, %219 : vector<16x16xf32>
    %221 = arith.truncf %220 : vector<16x16xf32> to vector<16x16xbf16>
    %222 = arith.index_cast %c5_i32 : i32 to index
    %c0_63 = arith.constant 0 : index
    %c0_64 = arith.constant 0 : index
    %223 = vector.load %arg6[%222, %c0_63, %c0_64] : memref<8x16x16xbf16, #tpu.memory_space<vmem>>, vector<1x16x16xbf16>
    %224 = vector.shape_cast %223 : vector<1x16x16xbf16> to vector<16x16xbf16>
    %225 = vector.shape_cast %221 : vector<16x16xbf16> to vector<1x16x16xbf16>
    tpu.vector_store %arg6[%222, %c0_63, %c0_64], %225 {strides = array<i32>} : memref<8x16x16xbf16, #tpu.memory_space<vmem>>, vector<1x16x16xbf16>,
    %c6_i32 = arith.constant 6 : i32
    %226 = arith.index_cast %c6_i32 : i32 to index
    %c0_65 = arith.constant 0 : index
    %c0_66 = arith.constant 0 : index
    %227 = vector.load %arg7[%226, %c0_65, %c0_66] : memref<8x16x64xf32, #tpu.memory_space<vmem>>, vector<1x16x64xf32>
    %228 = vector.shape_cast %227 : vector<1x16x64xf32> to vector<16x64xf32>
    %cst_67 = arith.constant dense<0.000000e+00> : vector<16x64xf32>
    %229 = tpu.matmul %221, %13, %cst_67 {dimension_numbers = #tpu.dot_dimension_numbers<[1], [0], [0], [1], [0, 0, 1, 1], [], []>} : vector<16x16xbf16>, vector<16x64xbf16>, vector<16x64xf32> -> vector<16x64xf32>
    %230 = arith.addf %228, %229 : vector<16x64xf32>
    %231 = vector.extract_strided_slice %230 {offsets = [0, 0], sizes = [16, 16], strides = [1, 1]} : vector<16x64xf32> to vector<16x16xf32>
    %232 = arith.negf %231 : vector<16x16xf32>
    %233 = math.exp %232 : vector<16x16xf32>
    %cst_68 = arith.constant 1.000000e+00 : f32
    %234 = vector.broadcast %cst_68 : f32 to vector<16x16xf32>
    %235 = arith.addf %234, %233 : vector<16x16xf32>
    %236 = arith.divf %234, %235 : vector<16x16xf32>
    %237 = vector.extract_strided_slice %230 {offsets = [0, 16], sizes = [16, 16], strides = [1, 1]} : vector<16x64xf32> to vector<16x16xf32>
    %238 = arith.negf %237 : vector<16x16xf32>
    %239 = math.exp %238 : vector<16x16xf32>
    %cst_69 = arith.constant 1.000000e+00 : f32
    %240 = vector.broadcast %cst_69 : f32 to vector<16x16xf32>
    %241 = arith.addf %240, %239 : vector<16x16xf32>
    %242 = arith.divf %240, %241 : vector<16x16xf32>
    %243 = vector.extract_strided_slice %230 {offsets = [0, 32], sizes = [16, 16], strides = [1, 1]} : vector<16x64xf32> to vector<16x16xf32>
    %244 = math.tanh %243 : vector<16x16xf32>
    %245 = vector.extract_strided_slice %230 {offsets = [0, 48], sizes = [16, 16], strides = [1, 1]} : vector<16x64xf32> to vector<16x16xf32>
    %246 = arith.negf %245 : vector<16x16xf32>
    %247 = math.exp %246 : vector<16x16xf32>
    %cst_70 = arith.constant 1.000000e+00 : f32
    %248 = vector.broadcast %cst_70 : f32 to vector<16x16xf32>
    %249 = arith.addf %248, %247 : vector<16x16xf32>
    %250 = arith.divf %248, %249 : vector<16x16xf32>
    %251 = arith.mulf %242, %218 : vector<16x16xf32>
    %252 = arith.mulf %236, %244 : vector<16x16xf32>
    %253 = arith.addf %251, %252 : vector<16x16xf32>
    %254 = math.tanh %253 : vector<16x16xf32>
    %255 = arith.mulf %250, %254 : vector<16x16xf32>
    %256 = arith.truncf %255 : vector<16x16xf32> to vector<16x16xbf16>
    %257 = arith.index_cast %c6_i32 : i32 to index
    %c0_71 = arith.constant 0 : index
    %c0_72 = arith.constant 0 : index
    %258 = vector.load %arg6[%257, %c0_71, %c0_72] : memref<8x16x16xbf16, #tpu.memory_space<vmem>>, vector<1x16x16xbf16>
    %259 = vector.shape_cast %258 : vector<1x16x16xbf16> to vector<16x16xbf16>
    %260 = vector.shape_cast %256 : vector<16x16xbf16> to vector<1x16x16xbf16>
    tpu.vector_store %arg6[%257, %c0_71, %c0_72], %260 {strides = array<i32>} : memref<8x16x16xbf16, #tpu.memory_space<vmem>>, vector<1x16x16xbf16>,
    %c7_i32 = arith.constant 7 : i32
    %261 = arith.index_cast %c7_i32 : i32 to index
    %c0_73 = arith.constant 0 : index
    %c0_74 = arith.constant 0 : index
    %262 = vector.load %arg7[%261, %c0_73, %c0_74] : memref<8x16x64xf32, #tpu.memory_space<vmem>>, vector<1x16x64xf32>
    %263 = vector.shape_cast %262 : vector<1x16x64xf32> to vector<16x64xf32>
    %cst_75 = arith.constant dense<0.000000e+00> : vector<16x64xf32>
    %264 = tpu.matmul %256, %13, %cst_75 {dimension_numbers = #tpu.dot_dimension_numbers<[1], [0], [0], [1], [0, 0, 1, 1], [], []>} : vector<16x16xbf16>, vector<16x64xbf16>, vector<16x64xf32> -> vector<16x64xf32>
    %265 = arith.addf %263, %264 : vector<16x64xf32>
    %266 = vector.extract_strided_slice %265 {offsets = [0, 0], sizes = [16, 16], strides = [1, 1]} : vector<16x64xf32> to vector<16x16xf32>
    %267 = arith.negf %266 : vector<16x16xf32>
    %268 = math.exp %267 : vector<16x16xf32>
    %cst_76 = arith.constant 1.000000e+00 : f32
    %269 = vector.broadcast %cst_76 : f32 to vector<16x16xf32>
    %270 = arith.addf %269, %268 : vector<16x16xf32>
    %271 = arith.divf %269, %270 : vector<16x16xf32>
    %272 = vector.extract_strided_slice %265 {offsets = [0, 16], sizes = [16, 16], strides = [1, 1]} : vector<16x64xf32> to vector<16x16xf32>
    %273 = arith.negf %272 : vector<16x16xf32>
    %274 = math.exp %273 : vector<16x16xf32>
    %cst_77 = arith.constant 1.000000e+00 : f32
    %275 = vector.broadcast %cst_77 : f32 to vector<16x16xf32>
    %276 = arith.addf %275, %274 : vector<16x16xf32>
    %277 = arith.divf %275, %276 : vector<16x16xf32>
    %278 = vector.extract_strided_slice %265 {offsets = [0, 32], sizes = [16, 16], strides = [1, 1]} : vector<16x64xf32> to vector<16x16xf32>
    %279 = math.tanh %278 : vector<16x16xf32>
    %280 = vector.extract_strided_slice %265 {offsets = [0, 48], sizes = [16, 16], strides = [1, 1]} : vector<16x64xf32> to vector<16x16xf32>
    %281 = arith.negf %280 : vector<16x16xf32>
    %282 = math.exp %281 : vector<16x16xf32>
    %cst_78 = arith.constant 1.000000e+00 : f32
    %283 = vector.broadcast %cst_78 : f32 to vector<16x16xf32>
    %284 = arith.addf %283, %282 : vector<16x16xf32>
    %285 = arith.divf %283, %284 : vector<16x16xf32>
    %286 = arith.mulf %277, %253 : vector<16x16xf32>
    %287 = arith.mulf %271, %279 : vector<16x16xf32>
    %288 = arith.addf %286, %287 : vector<16x16xf32>
    %289 = math.tanh %288 : vector<16x16xf32>
    %290 = arith.mulf %285, %289 : vector<16x16xf32>
    %291 = arith.truncf %290 : vector<16x16xf32> to vector<16x16xbf16>
    %292 = arith.index_cast %c7_i32 : i32 to index
    %c0_79 = arith.constant 0 : index
    %c0_80 = arith.constant 0 : index
    %293 = vector.load %arg6[%292, %c0_79, %c0_80] : memref<8x16x16xbf16, #tpu.memory_space<vmem>>, vector<1x16x16xbf16>
    %294 = vector.shape_cast %293 : vector<1x16x16xbf16> to vector<16x16xbf16>
    %295 = vector.shape_cast %291 : vector<16x16xbf16> to vector<1x16x16xbf16>
    tpu.vector_store %arg6[%292, %c0_79, %c0_80], %295 {strides = array<i32>} : memref<8x16x16xbf16, #tpu.memory_space<vmem>>, vector<1x16x16xbf16>,
    %c8_i32 = arith.constant 8 : i32
    %c0_81 = arith.constant 0 : index
    %c0_82 = arith.constant 0 : index
    %296 = vector.load %arg8[%c0_81, %c0_82] : memref<16x16xbf16, #tpu.memory_space<vmem>>, vector<16x16xbf16>
    tpu.vector_store %arg8[%c0_81, %c0_82], %291 {strides = array<i32>} : memref<16x16xbf16, #tpu.memory_space<vmem>>, vector<16x16xbf16>,
    %c0_83 = arith.constant 0 : index
    %c0_84 = arith.constant 0 : index
    %297 = vector.load %arg9[%c0_83, %c0_84] : memref<16x16xf32, #tpu.memory_space<vmem>>, vector<16x16xf32>
    tpu.vector_store %arg9[%c0_83, %c0_84], %288 {strides = array<i32>} : memref<16x16xf32, #tpu.memory_space<vmem>>, vector<16x16xf32>,
    return
  }
  func.func @transform_0(%arg0: i32, %arg1: i32) -> (i32, i32, i32) {
    %c0_i32 = arith.constant 0 : i32
    %c0_i32_0 = arith.constant 0 : i32
    return %arg1, %arg0, %c0_i32 : i32, i32, i32
  }
  func.func @transform_1(%arg0: i32, %arg1: i32) -> (i32, i32) {
    %c0_i32 = arith.constant 0 : i32
    %c0_i32_0 = arith.constant 0 : i32
    %c0_i32_1 = arith.constant 0 : i32
    return %c0_i32, %c0_i32_0 : i32, i32
  }
  func.func @transform_2(%arg0: i32, %arg1: i32) -> (i32, i32) {
    %c0_i32 = arith.constant 0 : i32
    %c0_i32_0 = arith.constant 0 : i32
    %c0_i32_1 = arith.constant 0 : i32
    return %c0_i32, %c0_i32_0 : i32, i32
  }
  func.func @transform_3(%arg0: i32, %arg1: i32) -> (i32, i32) {
    %c0_i32 = arith.constant 0 : i32
    %c0_i32_0 = arith.constant 0 : i32
    %c0_i32_1 = arith.constant 0 : i32
    return %c0_i32, %c0_i32_0 : i32, i32
  }
  func.func @transform_4(%arg0: i32, %arg1: i32) -> (i32, i32, i32) {
    %c0_i32 = arith.constant 0 : i32
    %c0_i32_0 = arith.constant 0 : i32
    return %arg1, %arg0, %c0_i32 : i32, i32, i32
  }
}

module attributes {stable_mosaic.version = 11 : i64} {
  func.func @_prelu_conv_kernel(%arg0: i32, %arg1: i32, %arg2: i32, %arg3: memref<1x64x16xf32, #tpu.memory_space<vmem>>, %arg4: memref<1x1xf32, #tpu.memory_space<vmem>>, %arg5: memref<1x16x16xbf16, #tpu.memory_space<vmem>>, %arg6: memref<1x1x16xf32, #tpu.memory_space<vmem>>, %arg7: memref<1x64x16xf32, #tpu.memory_space<vmem>>) attributes {dimension_semantics = [#tpu.dimension_semantics<parallel>, #tpu.dimension_semantics<parallel>, #tpu.dimension_semantics<parallel>], iteration_bounds = array<i64: 2, 2, 1>, scalar_prefetch = 0 : i64, scratch_operands = 0 : i64, tpu.core_type = #tpu.core_type<tc>, window_params = [{transform_indices = @transform_0, window_bounds = array<i64: 1, 64, 16>}, {pipeline_mode = #tpu.pipeline_mode<synchronous>, transform_indices = @transform_1, window_bounds = array<i64: 1, 1>}, {transform_indices = @transform_2, window_bounds = array<i64: 1, 16, 16>}, {transform_indices = @transform_3, window_bounds = array<i64: 1, 1, 16>}, {transform_indices = @transform_4, window_bounds = array<i64: 1, 64, 16>}]} {
    %c0 = arith.constant 0 : index
    %c0_0 = arith.constant 0 : index
    %c0_1 = arith.constant 0 : index
    %0 = vector.load %arg3[%c0, %c0_0, %c0_1] : memref<1x64x16xf32, #tpu.memory_space<vmem>>, vector<1x64x16xf32>
    %1 = vector.shape_cast %0 : vector<1x64x16xf32> to vector<64x16xf32>
    %c0_2 = arith.constant 0 : index
    %c0_3 = arith.constant 0 : index
    %2 = vector.load %arg4[%c0_2, %c0_3] : memref<1x1xf32, #tpu.memory_space<vmem>>, vector<1x1xf32>
    %cst = arith.constant 0.000000e+00 : f32
    %3 = vector.broadcast %cst : f32 to vector<64x16xf32>
    %4 = arith.cmpf oge, %1, %3 : vector<64x16xf32>
    %5 = vector.broadcast %2 : vector<1x1xf32> to vector<64x16xf32>
    %6 = arith.mulf %5, %1 : vector<64x16xf32>
    %7 = arith.select %4, %1, %6 : vector<64x16xi1>, vector<64x16xf32>
    %8 = arith.truncf %7 : vector<64x16xf32> to vector<64x16xbf16>
    %c0_4 = arith.constant 0 : index
    %c0_5 = arith.constant 0 : index
    %c0_6 = arith.constant 0 : index
    %9 = vector.load %arg5[%c0_4, %c0_5, %c0_6] : memref<1x16x16xbf16, #tpu.memory_space<vmem>>, vector<1x16x16xbf16>
    %10 = vector.shape_cast %9 : vector<1x16x16xbf16> to vector<16x16xbf16>
    %cst_7 = arith.constant dense<0.000000e+00> : vector<64x16xf32>
    %11 = tpu.matmul %8, %10, %cst_7 {dimension_numbers = #tpu.dot_dimension_numbers<[1], [0], [0], [1], [0, 0, 1, 1], [], []>} : vector<64x16xbf16>, vector<16x16xbf16>, vector<64x16xf32> -> vector<64x16xf32>
    %c0_8 = arith.constant 0 : index
    %c0_9 = arith.constant 0 : index
    %c0_10 = arith.constant 0 : index
    %12 = vector.load %arg6[%c0_8, %c0_9, %c0_10] : memref<1x1x16xf32, #tpu.memory_space<vmem>>, vector<1x1x16xf32>
    %13 = vector.shape_cast %12 : vector<1x1x16xf32> to vector<1x16xf32>
    %14 = vector.broadcast %13 : vector<1x16xf32> to vector<64x16xf32>
    %15 = arith.addf %11, %14 : vector<64x16xf32>
    %c0_11 = arith.constant 0 : index
    %c0_12 = arith.constant 0 : index
    %c0_13 = arith.constant 0 : index
    %16 = vector.load %arg7[%c0_11, %c0_12, %c0_13] : memref<1x64x16xf32, #tpu.memory_space<vmem>>, vector<1x64x16xf32>
    %17 = vector.shape_cast %16 : vector<1x64x16xf32> to vector<64x16xf32>
    %18 = vector.shape_cast %15 : vector<64x16xf32> to vector<1x64x16xf32>
    tpu.vector_store %arg7[%c0_11, %c0_12, %c0_13], %18 {strides = array<i32>} : memref<1x64x16xf32, #tpu.memory_space<vmem>>, vector<1x64x16xf32>,
    return
  }
  func.func @transform_0(%arg0: i32, %arg1: i32, %arg2: i32) -> (i32, i32, i32) {
    %c0_i32 = arith.constant 0 : i32
    %c0_i32_0 = arith.constant 0 : i32
    return %arg0, %arg2, %c0_i32 : i32, i32, i32
  }
  func.func @transform_1(%arg0: i32, %arg1: i32, %arg2: i32) -> (i32, i32) {
    %c0_i32 = arith.constant 0 : i32
    %c0_i32_0 = arith.constant 0 : i32
    %c0_i32_1 = arith.constant 0 : i32
    return %c0_i32, %c0_i32_0 : i32, i32
  }
  func.func @transform_2(%arg0: i32, %arg1: i32, %arg2: i32) -> (i32, i32, i32) {
    %c0_i32 = arith.constant 0 : i32
    %c0_i32_0 = arith.constant 0 : i32
    %c0_i32_1 = arith.constant 0 : i32
    return %arg1, %c0_i32, %c0_i32_0 : i32, i32, i32
  }
  func.func @transform_3(%arg0: i32, %arg1: i32, %arg2: i32) -> (i32, i32, i32) {
    %c0_i32 = arith.constant 0 : i32
    %c0_i32_0 = arith.constant 0 : i32
    %c0_i32_1 = arith.constant 0 : i32
    return %arg1, %c0_i32, %c0_i32_0 : i32, i32, i32
  }
  func.func @transform_4(%arg0: i32, %arg1: i32, %arg2: i32) -> (i32, i32, i32) {
    %c2_i32 = arith.constant 2 : i32
    %0 = arith.muli %arg0, %c2_i32 : i32
    %1 = arith.addi %0, %arg1 : i32
    %c0_i32 = arith.constant 0 : i32
    %c0_i32_0 = arith.constant 0 : i32
    return %1, %arg2, %c0_i32 : i32, i32, i32
  }
}

module attributes {stable_mosaic.version = 11 : i64} {
  func.func @_gated_end_kernel(%arg0: i32, %arg1: memref<80x16xf32, #tpu.memory_space<vmem>>, %arg2: memref<16x32xbf16, #tpu.memory_space<vmem>>, %arg3: memref<1x32xf32, #tpu.memory_space<vmem>>, %arg4: memref<16x8xbf16, #tpu.memory_space<vmem>>, %arg5: memref<80x8xf32, #tpu.memory_space<vmem>>) attributes {dimension_semantics = [#tpu.dimension_semantics<parallel>], iteration_bounds = array<i64: 1>, scalar_prefetch = 0 : i64, scratch_operands = 0 : i64, tpu.core_type = #tpu.core_type<tc>, window_params = [{transform_indices = @transform_0, window_bounds = array<i64: 80, 16>}, {pipeline_mode = #tpu.pipeline_mode<synchronous>, transform_indices = @transform_1, window_bounds = array<i64: 16, 32>}, {pipeline_mode = #tpu.pipeline_mode<synchronous>, transform_indices = @transform_2, window_bounds = array<i64: 1, 32>}, {pipeline_mode = #tpu.pipeline_mode<synchronous>, transform_indices = @transform_3, window_bounds = array<i64: 16, 8>}, {transform_indices = @transform_4, window_bounds = array<i64: 80, 8>}]} {
    %c0 = arith.constant 0 : index
    %c0_0 = arith.constant 0 : index
    %0 = vector.load %arg1[%c0, %c0_0] : memref<80x16xf32, #tpu.memory_space<vmem>>, vector<80x16xf32>
    %1 = arith.truncf %0 : vector<80x16xf32> to vector<80x16xbf16>
    %c0_1 = arith.constant 0 : index
    %c0_2 = arith.constant 0 : index
    %2 = vector.load %arg2[%c0_1, %c0_2] : memref<16x32xbf16, #tpu.memory_space<vmem>>, vector<16x32xbf16>
    %cst = arith.constant dense<0.000000e+00> : vector<80x32xf32>
    %3 = tpu.matmul %1, %2, %cst {dimension_numbers = #tpu.dot_dimension_numbers<[1], [0], [0], [1], [0, 0, 1, 1], [], []>} : vector<80x16xbf16>, vector<16x32xbf16>, vector<80x32xf32> -> vector<80x32xf32>
    %c0_3 = arith.constant 0 : index
    %c0_4 = arith.constant 0 : index
    %4 = vector.load %arg3[%c0_3, %c0_4] : memref<1x32xf32, #tpu.memory_space<vmem>>, vector<1x32xf32>
    %5 = vector.broadcast %4 : vector<1x32xf32> to vector<80x32xf32>
    %6 = arith.addf %3, %5 : vector<80x32xf32>
    %7 = vector.extract_strided_slice %6 {offsets = [0, 0], sizes = [80, 16], strides = [1, 1]} : vector<80x32xf32> to vector<80x16xf32>
    %8 = math.tanh %7 : vector<80x16xf32>
    %9 = vector.extract_strided_slice %6 {offsets = [0, 16], sizes = [80, 16], strides = [1, 1]} : vector<80x32xf32> to vector<80x16xf32>
    %10 = arith.negf %9 : vector<80x16xf32>
    %11 = math.exp %10 : vector<80x16xf32>
    %cst_5 = arith.constant 1.000000e+00 : f32
    %12 = vector.broadcast %cst_5 : f32 to vector<80x16xf32>
    %13 = arith.addf %12, %11 : vector<80x16xf32>
    %14 = arith.divf %12, %13 : vector<80x16xf32>
    %15 = arith.mulf %8, %14 : vector<80x16xf32>
    %16 = arith.truncf %15 : vector<80x16xf32> to vector<80x16xbf16>
    %c0_6 = arith.constant 0 : index
    %c0_7 = arith.constant 0 : index
    %17 = vector.load %arg4[%c0_6, %c0_7] : memref<16x8xbf16, #tpu.memory_space<vmem>>, vector<16x8xbf16>
    %cst_8 = arith.constant dense<0.000000e+00> : vector<80x8xf32>
    %18 = tpu.matmul %16, %17, %cst_8 {dimension_numbers = #tpu.dot_dimension_numbers<[1], [0], [0], [1], [0, 0, 1, 1], [], []>} : vector<80x16xbf16>, vector<16x8xbf16>, vector<80x8xf32> -> vector<80x8xf32>
    %cst_9 = arith.constant 0.000000e+00 : f32
    %19 = vector.broadcast %cst_9 : f32 to vector<80x8xf32>
    %20 = arith.maximumf %18, %19 : vector<80x8xf32>
    %c0_10 = arith.constant 0 : index
    %c0_11 = arith.constant 0 : index
    %21 = vector.load %arg5[%c0_10, %c0_11] : memref<80x8xf32, #tpu.memory_space<vmem>>, vector<80x8xf32>
    tpu.vector_store %arg5[%c0_10, %c0_11], %20 {strides = array<i32>} : memref<80x8xf32, #tpu.memory_space<vmem>>, vector<80x8xf32>,
    return
  }
  func.func @transform_0(%arg0: i32) -> (i32, i32) {
    %c0_i32 = arith.constant 0 : i32
    %c0_i32_0 = arith.constant 0 : i32
    return %arg0, %c0_i32 : i32, i32
  }
  func.func @transform_1(%arg0: i32) -> (i32, i32) {
    %c0_i32 = arith.constant 0 : i32
    %c0_i32_0 = arith.constant 0 : i32
    %c0_i32_1 = arith.constant 0 : i32
    return %c0_i32, %c0_i32_0 : i32, i32
  }
  func.func @transform_2(%arg0: i32) -> (i32, i32) {
    %c0_i32 = arith.constant 0 : i32
    %c0_i32_0 = arith.constant 0 : i32
    %c0_i32_1 = arith.constant 0 : i32
    return %c0_i32, %c0_i32_0 : i32, i32
  }
  func.func @transform_3(%arg0: i32) -> (i32, i32) {
    %c0_i32 = arith.constant 0 : i32
    %c0_i32_0 = arith.constant 0 : i32
    %c0_i32_1 = arith.constant 0 : i32
    return %c0_i32, %c0_i32_0 : i32, i32
  }
  func.func @transform_4(%arg0: i32) -> (i32, i32) {
    %c0_i32 = arith.constant 0 : i32
    %c0_i32_0 = arith.constant 0 : i32
    return %arg0, %c0_i32 : i32, i32
  }
}

</mosaic_0001>

<bundles_post_ra>
// kernel: dprnn_forward.23
= control target key start
LH: loop header
LB: loop body
LE: loop exit
PB: predicated region body
PF: predicated region fallthrough
CT: control target
= control target key end

     0   :  { %s653_s21 = smov 0   ;;  %s655_s22 = smov 0   ;;  %s706_s0 = inlined_call_operand.vmem [shape: f32[2,20,8], index: 0, kind: input, shape index: {}]   ;;  %s707_s1 = inlined_call_operand.vmem [shape: f32[2,1,1], index: 1, kind: input, shape index: {}]   ;;  %s708_s2 = inlined_call_operand.vmem [shape: f32[2,1,1], index: 2, kind: input, shape index: {}]   ;;  %s709_s3 = inlined_call_operand.vmem [shape: f32[1,8], index: 3, kind: input, shape index: {}]   ;;  %s710_s4 = inlined_call_operand.vmem [shape: f32[1,8], index: 4, kind: input, shape index: {}]   ;;  %s711_s5 = inlined_call_operand.vmem [shape: bf16[8,16], index: 5, kind: input, shape index: {}]   ;;  %s712_s6 = inlined_call_operand.vmem [shape: f32[2,20,16], index: 6, kind: output, shape index: {}]  }
   0x1   :  { %s657_s23 = smov 0  }
   0x2 LB: > { %s28_s24 = sadd.s32 1, %s611_s22  ;;  %p545_p0 = scmp.ge.s32.totalorder %s615_s23, 1  ;;  %s615_s23 = sphi %s657_s23, %s16_s23   ;;  %s611_s22 = sphi %s655_s22, %s714_s22   ;;  %s607_s21 = sphi %s653_s21, %s713_s21  }
   0x3   : > { %p30_p1 = scmp.ge.s32.totalorder %s28_s24, 2  ;;  %p249_p2 = scmp.lt.s32.totalorder %s615_s23, 3 }
   0x5   : > { %s716_s24 = smov (%p30_p1, %s28_s24), 0  ;;  %p250_p3 = pnand %p545_p0, %p249_p2 }
   0x6   : > { %p294_p4 = scmp.lt.s32.totalorder (!%p250_p3), %s607_s21, 1 }
   0x7   : > { %253 = sbr.rel (%p250_p3) target bundleno = 352 (0x160), region = 44 }
   0xc   : > { %v617_v0 = vmov 0   ;;  %s718_s21 = smov (!%p294_p4, %s607_s21), 1  ;;  %v371_v3 = vld [vmem:[%s711_s5] sm:$0xf]  ;;  %vm379_vm0 = vcmask 1043456   ;;  %vm372_vm1 = vcmask 64512  }
   0xd   : > { %592 = vset.pattern.permute.xlu0 %v617_v0  ;;  %s305_s27 = scalar_lea.vmem %s707_s1, %s718_s21  ;;  %s308_s30 = scalar_lea.vmem %s708_s2, %s718_s21  ;;  %565 = vmatprep.subr.msk.bf16.mxu0 %vm379_vm0, %v371_v3  ;;  %v381_v4 = vsel %vm379_vm0, %v371_v3, 0  ;;  %v550_v12 = vld [vmem:[%s709_s3] ss:$0 sm:$0xff]  ;;  %vm434_vm2 = vcmask 125952   ;;  %vm431_vm3 = vcmask 130048  }
   0xe   : > { %v548_v1 = vld [vmem:[%s305_s27] ss:$0 sm:$0xff]  ;;  %560 = vmatpush3.bf16.msra.mxu0 %v381_v4  ;;  %s566_s9 = smul.u32 24, %s718_s21 }
   0xf   : > { %330 = vperm.xlu0 %592, %v548_v1   ;;  %v549_v2 = vld [vmem:[%s308_s30] ss:$0 sm:$0xff] }
  0x10   : > { %s301_s12 = scalar_lea.vmem %s706_s0, %s566_s9  ;;  %v551_v17 = vld [vmem:[%s710_s4] ss:$0 sm:$0xff]  ;;  %s317_s19 = scalar_lea.vmem %s712_s6, %s566_s9 }
  0x11   : > { %v320_v6 = vld [vmem:[%s301_s12] sm:$0xff]  ;;  %v321_v7 = vld [vmem:[%s301_s12 + $0x8] sm:$0xff]  ;;  %v322_v8 = vld [vmem:[%s301_s12 + $0x10] sm:$0xf] }
  0x13   : > { %343 = vperm.xlu0 %592, %v549_v2  }
  0x8a   : > { %v331_v5 = vpop.permute.xlu0 %330 }
  0x8b   : > { %v333_v9 = vsub.f32 %v320_v6, %v331_v5  ;;  %v334_v10 = vsub.f32 %v321_v7, %v331_v5  ;;  %v335_v11 = vsub.f32 %v322_v8, %v331_v5 }
  0x8e   : > { %v344_v13 = vpop.permute.xlu0 %343 }
  0x8f   : > { %v346_v14 = vmul.f32 %v344_v13, %v333_v9  ;;  %v347_v15 = vmul.f32 %v344_v13, %v334_v10  ;;  %v348_v16 = vmul.f32 %v344_v13, %v335_v11 }
  0x91   : > { %v356_v18 = vmul.f32 %v550_v12, %v346_v14  ;;  %v357_v19 = vmul.f32 %v550_v12, %v347_v15  ;;  %v358_v20 = vmul.f32 %v550_v12, %v348_v16 }
  0x93   : > { %v368_v21 = vadd.f32 %v551_v17, %v358_v20  ;;  %v366_v22 = vadd.f32 %v551_v17, %v356_v18  ;;  %v367_v23 = vadd.f32 %v551_v17, %v357_v19 }
  0x95   : > { %v370_v24 = vpack.c.bf16 %v368_v21, %v368_v21  ;;  %v369_v25 = vpack.c.bf16 %v367_v23, %v366_v22 }
  0x97   : > { %561 = vmatprep.mubr.msk.bf16.mxu0 %vm372_vm1, %v369_v25 }
  0x98   : > { %562 = vmatmul.mubr.msk.bf16.vlgmr.msra.gmra.mxu0 %vm372_vm1, %v370_v24 }
 0x158   : > { %v563_v26 = vpop.f32.mrf.mxu0 }
 0x159   : > { %435 = vst.msk [vmem:[%s317_s19 + $0x10] sm:$0xf] %vm434_vm2, %v563_v26 }
 0x15a   : > { %v417_v27 = vpop.f32.mrf.mxu0 }
 0x15b   : > { %432 = vst.msk [vmem:[%s317_s19] sm:$0xff] %vm431_vm3, %v417_v27 }
 0x15c   : > { %v564_v28 = vpop.f32.mrf.mxu0 }
 0x15e   : > { %v420_v29 = vpop.f32.mrf.mxu0 }
 0x15f   : > { %433 = vst.msk [vmem:[%s317_s19 + $0x8] sm:$0xff] %vm431_vm3, %v420_v29 }
 0x160 PF: > { %s16_s23 = sadd.s32 1, %s615_s23   ;;  %s713_s21 = smov %s611_s22 }
 0x161   : > { %p13_p5 = scmp.ge.s32.totalorder %s16_s23, 4   ;;  %s714_s22 = smov %s716_s24 }
 0x163   :  { %15 = sbr.rel (!%p13_p5) target bundleno = 2 (0x2), region = 80 }

// kernel: dprnn_forward.22
= control target key start
LH: loop header
LB: loop body
LE: loop exit
PB: predicated region body
PF: predicated region fallthrough
CT: control target
= control target key end

     0   :  { %s422_s9 = smov 0   ;;  %s424_s10 = smov 0   ;;  %s465_s0 = inlined_call_operand.vmem [shape: f32[2,20,8], index: 0, kind: input, shape index: {}]   ;;  %s466_s1 = inlined_call_operand.vmem [shape: f32[2,1,1], index: 1, kind: output, shape index: {0}]   ;;  %s467_s2 = inlined_call_operand.vmem [shape: f32[2,1,1], index: 2, kind: output, shape index: {1}]  }
   0x1   :  { %s426_s11 = smov 0  }
   0x2 LB: > { %s25_s12 = sadd.s32 1, %s400_s10  ;;  %p342_p0 = scmp.ge.s32.totalorder %s404_s11, 1  ;;  %s404_s11 = sphi %s426_s11, %s13_s11   ;;  %s400_s10 = sphi %s424_s10, %s469_s10   ;;  %s396_s9 = sphi %s422_s9, %s468_s9  }
   0x3   : > { %p27_p1 = scmp.ge.s32.totalorder %s25_s12, 2  ;;  %p134_p2 = scmp.lt.s32.totalorder %s404_s11, 3 }
   0x5   : > { %s471_s12 = smov (%p27_p1, %s25_s12), 0  ;;  %p135_p3 = pnand %p342_p0, %p134_p2 }
   0x6   : > { %p162_p4 = scmp.lt.s32.totalorder (!%p135_p3), %s396_s9, 1  ;;  %s406_s26 = smov (!%p135_p3), 0.0  }
   0x7   : > { %138 = sbr.rel (%p135_p3) target bundleno = 300 (0x12c), region = 24 }
   0xc   : > { %s473_s9 = smov (!%p162_p4, %s396_s9), 1  ;;  %vm189_vm0 = vcmask 64512   ;;  %vm193_vm1 = vcmask 60416   ;;  %vm244_vm2 = vcmask 0  }
   0xd   : > { %s348_s13 = smul.u32 24, %s473_s9  ;;  %s173_s21 = scalar_lea.vmem %s466_s1, %s473_s9 }
   0xe   : > { %s176_s3 = scalar_lea.vmem %s467_s2, %s473_s9 }
   0xf   : > { %s169_s16 = scalar_lea.vmem %s465_s0, %s348_s13 }
  0x10   : > { %v185_v0 = vld [vmem:[%s169_s16] sm:$0xff]  ;;  %v186_v1 = vld [vmem:[%s169_s16 + $0x8] sm:$0xff]  ;;  %v187_v2 = vld [vmem:[%s169_s16 + $0x10] sm:$0xf] }
  0x11   : > { %v190_v3 = vsel %vm189_vm0, %v185_v0, 0.0  ;;  %v191_v4 = vsel %vm189_vm0, %v186_v1, 0.0  ;;  %v194_v5 = vsel %vm193_vm1, %v187_v2, 0.0  ;;  %v209_v6 = vmul.f32 %v185_v0, %v185_v0 }
  0x12   : > { %v192_v7 = vadd.f32 %v191_v4, %v190_v3  ;;  %v210_v8 = vmul.f32 %v186_v1, %v186_v1  ;;  %v211_v9 = vmul.f32 %v187_v2, %v187_v2 }
  0x13   : > { %v212_v10 = vsel %vm189_vm0, %v209_v6, 0.0 }
  0x14   : > { %v195_v11 = vadd.f32 %v194_v5, %v192_v7  ;;  %v213_v12 = vsel %vm189_vm0, %v210_v8, 0.0  ;;  %v215_v13 = vsel %vm193_vm1, %v211_v9, 0.0 }
  0x15   : > { %v214_v14 = vadd.f32 %v213_v12, %v212_v10 }
  0x16   : > { %196 = vadd.xlane.f32.xlu0 %v195_v11 }
  0x17   : > { %v216_v15 = vadd.f32 %v215_v13, %v214_v14 }
  0x1a   : > { %217 = vadd.xlane.f32.xlu0 %v216_v15 }
  0x9f   : > { %v197_v16 = vpop.xlane.xlu0 %196 }
  0xa0   : > { %v198_v17 = vrot.slane %v197_v16, 4 }
  0xa2   : > { %v199_v18 = vadd.f32 %v198_v17, %v197_v16 }
  0xa3   : > { %v218_v19 = vpop.xlane.xlu0 %217 }
  0xa4   : > { %v200_v20 = vrot.slane %v199_v18, 2  ;;  %v219_v21 = vrot.slane %v218_v19, 4 }
  0xa6   : > { %v220_v22 = vadd.f32 %v219_v21, %v218_v19  ;;  %v201_v23 = vadd.f32 %v200_v20, %v199_v18 }
  0xa8   : > { %v221_v24 = vrot.slane %v220_v22, 2  ;;  %v202_v25 = vrot.slane %v201_v23, 1 }
  0xaa   : > { %v222_v26 = vadd.f32 %v221_v24, %v220_v22  ;;  %v203_v27 = vadd.f32 %v202_v25, %v201_v23 }
  0xac   : > { %349 = vpush %v203_v27  ;;  %v223_v28 = vrot.slane %v222_v26, 1 }
  0xae   : > { %v224_v29 = vadd.f32 %v223_v28, %v222_v26 }
  0xb0   : > { %351 = vpush %v224_v29 }
  0xdd   : > { %s350_s17 = spop %349 }
  0xde   : > { %s235_s18 = smul.f32 0.00625, %s350_s17 }
  0xe0   : > { %v243_v30 = vstv %s235_s18  ;;  %s240_s22 = smul.f32 %s235_s18, %s235_s18 }
  0xe1   : > { %s352_s23 = spop %351  ;;  %245 = vst.msk [vmem:[%s173_s21] sm:$0x1] %vm244_vm2, %v243_v30 }
  0xe2   : > { %s239_s24 = smul.f32 0.00625, %s352_s23 }
  0xe4   : > { %s241_s25 = ssub.f32 %s239_s24, %s240_s22 }
  0xe6   : > { %s242_s27 = smax.f32 %s406_s26, %s241_s25 }
  0xe7   : > { %s246_s28 = sadd.f32 1e-08, %s242_s27 }
  0xe9   : > { %v247_v31 = vstv %s246_s28 }
  0xea   : > { %380 = vrsqrt.f32 %v247_v31 }
  0xf7   : > { %v381_v32 = vpop.eup %380 }
  0xf8   : > { %353 = vpush %v381_v32 }
 0x129   : > { %s354_s4 = spop %353 }
 0x12a   : > { %v250_v33 = vstv %s354_s4 }
 0x12b   : > { %251 = vst.msk [vmem:[%s176_s3] sm:$0x1] %vm244_vm2, %v250_v33 }
 0x12c PF: > { %s13_s11 = sadd.s32 1, %s404_s11   ;;  %s468_s9 = smov %s400_s10 }
 0x12d   : > { %p10_p5 = scmp.ge.s32.totalorder %s13_s11, 4   ;;  %s469_s10 = smov %s471_s12 }
 0x12f   :  { %12 = sbr.rel (!%p10_p5) target bundleno = 2 (0x2), region = 78 }

// kernel: dprnn_forward.25
= control target key start
LH: loop header
LB: loop body
LE: loop exit
PB: predicated region body
PF: predicated region fallthrough
CT: control target
= control target key end

     0   :  { %s778_s18 = smov 0   ;;  %s780_s19 = smov 0   ;;  %s869_s0 = inlined_call_operand.vmem [shape: bf16[2,64,16], index: 0, kind: input, shape index: {}]   ;;  %s870_s1 = inlined_call_operand.vmem [shape: bf16[16,16], index: 1, kind: input, shape index: {}]   ;;  %s871_s2 = inlined_call_operand.vmem [shape: f32[1,16], index: 2, kind: input, shape index: {}]   ;;  %s872_s3 = inlined_call_operand.vmem [shape: f32[2,64,16], index: 3, kind: output, shape index: {0}]   ;;  %s873_s4 = inlined_call_operand.vmem [shape: f32[2,1,1], index: 4, kind: output, shape index: {1}]   ;;  %s874_s5 = inlined_call_operand.vmem [shape: f32[2,1,1], index: 5, kind: output, shape index: {2}]  }
   0x1   :  { %s782_s20 = smov 0  }
   0x2 LB: > { %s28_s21 = sadd.s32 1, %s741_s19  ;;  %p647_p0 = scmp.ge.s32.totalorder %s745_s20, 1  ;;  %s745_s20 = sphi %s782_s20, %s16_s20   ;;  %s741_s19 = sphi %s780_s19, %s876_s19   ;;  %s737_s18 = sphi %s778_s18, %s875_s18  }
   0x3   : > { %p30_p1 = scmp.ge.s32.totalorder %s28_s21, 2  ;;  %p213_p2 = scmp.lt.s32.totalorder %s745_s20, 3 }
   0x5   : > { %s878_s21 = smov (%p30_p1, %s28_s21), 0  ;;  %p214_p3 = pnand %p647_p0, %p213_p2 }
   0x6   : > { %p256_p4 = scmp.lt.s32.totalorder (!%p214_p3), %s737_s18, 1  ;;  %s747_s22 = smov (!%p214_p3), 0.0  }
   0x7   : > { %217 = sbr.rel (%p214_p3) target bundleno = 511 (0x1ff), region = 32 }
   0xc   : > { %v716_v0 = vld [vmem:[%s870_s1] sm:$0xff]   ;;  %s880_s18 = smov (!%p256_p4, %s737_s18), 1  ;;  %vm333_vm0 = vcmask 130048   ;;  %vm498_vm1 = vcmask 0  }
   0xd   : > { %673 = vmatprep.subr.bf16.mxu0 %v716_v0  ;;  %683 = vmatprep.subr.bf16.mxu1 %v716_v0  ;;  %s666_s24 = sshll.u32 %s880_s18, 5  ;;  %s667_s28 = sshll.u32 %s880_s18, 6  ;;  %v652_v5 = vld [vmem:[%s871_s2] ss:$0 sm:$0xff] }
   0xe   : > { %674 = vmatpush3.bf16.msra.mxu0 %v716_v0  ;;  %684 = vmatpush3.bf16.msra.mxu1 %v716_v0  ;;  %s263_s27 = scalar_lea.vmem %s869_s0, %s666_s24  ;;  %s816_s8 = scalar_lea.vmem %s872_s3, %s667_s28 }
   0xf   : > { %v717_v1 = vld [vmem:[%s263_s27] sm:$0xff]   ;;  %v718_v2 = vld [vmem:[%s263_s27 + $0x8] sm:$0xff]   ;;  %v719_v3 = vld [vmem:[%s263_s27 + $0x10] sm:$0xff]   ;;  %s277_s13 = scalar_lea.vmem %s873_s4, %s880_s18 }
  0x10   : > { %675 = vmatprep.mubr.msk.bf16.mxu0 %vm333_vm0, %v717_v1  ;;  %v720_v4 = vld [vmem:[%s263_s27 + $0x18] sm:$0xff]   ;;  %679 = vmatprep.mubr.msk.bf16.mxu1 %vm333_vm0, %v719_v3  ;;  %s280_s27 = scalar_lea.vmem %s874_s5, %s880_s18 }
  0x11   : > { %676 = vmatmul.mubr.msk.bf16.vlgmr.msra.gmra.mxu0 %vm333_vm0, %v718_v2  ;;  %680 = vmatmul.mubr.msk.bf16.vlgmr.msra.gmra.mxu1 %vm333_vm0, %v720_v4 }
  0xd1   : > { %v677_v6 = vpop.f32.mrf.mxu0  ;;  %v681_v9 = vpop.f32.mrf.mxu1 }
  0xd2   : > { %v389_v7 = vadd.f32 %v677_v6, %v652_v5  ;;  %v405_v11 = vadd.f32 %v681_v9, %v652_v5 }
  0xd3   : > { %v380_v8 = vpop.f32.mrf.mxu0  ;;  %v396_v13 = vpop.f32.mrf.mxu1 }
  0xd4   : > { %413 = vst.msk [vmem:[%s816_s8 + $0x10] sm:$0xff] %vm333_vm0, %v389_v7  ;;  %v381_v10 = vadd.f32 %v652_v5, %v380_v8  ;;  %417 = vst.msk [vmem:[%s816_s8 + $0x30] sm:$0xff] %vm333_vm0, %v405_v11  ;;  %v397_v15 = vadd.f32 %v652_v5, %v396_v13  ;;  %v450_v21 = vmul.f32 %v389_v7, %v389_v7  ;;  %v423_v28 = vsel %vm333_vm0, %v389_v7, 0.0 }
  0xd5   : > { %v678_v12 = vpop.f32.mrf.mxu0  ;;  %v682_v17 = vpop.f32.mrf.mxu1  ;;  %v454_v44 = vmul.f32 %v405_v11, %v405_v11  ;;  %v431_v49 = vsel %vm333_vm0, %v405_v11, 0.0 }
  0xd6   : > { %411 = vst.msk [vmem:[%s816_s8] sm:$0xff] %vm333_vm0, %v381_v10  ;;  %v392_v14 = vadd.f32 %v678_v12, %v652_v5  ;;  %v448_v18 = vmul.f32 %v381_v10, %v381_v10  ;;  %v408_v20 = vadd.f32 %v682_v17, %v652_v5  ;;  %415 = vst.msk [vmem:[%s816_s8 + $0x20] sm:$0xff] %vm333_vm0, %v397_v15  ;;  %v420_v23 = vsel %vm333_vm0, %v381_v10, 0.0 }
  0xd7   : > { %v383_v16 = vpop.f32.mrf.mxu0  ;;  %v399_v22 = vpop.f32.mrf.mxu1  ;;  %v459_v34 = vsel %vm333_vm0, %v450_v21, 0.0  ;;  %v452_v36 = vmul.f32 %v397_v15, %v397_v15  ;;  %v427_v40 = vsel %vm333_vm0, %v397_v15, 0.0  ;;  %v467_v55 = vsel %vm333_vm0, %v454_v44, 0.0 }
  0xd8   : > { %v384_v19 = vadd.f32 %v652_v5, %v383_v16  ;;  %414 = vst.msk [vmem:[%s816_s8 + $0x18] sm:$0xff] %vm333_vm0, %v392_v14  ;;  %418 = vst.msk [vmem:[%s816_s8 + $0x38] sm:$0xff] %vm333_vm0, %v408_v20  ;;  %v400_v26 = vadd.f32 %v652_v5, %v399_v22  ;;  %v456_v29 = vsel %vm333_vm0, %v448_v18, 0.0  ;;  %v451_v30 = vmul.f32 %v392_v14, %v392_v14 }
  0xd9   : > { %v425_v35 = vsel %vm333_vm0, %v392_v14, 0.0  ;;  %v463_v45 = vsel %vm333_vm0, %v452_v36, 0.0  ;;  %v433_v53 = vsel %vm333_vm0, %v408_v20, 0.0  ;;  %v455_v54 = vmul.f32 %v408_v20, %v408_v20 }
  0xda   : > { %412 = vst.msk [vmem:[%s816_s8 + $0x8] sm:$0xff] %vm333_vm0, %v384_v19  ;;  %v421_v24 = vsel %vm333_vm0, %v384_v19, 0.0  ;;  %v449_v25 = vmul.f32 %v384_v19, %v384_v19  ;;  %416 = vst.msk [vmem:[%s816_s8 + $0x28] sm:$0xff] %vm333_vm0, %v400_v26  ;;  %v461_v39 = vsel %vm333_vm0, %v451_v30, 0.0  ;;  %v453_v41 = vmul.f32 %v400_v26, %v400_v26 }
  0xdb   : > { %v422_v27 = vadd.f32 %v421_v24, %v420_v23  ;;  %v429_v46 = vsel %vm333_vm0, %v400_v26, 0.0  ;;  %v469_v58 = vsel %vm333_vm0, %v455_v54, 0.0 }
  0xdc   : > { %v457_v31 = vsel %vm333_vm0, %v449_v25, 0.0  ;;  %v465_v50 = vsel %vm333_vm0, %v453_v41, 0.0 }
  0xdd   : > { %v424_v32 = vadd.f32 %v423_v28, %v422_v27  ;;  %v458_v33 = vadd.f32 %v457_v31, %v456_v29 }
  0xdf   : > { %v460_v37 = vadd.f32 %v459_v34, %v458_v33  ;;  %v426_v38 = vadd.f32 %v425_v35, %v424_v32 }
  0xe1   : > { %v428_v42 = vadd.f32 %v427_v40, %v426_v38  ;;  %v462_v43 = vadd.f32 %v461_v39, %v460_v37 }
  0xe3   : > { %v430_v47 = vadd.f32 %v429_v46, %v428_v42  ;;  %v464_v48 = vadd.f32 %v463_v45, %v462_v43 }
  0xe5   : > { %v432_v51 = vadd.f32 %v431_v49, %v430_v47  ;;  %v466_v52 = vadd.f32 %v465_v50, %v464_v48 }
  0xe7   : > { %v434_v56 = vadd.f32 %v433_v53, %v432_v51  ;;  %v468_v57 = vadd.f32 %v467_v55, %v466_v52 }
  0xe9   : > { %435 = vadd.xlane.f32.xlu0 %v434_v56  ;;  %v470_v59 = vadd.f32 %v469_v58, %v468_v57 }
  0xed   : > { %471 = vadd.xlane.f32.xlu0 %v470_v59 }
 0x172   : > { %v436_v60 = vpop.xlane.xlu0 %435 }
 0x173   : > { %v437_v61 = vrot.slane %v436_v60, 4 }
 0x175   : > { %v438_v62 = vadd.f32 %v437_v61, %v436_v60 }
 0x176   : > { %v472_v63 = vpop.xlane.xlu0 %471 }
 0x177   : > { %v439_v0 = vrot.slane %v438_v62, 2  ;;  %v473_v1 = vrot.slane %v472_v63, 4 }
 0x179   : > { %v474_v2 = vadd.f32 %v473_v1, %v472_v63  ;;  %v440_v3 = vadd.f32 %v439_v0, %v438_v62 }
 0x17b   : > { %v475_v4 = vrot.slane %v474_v2, 2  ;;  %v441_v5 = vrot.slane %v440_v3, 1 }
 0x17d   : > { %v476_v6 = vadd.f32 %v475_v4, %v474_v2  ;;  %v442_v7 = vadd.f32 %v441_v5, %v440_v3 }
 0x17f   : > { %685 = vpush %v442_v7  ;;  %v477_v8 = vrot.slane %v476_v6, 1 }
 0x181   : > { %v478_v9 = vadd.f32 %v477_v8, %v476_v6 }
 0x183   : > { %687 = vpush %v478_v9 }
 0x1b0   : > { %s686_s9 = spop %685 }
 0x1b1   : > { %s489_s10 = smul.f32 0.0009765625, %s686_s9 }
 0x1b3   : > { %v497_v10 = vstv %s489_s10  ;;  %s494_s14 = smul.f32 %s489_s10, %s489_s10 }
 0x1b4   : > { %s688_s15 = spop %687  ;;  %499 = vst.msk [vmem:[%s277_s13] sm:$0x1] %vm498_vm1, %v497_v10 }
 0x1b5   : > { %s493_s16 = smul.f32 0.0009765625, %s688_s15 }
 0x1b7   : > { %s495_s17 = ssub.f32 %s493_s16, %s494_s14 }
 0x1b9   : > { %s496_s23 = smax.f32 %s747_s22, %s495_s17 }
 0x1ba   : > { %s500_s24 = sadd.f32 1e-08, %s496_s23 }
 0x1bc   : > { %v501_v11 = vstv %s500_s24 }
 0x1bd   : > { %721 = vrsqrt.f32 %v501_v11 }
 0x1ca   : > { %v722_v12 = vpop.eup %721 }
 0x1cb   : > { %689 = vpush %v722_v12 }
 0x1fc   : > { %s690_s28 = spop %689 }
 0x1fd   : > { %v504_v13 = vstv %s690_s28 }
 0x1fe   : > { %505 = vst.msk [vmem:[%s280_s27] sm:$0x1] %vm498_vm1, %v504_v13 }
 0x1ff PF: > { %s16_s20 = sadd.s32 1, %s745_s20   ;;  %s875_s18 = smov %s741_s19 }
 0x200   : > { %p13_p5 = scmp.ge.s32.totalorder %s16_s20, 4   ;;  %s876_s19 = smov %s878_s21 }
 0x202   :  { %15 = sbr.rel (!%p13_p5) target bundleno = 2 (0x2), region = 98 }

// kernel: dprnn_forward.26
= control target key start
LH: loop header
LB: loop body
LE: loop exit
PB: predicated region body
PF: predicated region fallthrough
CT: control target
= control target key end

     0   :  { %s683_s21 = smov 0   ;;  %s685_s22 = smov 0   ;;  %s754_s0 = inlined_call_operand.vmem [shape: f32[2,64,16], index: 0, kind: input, shape index: {}]   ;;  %s755_s1 = inlined_call_operand.vmem [shape: f32[2,1,1], index: 1, kind: input, shape index: {}]   ;;  %s756_s2 = inlined_call_operand.vmem [shape: f32[2,1,1], index: 2, kind: input, shape index: {}]   ;;  %s757_s3 = inlined_call_operand.vmem [shape: f32[1,16], index: 3, kind: input, shape index: {}]   ;;  %s758_s4 = inlined_call_operand.vmem [shape: f32[1,16], index: 4, kind: input, shape index: {}]   ;;  %s759_s5 = inlined_call_operand.vmem [shape: f32[2,64,16], index: 5, kind: input, shape index: {}]   ;;  %s760_s6 = inlined_call_operand.vmem [shape: f32[2,64,16], index: 6, kind: output, shape index: {}]  }
   0x1   :  { %s687_s23 = smov 0  }
   0x2 LB: > { %s28_s24 = sadd.s32 1, %s641_s22  ;;  %p581_p0 = scmp.ge.s32.totalorder %s645_s23, 1  ;;  %s645_s23 = sphi %s687_s23, %s16_s23   ;;  %s641_s22 = sphi %s685_s22, %s762_s22   ;;  %s637_s21 = sphi %s683_s21, %s761_s21  }
   0x3   : > { %p30_p1 = scmp.ge.s32.totalorder %s28_s24, 2  ;;  %p266_p2 = scmp.lt.s32.totalorder %s645_s23, 3 }
   0x5   : > { %s764_s24 = smov (%p30_p1, %s28_s24), 0  ;;  %p267_p3 = pnand %p581_p0, %p266_p2 }
   0x6   : > { %p320_p4 = scmp.lt.s32.totalorder (!%p267_p3), %s637_s21, 1 }
   0x7   : > { %270 = sbr.rel (%p267_p3) target bundleno = 155 (0x9b), region = 44 }
   0xc   : > { %v647_v0 = vmov 0   ;;  %s766_s21 = smov (!%p320_p4, %s637_s21), 1  ;;  %vm445_vm0 = vcmask 130048   ;;  %v590_v16 = vld [vmem:[%s757_s3] ss:$0 sm:$0xff] }
   0xd   : > { %622 = vset.pattern.permute.xlu0 %v647_v0  ;;  %s331_s27 = scalar_lea.vmem %s755_s1, %s766_s21  ;;  %s334_s30 = scalar_lea.vmem %s756_s2, %s766_s21  ;;  %v591_v26 = vld [vmem:[%s758_s4] ss:$0 sm:$0xff] }
   0xe   : > { %v588_v1 = vld [vmem:[%s331_s27] ss:$0 sm:$0xff]  ;;  %s707_s7 = sshll.u32 %s766_s21, 6 }
   0xf   : > { %370 = vperm.xlu0 %622, %v588_v1   ;;  %v589_v2 = vld [vmem:[%s334_s30] ss:$0 sm:$0xff]  ;;  %s327_s10 = scalar_lea.vmem %s754_s0, %s707_s7  ;;  %s717_s13 = scalar_lea.vmem %s759_s5, %s707_s7 }
  0x10   : > { %v355_v3 = vld [vmem:[%s327_s10] sm:$0xff]  ;;  %v356_v4 = vld [vmem:[%s327_s10 + $0x8] sm:$0xff]  ;;  %v357_v6 = vld [vmem:[%s327_s10 + $0x10] sm:$0xff]  ;;  %s353_s20 = scalar_lea.vmem %s760_s6, %s707_s7 }
  0x11   : > { %v358_v7 = vld [vmem:[%s327_s10 + $0x18] sm:$0xff]  ;;  %v359_v8 = vld [vmem:[%s327_s10 + $0x20] sm:$0xff]  ;;  %v360_v9 = vld [vmem:[%s327_s10 + $0x28] sm:$0xff] }
  0x12   : > { %v361_v10 = vld [vmem:[%s327_s10 + $0x30] sm:$0xff]  ;;  %v362_v11 = vld [vmem:[%s327_s10 + $0x38] sm:$0xff]  ;;  %v429_v35 = vld [vmem:[%s717_s13] sm:$0xff] }
  0x13   : > { %388 = vperm.xlu0 %622, %v589_v2   ;;  %v430_v36 = vld [vmem:[%s717_s13 + $0x8] sm:$0xff]  ;;  %v431_v41 = vld [vmem:[%s717_s13 + $0x10] sm:$0xff]  ;;  %v432_v42 = vld [vmem:[%s717_s13 + $0x18] sm:$0xff] }
  0x14   : > { %v433_v43 = vld [vmem:[%s717_s13 + $0x20] sm:$0xff]  ;;  %v434_v48 = vld [vmem:[%s717_s13 + $0x28] sm:$0xff]  ;;  %v435_v49 = vld [vmem:[%s717_s13 + $0x30] sm:$0xff] }
  0x15   : > { %v436_v50 = vld [vmem:[%s717_s13 + $0x38] sm:$0xff] }
  0x8a   : > { %v371_v5 = vpop.permute.xlu0 %370 }
  0x8b   : > { %v373_v12 = vsub.f32 %v355_v3, %v371_v5  ;;  %v374_v13 = vsub.f32 %v356_v4, %v371_v5  ;;  %v375_v14 = vsub.f32 %v357_v6, %v371_v5  ;;  %v376_v15 = vsub.f32 %v358_v7, %v371_v5 }
  0x8c   : > { %v377_v18 = vsub.f32 %v359_v8, %v371_v5  ;;  %v378_v19 = vsub.f32 %v360_v9, %v371_v5  ;;  %v379_v20 = vsub.f32 %v361_v10, %v371_v5  ;;  %v380_v21 = vsub.f32 %v362_v11, %v371_v5 }
  0x8e   : > { %v389_v17 = vpop.permute.xlu0 %388 }
  0x8f   : > { %v391_v22 = vmul.f32 %v389_v17, %v373_v12  ;;  %v392_v23 = vmul.f32 %v389_v17, %v374_v13  ;;  %v393_v24 = vmul.f32 %v389_v17, %v375_v14  ;;  %v394_v25 = vmul.f32 %v389_v17, %v376_v15 }
  0x90   : > { %v395_v27 = vmul.f32 %v389_v17, %v377_v18  ;;  %v396_v28 = vmul.f32 %v389_v17, %v378_v19  ;;  %v397_v29 = vmul.f32 %v389_v17, %v379_v20  ;;  %v398_v30 = vmul.f32 %v389_v17, %v380_v21 }
  0x91   : > { %v406_v31 = vmul.f32 %v590_v16, %v391_v22  ;;  %v407_v32 = vmul.f32 %v590_v16, %v392_v23  ;;  %v408_v33 = vmul.f32 %v590_v16, %v393_v24  ;;  %v409_v34 = vmul.f32 %v590_v16, %v394_v25 }
  0x92   : > { %v410_v37 = vmul.f32 %v590_v16, %v395_v27  ;;  %v411_v38 = vmul.f32 %v590_v16, %v396_v28  ;;  %v412_v39 = vmul.f32 %v590_v16, %v397_v29  ;;  %v413_v40 = vmul.f32 %v590_v16, %v398_v30 }
  0x93   : > { %v421_v44 = vadd.f32 %v591_v26, %v406_v31  ;;  %v422_v45 = vadd.f32 %v591_v26, %v407_v32  ;;  %v423_v46 = vadd.f32 %v591_v26, %v408_v33  ;;  %v424_v47 = vadd.f32 %v591_v26, %v409_v34 }
  0x94   : > { %v425_v51 = vadd.f32 %v591_v26, %v410_v37  ;;  %v426_v52 = vadd.f32 %v591_v26, %v411_v38  ;;  %v427_v53 = vadd.f32 %v591_v26, %v412_v39  ;;  %v428_v54 = vadd.f32 %v591_v26, %v413_v40 }
  0x95   : > { %v437_v55 = vadd.f32 %v429_v35, %v421_v44  ;;  %v438_v56 = vadd.f32 %v430_v36, %v422_v45  ;;  %v439_v57 = vadd.f32 %v431_v41, %v423_v46  ;;  %v440_v58 = vadd.f32 %v432_v42, %v424_v47 }
  0x96   : > { %v441_v59 = vadd.f32 %v433_v43, %v425_v51  ;;  %v442_v60 = vadd.f32 %v434_v48, %v426_v52  ;;  %v443_v61 = vadd.f32 %v435_v49, %v427_v53  ;;  %v444_v62 = vadd.f32 %v436_v50, %v428_v54 }
  0x97   : > { %446 = vst.msk [vmem:[%s353_s20] sm:$0xff] %vm445_vm0, %v437_v55  ;;  %447 = vst.msk [vmem:[%s353_s20 + $0x8] sm:$0xff] %vm445_vm0, %v438_v56 }
  0x98   : > { %448 = vst.msk [vmem:[%s353_s20 + $0x10] sm:$0xff] %vm445_vm0, %v439_v57  ;;  %449 = vst.msk [vmem:[%s353_s20 + $0x18] sm:$0xff] %vm445_vm0, %v440_v58 }
  0x99   : > { %450 = vst.msk [vmem:[%s353_s20 + $0x20] sm:$0xff] %vm445_vm0, %v441_v59  ;;  %451 = vst.msk [vmem:[%s353_s20 + $0x28] sm:$0xff] %vm445_vm0, %v442_v60 }
  0x9a   : > { %452 = vst.msk [vmem:[%s353_s20 + $0x30] sm:$0xff] %vm445_vm0, %v443_v61  ;;  %453 = vst.msk [vmem:[%s353_s20 + $0x38] sm:$0xff] %vm445_vm0, %v444_v62 }
  0x9b PF: > { %s16_s23 = sadd.s32 1, %s645_s23   ;;  %s761_s21 = smov %s641_s22 }
  0x9c   : > { %p13_p5 = scmp.ge.s32.totalorder %s16_s23, 4   ;;  %s762_s22 = smov %s764_s24 }
  0x9e   :  { %15 = sbr.rel (!%p13_p5) target bundleno = 2 (0x2), region = 83 }

// kernel: dprnn_forward.24
= control target key start
LH: loop header
LB: loop body
LE: loop exit
PB: predicated region body
PF: predicated region fallthrough
CT: control target
= control target key end

     0   :  { %s3135_s15 = smov 0   ;;  %s3137_s16 = smov 0   ;;  %s4127_s0 = inlined_call_operand.vmem [shape: f32[4,128,4], index: 0, kind: input, shape index: {}]   ;;  %s4128_s1 = inlined_call_operand.vmem [shape: bf16[4,16], index: 1, kind: input, shape index: {}]   ;;  %s4129_s2 = inlined_call_operand.vmem [shape: f32[1,16], index: 2, kind: input, shape index: {}]   ;;  %s4130_s3 = inlined_call_operand.vmem [shape: bf16[4,16], index: 3, kind: input, shape index: {}]   ;;  %s4131_s4 = inlined_call_operand.vmem [shape: bf16[4,128,4], index: 4, kind: output, shape index: {}]  }
   0x1   :  { %s3139_s17 = smov 0   ;;  %s3141_s18 = smov 0  }
   0x2   :  { %s3143_s19 = smov 0  }
   0x3 LB: > { %s26_s20 = sadd.s32 1, %s3097_s18  ;;  %s2465_s21 = sadd.s32 4294967295, %s3101_s19   ;;  %s3101_s19 = sphi %s3143_s19, %s14_s19   ;;  %s3097_s18 = sphi %s3141_s18, %s4136_s18   ;;  %s3093_s17 = sphi %s3139_s17, %s4135_s17   ;;  %s3089_s16 = sphi %s3137_s16, %s4134_s16   ;;  %s3085_s15 = sphi %s3135_s15, %s4133_s15  }
   0x4   : > { %p28_p0 = scmp.ge.s32.totalorder %s26_s20, 2  ;;  %p42_p1 = scmp.ne.s32.totalorder %s3089_s16, %s3085_s15 }
   0x5   : > { %p43_p2 = scmp.eq.s32.totalorder %s3101_s19, 0  ;;  %p137_p4 = scmp.eq.s32.totalorder %s2465_s21, 1 }
   0x6   : > { %s4138_s20 = smov (%p28_p0, %s26_s20), 0  ;;  %s35_s23 = sadd.s32 1, %s3089_s16 }
   0x7   : > { %p44_p3 = por %p43_p2, %p42_p1  ;;  %s31_s22 = ssub.s32 %s3097_s18, %s4138_s20 }
   0x8   : > { %p33_p5 = scmp.eq.s32.totalorder %s31_s22, 0  ;;  %p3170_p6 = por %p137_p4, %p42_p1 }
   0x9   : > { %p2468_p7 = scmp.ge.s32.totalorder %s3101_s19, 2 }
   0xa   : > { %s3175_s25 = scalar_select %p33_p5, %s3089_s16, %s35_s23  }
   0xb   : > { %168 = sbr.rel (%p2468_p7) target bundleno = 36 (0x24), region = 28 }
  0x10   : > { %171 = sbr.rel (!%p44_p3) target bundleno = 36 (0x24), region = 32  ;;  %s173_s26 = sand.u32 (%p44_p3), 1, %s3089_s16  }
  0x11   : > { %s2605_s27 = sshll.u32 (%p44_p3), %s3097_s18, 6  ;;  %s2469_s28 = sshll.u32 (%p44_p3), %s173_s26, 8 }
  0x12   : > { %s3183_s5 = scalar_lea.vmem (%p44_p3), %s4127_s0, %s2605_s27  ;;  %s3188_s6 = scalar_lea.vmem (%p44_p3), [#allocation5], %s2469_s28 }
  0x13   : > { %v272_v0 = vld [vmem:[%s3183_s5] sm:$0xff] (%p44_p3)  ;;  %v274_v1 = vld [vmem:[%s3183_s5 + $0x8] sm:$0xff] (%p44_p3)  ;;  %v276_v2 = vld [vmem:[%s3183_s5 + $0x10] sm:$0xff] (%p44_p3) }
  0x14   : > { %273 = vst [vmem:[%s3188_s6] sm:$0xff] (%p44_p3), %v272_v0  ;;  %275 = vst [vmem:[%s3188_s6 + $0x8] sm:$0xff] (%p44_p3), %v274_v1  ;;  %v278_v3 = vld [vmem:[%s3183_s5 + $0x18] sm:$0xff] (%p44_p3)  ;;  %v280_v4 = vld [vmem:[%s3183_s5 + $0x20] sm:$0xff] (%p44_p3) }
  0x15   : > { %277 = vst [vmem:[%s3188_s6 + $0x10] sm:$0xff] %v276_v2  ;;  %v282_v5 = vld [vmem:[%s3183_s5 + $0x28] sm:$0xff]  ;;  %279 = vst [vmem:[%s3188_s6 + $0x18] sm:$0xff] %v278_v3  ;;  %v284_v6 = vld [vmem:[%s3183_s5 + $0x30] sm:$0xff] }
  0x16   : > { %281 = vst [vmem:[%s3188_s6 + $0x20] sm:$0xff] %v280_v4  ;;  %283 = vst [vmem:[%s3188_s6 + $0x28] sm:$0xff] %v282_v5  ;;  %v286_v7 = vld [vmem:[%s3183_s5 + $0x38] sm:$0xff]  ;;  %v288_v8 = vld [vmem:[%s3183_s5 + $0x80] sm:$0xff] }
  0x17   : > { %285 = vst [vmem:[%s3188_s6 + $0x30] sm:$0xff] %v284_v6  ;;  %287 = vst [vmem:[%s3188_s6 + $0x38] sm:$0xff] %v286_v7  ;;  %v290_v9 = vld [vmem:[%s3183_s5 + $0x88] sm:$0xff]  ;;  %v292_v10 = vld [vmem:[%s3183_s5 + $0x90] sm:$0xff] }
  0x18   : > { %289 = vst [vmem:[%s3188_s6 + $0x40] sm:$0xff] %v288_v8  ;;  %v294_v11 = vld [vmem:[%s3183_s5 + $0x98] sm:$0xff]  ;;  %291 = vst [vmem:[%s3188_s6 + $0x48] sm:$0xff] %v290_v9  ;;  %v296_v12 = vld [vmem:[%s3183_s5 + $0xa0] sm:$0xff] }
  0x19   : > { %293 = vst [vmem:[%s3188_s6 + $0x50] sm:$0xff] %v292_v10  ;;  %295 = vst [vmem:[%s3188_s6 + $0x58] sm:$0xff] %v294_v11  ;;  %v298_v13 = vld [vmem:[%s3183_s5 + $0xa8] sm:$0xff]  ;;  %v300_v14 = vld [vmem:[%s3183_s5 + $0xb0] sm:$0xff] }
  0x1a   : > { %297 = vst [vmem:[%s3188_s6 + $0x60] sm:$0xff] %v296_v12  ;;  %299 = vst [vmem:[%s3188_s6 + $0x68] sm:$0xff] %v298_v13  ;;  %v302_v15 = vld [vmem:[%s3183_s5 + $0xb8] sm:$0xff]  ;;  %v304_v16 = vld [vmem:[%s3183_s5 + $0x100] sm:$0xff] }
  0x1b   : > { %301 = vst [vmem:[%s3188_s6 + $0x70] sm:$0xff] %v300_v14  ;;  %v306_v17 = vld [vmem:[%s3183_s5 + $0x108] sm:$0xff]  ;;  %303 = vst [vmem:[%s3188_s6 + $0x78] sm:$0xff] %v302_v15  ;;  %v308_v18 = vld [vmem:[%s3183_s5 + $0x110] sm:$0xff] }
  0x1c   : > { %305 = vst [vmem:[%s3188_s6 + $0x80] sm:$0xff] %v304_v16  ;;  %307 = vst [vmem:[%s3188_s6 + $0x88] sm:$0xff] %v306_v17  ;;  %v310_v19 = vld [vmem:[%s3183_s5 + $0x118] sm:$0xff]  ;;  %v312_v20 = vld [vmem:[%s3183_s5 + $0x120] sm:$0xff] }
  0x1d   : > { %309 = vst [vmem:[%s3188_s6 + $0x90] sm:$0xff] %v308_v18  ;;  %311 = vst [vmem:[%s3188_s6 + $0x98] sm:$0xff] %v310_v19  ;;  %v314_v21 = vld [vmem:[%s3183_s5 + $0x128] sm:$0xff]  ;;  %v316_v22 = vld [vmem:[%s3183_s5 + $0x130] sm:$0xff] }
  0x1e   : > { %313 = vst [vmem:[%s3188_s6 + $0xa0] sm:$0xff] %v312_v20  ;;  %v318_v23 = vld [vmem:[%s3183_s5 + $0x138] sm:$0xff]  ;;  %315 = vst [vmem:[%s3188_s6 + $0xa8] sm:$0xff] %v314_v21  ;;  %v320_v24 = vld [vmem:[%s3183_s5 + $0x180] sm:$0xff] }
  0x1f   : > { %317 = vst [vmem:[%s3188_s6 + $0xb0] sm:$0xff] %v316_v22  ;;  %319 = vst [vmem:[%s3188_s6 + $0xb8] sm:$0xff] %v318_v23  ;;  %v322_v25 = vld [vmem:[%s3183_s5 + $0x188] sm:$0xff]  ;;  %v324_v26 = vld [vmem:[%s3183_s5 + $0x190] sm:$0xff] }
  0x20   : > { %321 = vst [vmem:[%s3188_s6 + $0xc0] sm:$0xff] %v320_v24  ;;  %323 = vst [vmem:[%s3188_s6 + $0xc8] sm:$0xff] %v322_v25  ;;  %v326_v27 = vld [vmem:[%s3183_s5 + $0x198] sm:$0xff]  ;;  %v328_v28 = vld [vmem:[%s3183_s5 + $0x1a0] sm:$0xff] }
  0x21   : > { %325 = vst [vmem:[%s3188_s6 + $0xd0] sm:$0xff] %v324_v26  ;;  %v330_v29 = vld [vmem:[%s3183_s5 + $0x1a8] sm:$0xff]  ;;  %327 = vst [vmem:[%s3188_s6 + $0xd8] sm:$0xff] %v326_v27  ;;  %v332_v30 = vld [vmem:[%s3183_s5 + $0x1b0] sm:$0xff] }
  0x22   : > { %329 = vst [vmem:[%s3188_s6 + $0xe0] sm:$0xff] %v328_v28  ;;  %331 = vst [vmem:[%s3188_s6 + $0xe8] sm:$0xff] %v330_v29  ;;  %v334_v31 = vld [vmem:[%s3183_s5 + $0x1b8] sm:$0xff] }
  0x23   : > { %333 = vst [vmem:[%s3188_s6 + $0xf0] sm:$0xff] %v332_v30  ;;  %335 = vst [vmem:[%s3188_s6 + $0xf8] sm:$0xff] %v334_v31 }
  0x24 PF: > { %p2472_p8 = scmp.ge.s32.totalorder %s3101_s19, 1  ;;  %p340_p9 = scmp.lt.s32.totalorder %s3101_s19, 3 }
  0x26   : > { %p341_p10 = pnand %p2472_p8, %p340_p9 }
  0x27   : > { %s347_s9 = sand.u32 (!%p341_p10), 1, %s3085_s15   ;;  %s3105_s22 = smov (!%p341_p10), 120  }
  0x28   : > { %344 = sbr.rel (%p341_p10) target bundleno = 2889 (0xb49), region = 70  ;;  %s2473_s10 = sshll.u32 (!%p341_p10), %s347_s9, 8 }
  0x29   : > { %s3280_s13 = scalar_lea.vmem (!%p341_p10), [#allocation5], %s2473_s10  ;;  %s3106_s23 = smov (!%p341_p10), 4  }
  0x2a   : > { %s3107_s26 = smov (!%p341_p10), 8   ;;  %s3108_s27 = smov (!%p341_p10), 116  }
  0x2b   : > { %s2474_s30 = sshll.u32 (!%p341_p10), %s347_s9, 7  ;;  %s3109_s5 = smov (!%p341_p10), 124  }
  0x2c   : > { %s3916_s15 = scalar_lea.vmem (!%p341_p10), [#allocation6], %s2474_s30 }
  0x2d   : > { %v446_v32 = vld [vmem:[%s4128_s1] sm:$0x3]  ;;  %vm503_vm0 = vcmask 1041408   ;;  %vm380_vm1 = vcmask 27648   ;;  %v3103_v36 = vmov 0   ;;  %vm389_vm2 = vcmask 31744  }
  0x2e   : > { %2750 = vmatprep.subr.msk.bf16.mxu0 %vm503_vm0, %v446_v32  ;;  %v505_v33 = vsel %vm503_vm0, %v446_v32, 0  ;;  %v3264_v34 = vld [vmem:[%s4130_s3] sm:$0x3]  ;;  %381 = vst.msk [vmem:[#allocation3] sm:$0xf] %vm380_vm1, %v3103_v36  ;;  %v399_v38 = vld [vmem:[%s3280_s13 + $0x8] sm:$0xff] }
  0x2f   : > { %2677 = vmatpush3.bf16.msra.mxu0 %v505_v33  ;;  %2751 = vmatprep.subr.msk.bf16.mxu1 %vm503_vm0, %v3264_v34  ;;  %v3270_v35 = vsel %vm503_vm0, %v3264_v34, 0  ;;  %382 = vst.msk [vmem:[#allocation3 + $0x4] sm:$0xf] %vm380_vm1, %v3103_v36  ;;  %383 = vst.msk [vmem:[#allocation3 + $0x8] sm:$0xf] %vm380_vm1, %v3103_v36  ;;  %v398_v37 = vld [vmem:[%s3280_s13] sm:$0xff] }
  0x30   : > { %384 = vst.msk [vmem:[#allocation3 + $0xc] sm:$0xf] %vm380_vm1, %v3103_v36  ;;  %385 = vst.msk [vmem:[#allocation3 + $0x10] sm:$0xf] %vm380_vm1, %v3103_v36  ;;  %v400_v39 = vld [vmem:[%s3280_s13 + $0x10] sm:$0xff]  ;;  %2711 = vmatpush3.bf16.msra.mxu1 %v3270_v35  ;;  %v430_v40 = vpack.c.bf16 %v399_v38, %v398_v37  ;;  %v401_v41 = vld [vmem:[%s3280_s13 + $0x18] sm:$0xff] }
  0x31   : > { %386 = vst.msk [vmem:[#allocation3 + $0x14] sm:$0xf] %vm380_vm1, %v3103_v36  ;;  %387 = vst.msk [vmem:[#allocation3 + $0x18] sm:$0xf] %vm380_vm1, %v3103_v36  ;;  %v402_v42 = vld [vmem:[%s3280_s13 + $0x20] sm:$0xff]  ;;  %v403_v43 = vld [vmem:[%s3280_s13 + $0x28] sm:$0xff]  ;;  %2752 = vmatprep.subr.msk.bf16.mxu1 %vm503_vm0, %v3264_v34  ;;  %v431_v44 = vpack.c.bf16 %v401_v41, %v400_v39 }
  0x32   : > { %388 = vst.msk [vmem:[#allocation3 + $0x1c] sm:$0xf] %vm380_vm1, %v3103_v36  ;;  %v432_v45 = vpack.c.bf16 %v403_v43, %v402_v42  ;;  %2678 = vmatprep.mubr.msk.bf16.mxu0 %vm389_vm2, %v430_v40  ;;  %v404_v46 = vld [vmem:[%s3280_s13 + $0x30] sm:$0xff]  ;;  %v405_v47 = vld [vmem:[%s3280_s13 + $0x38] sm:$0xff]  ;;  %v3104_v53 = vmov 0.0   ;;  %vm668_vm3 = vcmask 130048  }
  0x33   : > { %2679 = vmatmul.mubr.msk.bf16.vlgmr.msra.gmra.mxu0 %vm389_vm2, %v431_v44  ;;  %v433_v50 = vpack.c.bf16 %v405_v47, %v404_v46  ;;  %390 = vst.msk [vmem:[#allocation4] sm:$0xff] %vm389_vm2, %v3104_v53  ;;  %391 = vst.msk [vmem:[#allocation4 + $0x8] sm:$0xff] %vm389_vm2, %v3104_v53  ;;  %v3315_v54 = vld [vmem:[%s4129_s2] ss:$0 sm:$0xff]  ;;  %s2638_s6 = sshll.u32 (%p3170_p6), %s3093_s17, 5 }
  0x34   : > { %2682 = vmatprep.mubr.msk.bf16.mxu0 %vm389_vm2, %v432_v45  ;;  %392 = vst.msk [vmem:[#allocation4 + $0x10] sm:$0xff] %vm389_vm2, %v3104_v53  ;;  %393 = vst.msk [vmem:[#allocation4 + $0x18] sm:$0xff] %vm389_vm2, %v3104_v53  ;;  %s2228_s9 = scalar_lea.vmem (%p3170_p6), %s4131_s4, %s2638_s6 }
  0x35   : > { %394 = vst.msk [vmem:[#allocation4 + $0x20] sm:$0xff] %vm389_vm2, %v3104_v53  ;;  %395 = vst.msk [vmem:[#allocation4 + $0x28] sm:$0xff] %vm389_vm2, %v3104_v53 }
  0x36   : > { %v2802_v48 = vld [vmem:[#allocation3] sm:$0xff]   ;;  %396 = vst.msk [vmem:[#allocation4 + $0x30] sm:$0xff] %vm389_vm2, %v3104_v53  ;;  %397 = vst.msk [vmem:[#allocation4 + $0x38] sm:$0xff] %vm389_vm2, %v3104_v53 }
  0x37   : > { %v2803_v49 = vld [vmem:[#allocation3 + $0x8] sm:$0xff]   ;;  %2712 = vmatprep.mubr.msk.bf16.mxu1 %vm389_vm2, %v2802_v48 }
  0x38   : > { %v2804_v51 = vld [vmem:[#allocation3 + $0x10] sm:$0xff]   ;;  %2713 = vmatmul.mubr.msk.bf16.vlgmr.msra.gmra.mxu1 %vm389_vm2, %v2803_v49 }
  0x39   : > { %2716 = vmatprep.mubr.msk.bf16.mxu1 %vm389_vm2, %v2804_v51  ;;  %2721 = vmatpush3.bf16.msra.mxu1 %v3270_v35  ;;  %v2805_v52 = vld [vmem:[#allocation3 + $0x18] sm:$0xff]  }
  0x3a   : > { %2753 = vmatprep.subr.msk.bf16.mxu1 %vm503_vm0, %v3264_v34  ;;  %v710_v40 = vld [vmem:[#allocation4] sm:$0xff]  ;;  %v711_v42 = vld [vmem:[#allocation4 + $0x8] sm:$0xff] }
  0x3b   : > { %2683 = vmatmul.mubr.msk.bf16.gmra.mxu0 %vm389_vm2, %v433_v50  ;;  %v712_v43 = vld [vmem:[#allocation4 + $0x10] sm:$0xff]  ;;  %v713_v44 = vld [vmem:[#allocation4 + $0x18] sm:$0xff] }
  0x3c   : > { %v714_v45 = vld [vmem:[#allocation4 + $0x20] sm:$0xff]  ;;  %v715_v46 = vld [vmem:[#allocation4 + $0x28] sm:$0xff] }
  0x40   : > { %2717 = vmatmul.mubr.msk.bf16.gmra.mxu1 %vm389_vm2, %v2805_v52 }
  0xf3   : > { %v2680_v55 = vpop.f32.mrf.mxu0 }
  0xf4   : > { %v550_v56 = vadd.f32 %v2680_v55, %v3315_v54 }
  0xf5   : > { %v541_v57 = vpop.f32.mrf.mxu0 }
  0xf6   : > { %671 = vst.msk [vmem:[#allocation2 + $0x10] sm:$0xff] %vm668_vm3, %v550_v56  ;;  %v542_v58 = vadd.f32 %v3315_v54, %v541_v57 }
  0xf7   : > { %v2681_v59 = vpop.f32.mrf.mxu0 }
  0xf8   : > { %669 = vst.msk [vmem:[#allocation2] sm:$0xff] %vm668_vm3, %v542_v58  ;;  %v553_v60 = vadd.f32 %v2681_v59, %v3315_v54  ;;  %v2714_v61 = vpop.f32.mrf.mxu1 }
  0xf9   : > { %v544_v62 = vpop.f32.mrf.mxu0 }
  0xfa   : > { %672 = vst.msk [vmem:[#allocation2 + $0x18] sm:$0xff] %vm668_vm3, %v553_v60  ;;  %v545_v63 = vadd.f32 %v3315_v54, %v544_v62  ;;  %v795_v0 = vpop.f32.mrf.mxu1 }
  0xfb   : > { %v2684_v1 = vpop.f32.mrf.mxu0 }
  0xfc   : > { %670 = vst.msk [vmem:[#allocation2 + $0x8] sm:$0xff] %vm668_vm3, %v545_v63  ;;  %v566_v2 = vadd.f32 %v2684_v1, %v3315_v54  ;;  %v2715_v3 = vpop.f32.mrf.mxu1 }
  0xfd   : > { %v720_v4 = vld [vmem:[#allocation2 + $0x10] sm:$0xff]  ;;  %v557_v5 = vpop.f32.mrf.mxu0 }
  0xfe   : > { %v3326_v6 = vadd.f32 %v2714_v61, %v720_v4  ;;  %675 = vst.msk [vmem:[#allocation2 + $0x30] sm:$0xff] %vm668_vm3, %v566_v2  ;;  %v558_v7 = vadd.f32 %v3315_v54, %v557_v5  ;;  %v798_v8 = vpop.f32.mrf.mxu1 }
  0xff   : > { %v718_v9 = vld [vmem:[#allocation2] sm:$0xff]  ;;  %v2685_v10 = vpop.f32.mrf.mxu0 }
 0x100   : > { %2806 = vtanh.f32 %v3326_v6  ;;  %v826_v11 = vadd.f32 %v795_v0, %v718_v9  ;;  %673 = vst.msk [vmem:[#allocation2 + $0x20] sm:$0xff] %vm668_vm3, %v558_v7  ;;  %v569_v12 = vadd.f32 %v2685_v10, %v3315_v54  ;;  %v2718_v13 = vpop.f32.mrf.mxu1  ;;  %v2502_v47 = vmul.f32 -1.442695, %v3326_v6 }
 0x101   : > { %v721_v14 = vld [vmem:[#allocation2 + $0x18] sm:$0xff]  ;;  %v560_v15 = vpop.f32.mrf.mxu0 }
 0x102   : > { %v829_v16 = vadd.f32 %v2715_v3, %v721_v14  ;;  %676 = vst.msk [vmem:[#allocation2 + $0x38] sm:$0xff] %vm668_vm3, %v569_v12  ;;  %v561_v17 = vadd.f32 %v3315_v54, %v560_v15  ;;  %2808 = vtanh.f32 %v826_v11  ;;  %v811_v19 = vpop.f32.mrf.mxu1  ;;  %v2500_v48 = vmul.f32 -1.442695, %v826_v11 }
 0x103   : > { %v719_v18 = vld [vmem:[#allocation2 + $0x8] sm:$0xff] }
 0x104   : > { %v827_v20 = vadd.f32 %v798_v8, %v719_v18  ;;  %674 = vst.msk [vmem:[#allocation2 + $0x28] sm:$0xff] %vm668_vm3, %v561_v17  ;;  %2810 = vtanh.f32 %v829_v16  ;;  %v2719_v23 = vpop.f32.mrf.mxu1  ;;  %v2503_v49 = vmul.f32 -1.442695, %v829_v16  ;;  %v716_v18 = vld [vmem:[#allocation4 + $0x30] sm:$0xff] }
 0x105   : > { %v724_v21 = vld [vmem:[#allocation2 + $0x30] sm:$0xff] }
 0x106   : > { %2812 = vtanh.f32 %v827_v20  ;;  %v832_v25 = vadd.f32 %v2718_v13, %v724_v21  ;;  %v814_v27 = vpop.f32.mrf.mxu1  ;;  %v2501_v50 = vmul.f32 -1.442695, %v827_v20 }
 0x107   : > { %v722_v22 = vld [vmem:[#allocation2 + $0x20] sm:$0xff] }
 0x108   : > { %v830_v24 = vadd.f32 %v811_v19, %v722_v22  ;;  %v2506_v52 = vmul.f32 -1.442695, %v832_v25 }
 0x109   : > { %v725_v28 = vld [vmem:[#allocation2 + $0x38] sm:$0xff] }
 0x10a   : > { %2814 = vtanh.f32 %v830_v24  ;;  %v833_v31 = vadd.f32 %v2719_v23, %v725_v28  ;;  %v2504_v51 = vmul.f32 -1.442695, %v830_v24  ;;  %v717_v24 = vld [vmem:[#allocation4 + $0x38] sm:$0xff] }
 0x10b   : > { %v723_v26 = vld [vmem:[#allocation2 + $0x28] sm:$0xff]  ;;  %2816 = vtanh.f32 %v832_v25 }
 0x10c   : > { %v831_v29 = vadd.f32 %v814_v27, %v723_v26  ;;  %v2507_v58 = vmul.f32 -1.442695, %v833_v31 }
 0x10d   : > { %v2807_v30 = vpop.eup %2806 }
 0x10e   : > { %942 = vrot.lane.b32.xlu1 %v2807_v30, %s3105_s22  ;;  %2818 = vtanh.f32 %v831_v29  ;;  %v2505_v55 = vmul.f32 -1.442695, %v831_v29 }
 0x10f   : > { %v2809_v32 = vpop.eup %2808  ;;  %2820 = vtanh.f32 %v833_v31 }
 0x110   : > { %938 = vrot.lane.b32.xlu0 %v2809_v32, %s3105_s22  ;;  %2822 = vpow2.f32 %v2502_v47 }
 0x111   : > { %v2811_v33 = vpop.eup %2810  ;;  %2824 = vpow2.f32 %v2500_v48 }
 0x112   : > { %944 = vrot.lane.b32.xlu1 %v2811_v33, %s3105_s22  ;;  %2826 = vpow2.f32 %v2503_v49 }
 0x113   : > { %v2813_v36 = vpop.eup %2812  ;;  %2828 = vpow2.f32 %v2501_v50 }
 0x114   : > { %940 = vrot.lane.b32.xlu0 %v2813_v36, %s3105_s22  ;;  %2830 = vpow2.f32 %v2504_v51 }
 0x115   : > { %2832 = vpow2.f32 %v2506_v52 }
 0x116   : > { %2834 = vpow2.f32 %v2505_v55 }
 0x117   : > { %v2815_v37 = vpop.eup %2814 }
 0x118   : > { %946 = vrot.lane.b32.xlu0 %v2815_v37, %s3105_s22  ;;  %v2817_v38 = vpop.eup %2816 }
 0x11b   : > { %v2819_v39 = vpop.eup %2818 }
 0x11c   : > { %948 = vrot.lane.b32.xlu1 %v2819_v39, %s3105_s22  ;;  %950 = vrot.lane.b32.xlu0 %v2817_v38, %s3105_s22  ;;  %v2821_v41 = vpop.eup %2820 }
 0x11d   : > { %v2823_v53 = vpop.eup %2822 }
 0x11e   : > { %v860_v56 = vadd.f32 1.0, %v2823_v53  ;;  %v2825_v57 = vpop.eup %2824 }
 0x11f   : > { %v2827_v59 = vpop.eup %2826  ;;  %v858_v60 = vadd.f32 1.0, %v2825_v57 }
 0x120   : > { %952 = vrot.lane.b32.xlu1 %v2821_v41, %s3105_s22  ;;  %898 = vrot.lane.b32.xlu0 %v710_v40, %s3106_s23  ;;  %2836 = vrcp.f32 %v860_v56  ;;  %v861_v61 = vadd.f32 1.0, %v2827_v59  ;;  %v2829_v62 = vpop.eup %2828 }
 0x121   : > { %2838 = vpow2.f32 %v2507_v58  ;;  %v2831_v63 = vpop.eup %2830  ;;  %v859_v0 = vadd.f32 1.0, %v2829_v62 }
 0x122   : > { %2840 = vrcp.f32 %v858_v60  ;;  %v862_v1 = vadd.f32 1.0, %v2831_v63  ;;  %v2833_v2 = vpop.eup %2832 }
 0x123   : > { %2842 = vrcp.f32 %v861_v61  ;;  %v2835_v3 = vpop.eup %2834  ;;  %v864_v4 = vadd.f32 1.0, %v2833_v2 }
 0x124   : > { %900 = vrot.lane.b32.xlu1 %v711_v42, %s3106_s23  ;;  %902 = vrot.lane.b32.xlu0 %v712_v43, %s3106_s23  ;;  %2844 = vrcp.f32 %v859_v0  ;;  %v863_v6 = vadd.f32 1.0, %v2835_v3 }
 0x125   : > { %2846 = vrcp.f32 %v862_v1 }
 0x126   : > { %2848 = vrcp.f32 %v864_v4 }
 0x127   : > { %2850 = vrcp.f32 %v863_v6 }
 0x128   : > { %904 = vrot.lane.b32.xlu1 %v713_v44, %s3106_s23  ;;  %906 = vrot.lane.b32.xlu0 %v714_v45, %s3106_s23 }
 0x12c   : > { %908 = vrot.lane.b32.xlu1 %v715_v46, %s3106_s23 }
 0x12d   : > { %v3351_v5 = vpop.eup %2836 }
 0x12e   : > { %v2839_v8 = vpop.eup %2838 }
 0x12f   : > { %v3355_v11 = vpop.eup %2840  ;;  %v865_v12 = vadd.f32 1.0, %v2839_v8 }
 0x130   : > { %v3357_v13 = vpop.eup %2842 }
 0x131   : > { %2852 = vrcp.f32 %v865_v12  ;;  %v3363_v19 = vpop.eup %2844  ;;  %v406_v12 = vld [vmem:[%s3280_s13 + $0x40] sm:$0xff] }
 0x132   : > { %v3367_v22 = vpop.eup %2846 }
 0x133   : > { %v3372_v27 = vpop.eup %2848 }
 0x134   : > { %v3375_v28 = vpop.eup %2850 }
 0x13e   : > { %v3381_v32 = vpop.eup %2852 }
 0x180   : > { %v943_v7 = vpop.permute.xlu1 %942 }
 0x181   : > { %v964_v9 = vmul.f32 %v3351_v5, %v943_v7 }
 0x182   : > { %v939_v10 = vpop.permute.xlu0 %938 }
 0x183   : > { %982 = vrot.lane.b32.xlu0 %v964_v9, %s3106_s23  ;;  %v962_v14 = vmul.f32 %v3355_v11, %v939_v10 }
 0x184   : > { %v945_v15 = vpop.permute.xlu1 %944 }
 0x185   : > { %v965_v16 = vmul.f32 %v3357_v13, %v945_v15  ;;  %v408_v15 = vld [vmem:[%s3280_s13 + $0x50] sm:$0xff] }
 0x186   : > { %v941_v17 = vpop.permute.xlu0 %940 }
 0x187   : > { %978 = vrot.lane.b32.xlu0 %v962_v14, %s3106_s23  ;;  %984 = vrot.lane.b32.xlu1 %v965_v16, %s3106_s23  ;;  %v963_v20 = vmul.f32 %v3363_v19, %v941_v17  ;;  %v407_v14 = vld [vmem:[%s3280_s13 + $0x48] sm:$0xff]  ;;  %v409_v17 = vld [vmem:[%s3280_s13 + $0x58] sm:$0xff] }
 0x188   : > { %v434_v16 = vpack.c.bf16 %v407_v14, %v406_v12 }
 0x18a   : > { %v947_v21 = vpop.permute.xlu0 %946  ;;  %2686 = vmatprep.mubr.msk.bf16.mxu0 %vm389_vm2, %v434_v16 }
 0x18b   : > { %910 = vrot.lane.b32.xlu0 %v716_v18, %s3106_s23  ;;  %980 = vrot.lane.b32.xlu1 %v963_v20, %s3106_s23  ;;  %v966_v23 = vmul.f32 %v3367_v22, %v947_v21  ;;  %v410_v18 = vld [vmem:[%s3280_s13 + $0x60] sm:$0xff]  ;;  %v411_v20 = vld [vmem:[%s3280_s13 + $0x68] sm:$0xff]  ;;  %v435_v21 = vpack.c.bf16 %v409_v17, %v408_v15 }
 0x18d   : > { %2687 = vmatmul.mubr.msk.bf16.gmra.mxu0 %vm389_vm2, %v435_v21 }
 0x18e   : > { %v949_v25 = vpop.permute.xlu1 %948  ;;  %v951_v26 = vpop.permute.xlu0 %950 }
 0x18f   : > { %986 = vrot.lane.b32.xlu0 %v966_v23, %s3106_s23  ;;  %912 = vrot.lane.b32.xlu1 %v717_v24, %s3106_s23  ;;  %v968_v29 = vmul.f32 %v3372_v27, %v951_v26  ;;  %v967_v30 = vmul.f32 %v3375_v28, %v949_v25  ;;  %v436_v23 = vpack.c.bf16 %v411_v20, %v410_v18  ;;  %v412_v26 = vld [vmem:[%s3280_s13 + $0x70] sm:$0xff] }
 0x191   : > { %2690 = vmatprep.mubr.msk.bf16.mxu0 %vm389_vm2, %v436_v23 }
 0x192   : > { %v953_v31 = vpop.permute.xlu1 %952  ;;  %v899_v36 = vpop.permute.xlu0 %898 }
 0x193   : > { %990 = vrot.lane.b32.xlu0 %v968_v29, %s3106_s23  ;;  %988 = vrot.lane.b32.xlu1 %v967_v30, %s3106_s23  ;;  %v969_v33 = vmul.f32 %v3381_v32, %v953_v31  ;;  %v922_v43 = vmul.f32 %v3355_v11, %v899_v36  ;;  %v413_v29 = vld [vmem:[%s3280_s13 + $0x78] sm:$0xff] }
 0x194   : > { %v437_v31 = vpack.c.bf16 %v413_v29, %v412_v26 }
 0x196   : > { %v901_v37 = vpop.permute.xlu1 %900  ;;  %v903_v38 = vpop.permute.xlu0 %902  ;;  %2691 = vmatmul.mubr.msk.bf16.gmra.mxu0 %vm389_vm2, %v437_v31 }
 0x197   : > { %992 = vrot.lane.b32.xlu1 %v969_v33, %s3106_s23  ;;  %v924_v45 = vmul.f32 %v3351_v5, %v903_v38  ;;  %v923_v49 = vmul.f32 %v3363_v19, %v901_v37 }
 0x19a   : > { %v905_v39 = vpop.permute.xlu1 %904  ;;  %v907_v40 = vpop.permute.xlu0 %906 }
 0x19b   : > { %v925_v52 = vmul.f32 %v3357_v13, %v905_v39  ;;  %v926_v55 = vmul.f32 %v3367_v22, %v907_v40 }
 0x19e   : > { %v909_v42 = vpop.permute.xlu1 %908 }
 0x19f   : > { %v927_v61 = vmul.f32 %v3375_v28, %v909_v42 }
 0x1f5   : > { %v983_v41 = vpop.permute.xlu0 %982 }
 0x1f6   : > { %v3389_v48 = vadd.f32 %v983_v41, %v924_v45 }
 0x1f9   : > { %v979_v44 = vpop.permute.xlu0 %978  ;;  %v985_v46 = vpop.permute.xlu1 %984 }
 0x1fa   : > { %v3387_v47 = vadd.f32 %v979_v44, %v922_v43  ;;  %v3398_v56 = vadd.f32 %v985_v46, %v925_v52 }
 0x1fc   : > { %2854 = vtanh.f32 %v3387_v47 }
 0x1fd   : > { %v911_v50 = vpop.permute.xlu0 %910  ;;  %v981_v51 = vpop.permute.xlu1 %980  ;;  %2856 = vtanh.f32 %v3389_v48 }
 0x1fe   : > { %v3394_v53 = vadd.f32 %v981_v51, %v923_v49  ;;  %v928_v60 = vmul.f32 %v3372_v27, %v911_v50 }
 0x200   : > { %2858 = vtanh.f32 %v3394_v53 }
 0x201   : > { %v987_v57 = vpop.permute.xlu0 %986  ;;  %v913_v58 = vpop.permute.xlu1 %912 }
 0x202   : > { %v3401_v59 = vadd.f32 %v987_v57, %v926_v55  ;;  %v929_v3 = vmul.f32 %v3381_v32, %v913_v58 }
 0x204   : > { %2860 = vtanh.f32 %v3401_v59 }
 0x205   : > { %2862 = vtanh.f32 %v3398_v56  ;;  %v991_v62 = vpop.permute.xlu0 %990  ;;  %v989_v63 = vpop.permute.xlu1 %988 }
 0x206   : > { %v3407_v0 = vadd.f32 %v991_v62, %v928_v60  ;;  %v3409_v1 = vadd.f32 %v989_v63, %v927_v61 }
 0x208   : > { %2864 = vtanh.f32 %v3407_v0 }
 0x209   : > { %v2855_v2 = vpop.eup %2854  ;;  %2866 = vtanh.f32 %v3409_v1  ;;  %v993_v4 = vpop.permute.xlu1 %992 }
 0x20a   : > { %1026 = vrot.lane.b32.xlu0 %v2855_v2, %s3107_s26  ;;  %v3415_v6 = vadd.f32 %v993_v4, %v929_v3  ;;  %v2857_v7 = vpop.eup %2856 }
 0x20c   : > { %2868 = vtanh.f32 %v3415_v6 }
 0x20d   : > { %v2859_v8 = vpop.eup %2858 }
 0x20e   : > { %1030 = vrot.lane.b32.xlu0 %v2857_v7, %s3107_s26  ;;  %1028 = vrot.lane.b32.xlu1 %v2859_v8, %s3107_s26 }
 0x211   : > { %v2861_v9 = vpop.eup %2860 }
 0x212   : > { %v2863_v10 = vpop.eup %2862  ;;  %1034 = vrot.lane.b32.xlu0 %v2861_v9, %s3107_s26 }
 0x213   : > { %1032 = vrot.lane.b32.xlu1 %v2863_v10, %s3107_s26 }
 0x215   : > { %v2865_v24 = vpop.eup %2864 }
 0x216   : > { %v2867_v25 = vpop.eup %2866  ;;  %1038 = vrot.lane.b32.xlu0 %v2865_v24, %s3107_s26 }
 0x217   : > { %1036 = vrot.lane.b32.xlu1 %v2867_v25, %s3107_s26 }
 0x219   : > { %v2869_v30 = vpop.eup %2868 }
 0x21b   : > { %1040 = vrot.lane.b32.xlu1 %v2869_v30, %s3107_s26 }
 0x27c   : > { %v1027_v33 = vpop.permute.xlu0 %1026 }
 0x27d   : > { %v3438_v38 = vmul.f32 %v3355_v11, %v1027_v33 }
 0x280   : > { %v1031_v36 = vpop.permute.xlu0 %1030  ;;  %v1029_v37 = vpop.permute.xlu1 %1028 }
 0x281   : > { %v3441_v39 = vmul.f32 %v3363_v19, %v1029_v37  ;;  %v3446_v43 = vmul.f32 %v3351_v5, %v1031_v36 }
 0x283   : > { %v1058_v40 = vpack.c.bf16 %v3441_v39, %v3438_v38 }
 0x284   : > { %v1035_v42 = vpop.permute.xlu0 %1034 }
 0x285   : > { %v1033_v41 = vpop.permute.xlu1 %1032  ;;  %1124 = vrot.lane.b32.xlu0 %v1058_v40, %s3108_s27  ;;  %v3455_v19 = vmul.f32 %v3367_v22, %v1035_v42 }
 0x286   : > { %v3449_v44 = vmul.f32 %v3357_v13, %v1033_v41 }
 0x288   : > { %v1059_v11 = vpack.c.bf16 %v3449_v44, %v3446_v43  ;;  %v1039_v5 = vpop.permute.xlu0 %1038 }
 0x289   : > { %v1037_v45 = vpop.permute.xlu1 %1036  ;;  %v3464_v50 = vmul.f32 %v3372_v27, %v1039_v5 }
 0x28a   : > { %v3458_v46 = vmul.f32 %v3375_v28, %v1037_v45  ;;  %1126 = vrot.lane.b32.xlu1 %v1059_v11, %s3108_s27  ;;  %v2688_v28 = vpop.f32.mrf.mxu0 }
 0x28b   : > { %v582_v52 = vadd.f32 %v2688_v28, %v3315_v54 }
 0x28c   : > { %v1060_v13 = vpack.c.bf16 %v3458_v46, %v3455_v19  ;;  %v573_v55 = vpop.f32.mrf.mxu0 }
 0x28d   : > { %v1041_v49 = vpop.permute.xlu1 %1040  ;;  %679 = vst.msk [vmem:[#allocation2 + $0x50] sm:$0xff] %vm668_vm3, %v582_v52  ;;  %v574_v57 = vadd.f32 %v3315_v54, %v573_v55 }
 0x28e   : > { %v3467_v51 = vmul.f32 %v3381_v32, %v1041_v49  ;;  %1128 = vrot.lane.b32.xlu0 %v1060_v13, %s3108_s27  ;;  %v2689_v27 = vpop.f32.mrf.mxu0 }
 0x28f   : > { %677 = vst.msk [vmem:[#allocation2 + $0x40] sm:$0xff] %vm668_vm3, %v574_v57  ;;  %v585_v32 = vadd.f32 %v2689_v27, %v3315_v54 }
 0x290   : > { %v1061_v22 = vpack.c.bf16 %v3467_v51, %v3464_v50  ;;  %v576_v58 = vpop.f32.mrf.mxu0 }
 0x291   : > { %680 = vst.msk [vmem:[#allocation2 + $0x58] sm:$0xff] %vm668_vm3, %v585_v32  ;;  %v577_v60 = vadd.f32 %v3315_v54, %v576_v58 }
 0x292   : > { %1130 = vrot.lane.b32.xlu1 %v1061_v22, %s3108_s27  ;;  %v2692_v61 = vpop.f32.mrf.mxu0 }
 0x293   : > { %678 = vst.msk [vmem:[#allocation2 + $0x48] sm:$0xff] %vm668_vm3, %v577_v60  ;;  %v598_v62 = vadd.f32 %v2692_v61, %v3315_v54 }
 0x294   : > { %v589_v63 = vpop.f32.mrf.mxu0  ;;  %v1118_v16 = vld [vmem:[#allocation2 + $0x50] sm:$0xff] }
 0x295   : > { %683 = vst.msk [vmem:[#allocation2 + $0x70] sm:$0xff] %vm668_vm3, %v598_v62  ;;  %v590_v2 = vadd.f32 %v3315_v54, %v589_v63 }
 0x296   : > { %v2693_v3 = vpop.f32.mrf.mxu0  ;;  %v1116_v17 = vld [vmem:[#allocation2 + $0x40] sm:$0xff] }
 0x297   : > { %681 = vst.msk [vmem:[#allocation2 + $0x60] sm:$0xff] %vm668_vm3, %v590_v2  ;;  %v601_v4 = vadd.f32 %v2693_v3, %v3315_v54 }
 0x298   : > { %v592_v7 = vpop.f32.mrf.mxu0  ;;  %v1119_v29 = vld [vmem:[#allocation2 + $0x58] sm:$0xff] }
 0x299   : > { %684 = vst.msk [vmem:[#allocation2 + $0x78] sm:$0xff] %vm668_vm3, %v601_v4  ;;  %v593_v8 = vadd.f32 %v3315_v54, %v592_v7 }
 0x29a   : > { %v1117_v24 = vld [vmem:[#allocation2 + $0x48] sm:$0xff] }
 0x29b   : > { %682 = vst.msk [vmem:[#allocation2 + $0x68] sm:$0xff] %vm668_vm3, %v593_v8 }
 0x29c   : > { %v1122_v31 = vld [vmem:[#allocation2 + $0x70] sm:$0xff] }
 0x29e   : > { %v1120_v33 = vld [vmem:[#allocation2 + $0x60] sm:$0xff] }
 0x2a0   : > { %v1123_v5 = vld [vmem:[#allocation2 + $0x78] sm:$0xff] }
 0x2a2   : > { %v1121_v42 = vld [vmem:[#allocation2 + $0x68] sm:$0xff] }
 0x2f7   : > { %v1125_v9 = vpop.permute.xlu0 %1124 }
 0x2f8   : > { %2722 = vmatprep.mubr.msk.bf16.mxu1 %vm389_vm2, %v1125_v9 }
 0x2fc   : > { %v1127_v10 = vpop.permute.xlu1 %1126 }
 0x2fd   : > { %2723 = vmatmul.mubr.msk.bf16.vlgmr.msra.gmra.mxu1 %vm389_vm2, %v1127_v10 }
 0x2fe   : > { %2731 = vmatpush3.bf16.msra.mxu1 %v3270_v35 }
 0x2ff   : > { %2754 = vmatprep.subr.msk.bf16.mxu1 %vm503_vm0, %v3264_v34 }
 0x300   : > { %v1129_v12 = vpop.permute.xlu0 %1128 }
 0x301   : > { %2726 = vmatprep.mubr.msk.bf16.mxu1 %vm389_vm2, %v1129_v12 }
 0x304   : > { %v1131_v14 = vpop.permute.xlu1 %1130 }
 0x305   : > { %2727 = vmatmul.mubr.msk.bf16.gmra.mxu1 %vm389_vm2, %v1131_v14 }
 0x3bd   : > { %v2724_v15 = vpop.f32.mrf.mxu1 }
 0x3be   : > { %v1211_v23 = vadd.f32 %v2724_v15, %v1118_v16 }
 0x3bf   : > { %v1178_v18 = vpop.f32.mrf.mxu1 }
 0x3c0   : > { %v1209_v20 = vadd.f32 %v1178_v18, %v1116_v17  ;;  %v2522_v60 = vmul.f32 -1.442695, %v1211_v23 }
 0x3c1   : > { %v2725_v21 = vpop.f32.mrf.mxu1 }
 0x3c2   : > { %2870 = vtanh.f32 %v1209_v20  ;;  %v1212_v34 = vadd.f32 %v2725_v21, %v1119_v29  ;;  %v2520_v58 = vmul.f32 -1.442695, %v1209_v20 }
 0x3c3   : > { %v1181_v25 = vpop.f32.mrf.mxu1  ;;  %2872 = vtanh.f32 %v1211_v23 }
 0x3c4   : > { %v1210_v26 = vadd.f32 %v1181_v25, %v1117_v24  ;;  %v2523_v62 = vmul.f32 -1.442695, %v1212_v34 }
 0x3c5   : > { %v2728_v30 = vpop.f32.mrf.mxu1 }
 0x3c6   : > { %2874 = vtanh.f32 %v1210_v26  ;;  %v1215_v41 = vadd.f32 %v2728_v30, %v1122_v31  ;;  %v2521_v61 = vmul.f32 -1.442695, %v1210_v26 }
 0x3c7   : > { %v1194_v36 = vpop.f32.mrf.mxu1  ;;  %2876 = vtanh.f32 %v1212_v34 }
 0x3c8   : > { %v1213_v37 = vadd.f32 %v1194_v36, %v1120_v33  ;;  %v2526_v2 = vmul.f32 -1.442695, %v1215_v41 }
 0x3c9   : > { %v2729_v40 = vpop.f32.mrf.mxu1 }
 0x3ca   : > { %2878 = vtanh.f32 %v1213_v37  ;;  %v1216_v13 = vadd.f32 %v2729_v40, %v1123_v5  ;;  %v2524_v63 = vmul.f32 -1.442695, %v1213_v37 }
 0x3cb   : > { %v1197_v11 = vpop.f32.mrf.mxu1  ;;  %2880 = vtanh.f32 %v1215_v41 }
 0x3cc   : > { %v1214_v45 = vadd.f32 %v1197_v11, %v1121_v42  ;;  %v2527_v4 = vmul.f32 -1.442695, %v1216_v13 }
 0x3ce   : > { %2882 = vtanh.f32 %v1214_v45  ;;  %v2525_v3 = vmul.f32 -1.442695, %v1214_v45 }
 0x3cf   : > { %v2871_v49 = vpop.eup %2870  ;;  %2884 = vtanh.f32 %v1216_v13 }
 0x3d0   : > { %1289 = vrot.lane.b32.xlu0 %v2871_v49, %s3105_s22  ;;  %v2873_v22 = vpop.eup %2872  ;;  %2886 = vpow2.f32 %v2520_v58 }
 0x3d1   : > { %2888 = vpow2.f32 %v2522_v60 }
 0x3d2   : > { %2890 = vpow2.f32 %v2521_v61 }
 0x3d3   : > { %v2875_v28 = vpop.eup %2874  ;;  %2892 = vpow2.f32 %v2523_v62 }
 0x3d4   : > { %1293 = vrot.lane.b32.xlu0 %v2873_v22, %s3105_s22  ;;  %1291 = vrot.lane.b32.xlu1 %v2875_v28, %s3105_s22  ;;  %v2877_v52 = vpop.eup %2876  ;;  %2894 = vpow2.f32 %v2524_v63 }
 0x3d5   : > { %2896 = vpow2.f32 %v2526_v2 }
 0x3d6   : > { %2898 = vpow2.f32 %v2525_v3 }
 0x3d7   : > { %v2879_v55 = vpop.eup %2878  ;;  %2900 = vpow2.f32 %v2527_v4 }
 0x3d8   : > { %1295 = vrot.lane.b32.xlu1 %v2877_v52, %s3105_s22  ;;  %1297 = vrot.lane.b32.xlu0 %v2879_v55, %s3105_s22  ;;  %v2881_v57 = vpop.eup %2880 }
 0x3db   : > { %v2883_v27 = vpop.eup %2882 }
 0x3dc   : > { %1301 = vrot.lane.b32.xlu0 %v2881_v57, %s3105_s22  ;;  %1299 = vrot.lane.b32.xlu1 %v2883_v27, %s3105_s22  ;;  %v2885_v32 = vpop.eup %2884 }
 0x3dd   : > { %v2887_v7 = vpop.eup %2886 }
 0x3de   : > { %v2889_v8 = vpop.eup %2888  ;;  %v1241_v9 = vadd.f32 1.0, %v2887_v7 }
 0x3df   : > { %v2891_v10 = vpop.eup %2890  ;;  %v1243_v12 = vadd.f32 1.0, %v2889_v8 }
 0x3e0   : > { %1303 = vrot.lane.b32.xlu1 %v2885_v32, %s3105_s22  ;;  %v2893_v14 = vpop.eup %2892  ;;  %2902 = vrcp.f32 %v1241_v9  ;;  %v1242_v15 = vadd.f32 1.0, %v2891_v10 }
 0x3e1   : > { %v2895_v16 = vpop.eup %2894  ;;  %2904 = vrcp.f32 %v1243_v12  ;;  %v1244_v17 = vadd.f32 1.0, %v2893_v14 }
 0x3e2   : > { %v2897_v18 = vpop.eup %2896  ;;  %2906 = vrcp.f32 %v1242_v15  ;;  %v1245_v20 = vadd.f32 1.0, %v2895_v16 }
 0x3e3   : > { %v2899_v21 = vpop.eup %2898  ;;  %2908 = vrcp.f32 %v1244_v17  ;;  %v1247_v23 = vadd.f32 1.0, %v2897_v18 }
 0x3e4   : > { %2910 = vrcp.f32 %v1245_v20  ;;  %v1246_v24 = vadd.f32 1.0, %v2899_v21  ;;  %v2901_v25 = vpop.eup %2900 }
 0x3e5   : > { %2912 = vrcp.f32 %v1247_v23  ;;  %v1248_v26 = vadd.f32 1.0, %v2901_v25  ;;  %v414_v25 = vld [vmem:[%s3280_s13 + $0x80] sm:$0xff] }
 0x3e6   : > { %2914 = vrcp.f32 %v1246_v24 }
 0x3e7   : > { %2916 = vrcp.f32 %v1248_v26  ;;  %v415_v26 = vld [vmem:[%s3280_s13 + $0x88] sm:$0xff] }
 0x3ed   : > { %v3504_v29 = vpop.eup %2902 }
 0x3ee   : > { %v3507_v31 = vpop.eup %2904  ;;  %v1273_v61 = vmul.f32 %v3504_v29, %v3387_v47 }
 0x3ef   : > { %v3510_v33 = vpop.eup %2906  ;;  %v1275_v3 = vmul.f32 %v3507_v31, %v3389_v48 }
 0x3f0   : > { %v3514_v42 = vpop.eup %2908  ;;  %v1274_v2 = vmul.f32 %v3510_v33, %v3394_v53 }
 0x3f1   : > { %v3518_v11 = vpop.eup %2910  ;;  %v1276_v47 = vmul.f32 %v3514_v42, %v3398_v56 }
 0x3f2   : > { %v3522_v22 = vpop.eup %2912  ;;  %v1277_v10 = vmul.f32 %v3518_v11, %v3401_v59 }
 0x3f3   : > { %v3526_v28 = vpop.eup %2914  ;;  %v1279_v16 = vmul.f32 %v3522_v22, %v3407_v0 }
 0x3f4   : > { %v3532_v32 = vpop.eup %2916  ;;  %v1278_v15 = vmul.f32 %v3526_v28, %v3409_v1 }
 0x3f5   : > { %v1280_v20 = vmul.f32 %v3532_v32, %v3415_v6 }
 0x442   : > { %v1290_v30 = vpop.permute.xlu0 %1289 }
 0x443   : > { %v1313_v34 = vmul.f32 %v3504_v29, %v1290_v30  ;;  %v416_v30 = vld [vmem:[%s3280_s13 + $0x90] sm:$0xff] }
 0x445   : > { %1329 = vrot.lane.b32.xlu0 %v1313_v34, %s3106_s23 }
 0x446   : > { %v1292_v36 = vpop.permute.xlu1 %1291  ;;  %v1294_v37 = vpop.permute.xlu0 %1293 }
 0x447   : > { %v1314_v40 = vmul.f32 %v3510_v33, %v1292_v36  ;;  %v1315_v41 = vmul.f32 %v3507_v31, %v1294_v37  ;;  %v438_v36 = vpack.c.bf16 %v415_v26, %v414_v25  ;;  %v417_v37 = vld [vmem:[%s3280_s13 + $0x98] sm:$0xff] }
 0x449   : > { %1331 = vrot.lane.b32.xlu1 %v1314_v40, %s3106_s23  ;;  %1333 = vrot.lane.b32.xlu0 %v1315_v41, %s3106_s23  ;;  %v418_v40 = vld [vmem:[%s3280_s13 + $0xa0] sm:$0xff]  ;;  %v419_v41 = vld [vmem:[%s3280_s13 + $0xa8] sm:$0xff] }
 0x44a   : > { %v1296_v45 = vpop.permute.xlu1 %1295  ;;  %v1298_v5 = vpop.permute.xlu0 %1297  ;;  %2694 = vmatprep.mubr.msk.bf16.mxu0 %vm389_vm2, %v438_v36 }
 0x44b   : > { %v1316_v13 = vmul.f32 %v3514_v42, %v1296_v45  ;;  %v1317_v49 = vmul.f32 %v3518_v11, %v1298_v5  ;;  %v439_v45 = vpack.c.bf16 %v417_v37, %v416_v30  ;;  %v440_v5 = vpack.c.bf16 %v419_v41, %v418_v40 }
 0x44d   : > { %1335 = vrot.lane.b32.xlu1 %v1316_v13, %s3106_s23  ;;  %1337 = vrot.lane.b32.xlu0 %v1317_v49, %s3106_s23 }
 0x44e   : > { %v1300_v52 = vpop.permute.xlu1 %1299  ;;  %v1302_v55 = vpop.permute.xlu0 %1301  ;;  %2695 = vmatmul.mubr.msk.bf16.gmra.mxu0 %vm389_vm2, %v439_v45 }
 0x44f   : > { %v1318_v57 = vmul.f32 %v3526_v28, %v1300_v52  ;;  %v1319_v27 = vmul.f32 %v3522_v22, %v1302_v55  ;;  %2698 = vmatprep.mubr.msk.bf16.mxu0 %vm389_vm2, %v440_v5  ;;  %v420_v52 = vld [vmem:[%s3280_s13 + $0xb0] sm:$0xff]  ;;  %v421_v55 = vld [vmem:[%s3280_s13 + $0xb8] sm:$0xff] }
 0x451   : > { %1339 = vrot.lane.b32.xlu1 %v1318_v57, %s3106_s23  ;;  %1341 = vrot.lane.b32.xlu0 %v1319_v27, %s3106_s23  ;;  %v441_v27 = vpack.c.bf16 %v421_v55, %v420_v52 }
 0x452   : > { %v1304_v58 = vpop.permute.xlu1 %1303 }
 0x453   : > { %v1320_v60 = vmul.f32 %v3532_v32, %v1304_v58 }
 0x455   : > { %1343 = vrot.lane.b32.xlu1 %v1320_v60, %s3106_s23 }
 0x456   : > { %2699 = vmatmul.mubr.msk.bf16.gmra.mxu0 %vm389_vm2, %v441_v27 }
 0x4b7   : > { %v1330_v62 = vpop.permute.xlu0 %1329 }
 0x4b8   : > { %v3538_v63 = vadd.f32 %v1330_v62, %v1273_v61 }
 0x4ba   : > { %2918 = vtanh.f32 %v3538_v63 }
 0x4bb   : > { %v1332_v4 = vpop.permute.xlu1 %1331  ;;  %v1334_v7 = vpop.permute.xlu0 %1333 }
 0x4bc   : > { %v3545_v8 = vadd.f32 %v1332_v4, %v1274_v2  ;;  %v3547_v9 = vadd.f32 %v1334_v7, %v1275_v3 }
 0x4be   : > { %2920 = vtanh.f32 %v3545_v8 }
 0x4bf   : > { %2922 = vtanh.f32 %v3547_v9  ;;  %v1336_v53 = vpop.permute.xlu1 %1335  ;;  %v1338_v12 = vpop.permute.xlu0 %1337 }
 0x4c0   : > { %v3555_v14 = vadd.f32 %v1336_v53, %v1276_v47  ;;  %v3557_v48 = vadd.f32 %v1338_v12, %v1277_v10 }
 0x4c2   : > { %2924 = vtanh.f32 %v3555_v14 }
 0x4c3   : > { %2926 = vtanh.f32 %v3557_v48  ;;  %v1340_v56 = vpop.permute.xlu1 %1339  ;;  %v1342_v59 = vpop.permute.xlu0 %1341 }
 0x4c4   : > { %v3565_v17 = vadd.f32 %v1340_v56, %v1278_v15  ;;  %v3567_v18 = vadd.f32 %v1342_v59, %v1279_v16 }
 0x4c6   : > { %2928 = vtanh.f32 %v3565_v17 }
 0x4c7   : > { %v2919_v1 = vpop.eup %2918  ;;  %2930 = vtanh.f32 %v3567_v18  ;;  %v1344_v0 = vpop.permute.xlu1 %1343 }
 0x4c8   : > { %v3573_v21 = vadd.f32 %v1344_v0, %v1280_v20  ;;  %1377 = vrot.lane.b32.xlu0 %v2919_v1, %s3107_s26 }
 0x4ca   : > { %2932 = vtanh.f32 %v3573_v21 }
 0x4cb   : > { %v2921_v23 = vpop.eup %2920 }
 0x4cc   : > { %v2923_v24 = vpop.eup %2922  ;;  %1379 = vrot.lane.b32.xlu1 %v2921_v23, %s3107_s26  ;;  %v3641_v23 = vld [vmem:[%s4129_s2] ss:$0 sm:$0xff] }
 0x4cd   : > { %1381 = vrot.lane.b32.xlu0 %v2923_v24, %s3107_s26 }
 0x4cf   : > { %v2925_v6 = vpop.eup %2924 }
 0x4d0   : > { %v2927_v34 = vpop.eup %2926  ;;  %1383 = vrot.lane.b32.xlu1 %v2925_v6, %s3107_s26 }
 0x4d1   : > { %1385 = vrot.lane.b32.xlu0 %v2927_v34, %s3107_s26 }
 0x4d3   : > { %v2929_v13 = vpop.eup %2928 }
 0x4d4   : > { %v2931_v49 = vpop.eup %2930  ;;  %1387 = vrot.lane.b32.xlu1 %v2929_v13, %s3107_s26 }
 0x4d5   : > { %1389 = vrot.lane.b32.xlu0 %v2931_v49, %s3107_s26 }
 0x4d7   : > { %v2933_v57 = vpop.eup %2932 }
 0x4d8   : > { %1391 = vrot.lane.b32.xlu1 %v2933_v57, %s3107_s26 }
 0x53a   : > { %v1378_v58 = vpop.permute.xlu0 %1377 }
 0x53b   : > { %v3597_v61 = vmul.f32 %v3504_v29, %v1378_v58 }
 0x53e   : > { %v1380_v60 = vpop.permute.xlu1 %1379 }
 0x53f   : > { %v3600_v62 = vmul.f32 %v3510_v33, %v1380_v60  ;;  %v1382_v2 = vpop.permute.xlu0 %1381 }
 0x540   : > { %v3605_v7 = vmul.f32 %v3507_v31, %v1382_v2 }
 0x541   : > { %v1409_v3 = vpack.c.bf16 %v3600_v62, %v3597_v61 }
 0x542   : > { %v1384_v4 = vpop.permute.xlu1 %1383 }
 0x543   : > { %v3608_v47 = vmul.f32 %v3514_v42, %v1384_v4  ;;  %v1386_v10 = vpop.permute.xlu0 %1385  ;;  %1475 = vrot.lane.b32.xlu0 %v1409_v3, %s3108_s27 }
 0x544   : > { %v3614_v33 = vmul.f32 %v3518_v11, %v1386_v10 }
 0x545   : > { %v1410_v29 = vpack.c.bf16 %v3608_v47, %v3605_v7 }
 0x546   : > { %v1388_v53 = vpop.permute.xlu1 %1387 }
 0x547   : > { %v3617_v12 = vmul.f32 %v3526_v28, %v1388_v53  ;;  %1477 = vrot.lane.b32.xlu1 %v1410_v29, %s3108_s27  ;;  %v1390_v31 = vpop.permute.xlu0 %1389  ;;  %v2696_v28 = vpop.f32.mrf.mxu0 }
 0x548   : > { %v3623_v16 = vmul.f32 %v3522_v22, %v1390_v31  ;;  %v614_v59 = vadd.f32 %v2696_v28, %v3315_v54 }
 0x549   : > { %v1411_v42 = vpack.c.bf16 %v3617_v12, %v3614_v33  ;;  %v605_v20 = vpop.f32.mrf.mxu0 }
 0x54a   : > { %v1392_v15 = vpop.permute.xlu1 %1391  ;;  %687 = vst.msk [vmem:[#allocation2 + $0x90] sm:$0xff] %vm668_vm3, %v614_v59  ;;  %v606_v1 = vadd.f32 %v3315_v54, %v605_v20 }
 0x54b   : > { %v3626_v56 = vmul.f32 %v3532_v32, %v1392_v15  ;;  %1479 = vrot.lane.b32.xlu0 %v1411_v42, %s3108_s27  ;;  %v2697_v22 = vpop.f32.mrf.mxu0 }
 0x54c   : > { %685 = vst.msk [vmem:[#allocation2 + $0x80] sm:$0xff] %vm668_vm3, %v606_v1  ;;  %v617_v32 = vadd.f32 %v2697_v22, %v3315_v54 }
 0x54d   : > { %v1412_v11 = vpack.c.bf16 %v3626_v56, %v3623_v16  ;;  %v608_v0 = vpop.f32.mrf.mxu0 }
 0x54e   : > { %688 = vst.msk [vmem:[#allocation2 + $0x98] sm:$0xff] %vm668_vm3, %v617_v32  ;;  %v609_v24 = vadd.f32 %v3641_v23, %v608_v0 }
 0x54f   : > { %1481 = vrot.lane.b32.xlu1 %v1412_v11, %s3108_s27  ;;  %v2700_v6 = vpop.f32.mrf.mxu0 }
 0x550   : > { %686 = vst.msk [vmem:[#allocation2 + $0x88] sm:$0xff] %vm668_vm3, %v609_v24  ;;  %v630_v25 = vadd.f32 %v3641_v23, %v2700_v6 }
 0x551   : > { %v621_v26 = vpop.f32.mrf.mxu0  ;;  %v1469_v49 = vld [vmem:[#allocation2 + $0x90] sm:$0xff] }
 0x552   : > { %691 = vst.msk [vmem:[#allocation2 + $0xb0] sm:$0xff] %vm668_vm3, %v630_v25  ;;  %v622_v54 = vadd.f32 %v3641_v23, %v621_v26 }
 0x553   : > { %v2701_v30 = vpop.f32.mrf.mxu0  ;;  %v1467_v52 = vld [vmem:[#allocation2 + $0x80] sm:$0xff] }
 0x554   : > { %689 = vst.msk [vmem:[#allocation2 + $0xa0] sm:$0xff] %vm668_vm3, %v622_v54  ;;  %v633_v34 = vadd.f32 %v3641_v23, %v2701_v30 }
 0x555   : > { %v624_v36 = vpop.f32.mrf.mxu0  ;;  %v1470_v4 = vld [vmem:[#allocation2 + $0x98] sm:$0xff] }
 0x556   : > { %692 = vst.msk [vmem:[#allocation2 + $0xb8] sm:$0xff] %vm668_vm3, %v633_v34  ;;  %v625_v37 = vadd.f32 %v3641_v23, %v624_v36 }
 0x557   : > { %v1468_v60 = vld [vmem:[#allocation2 + $0x88] sm:$0xff] }
 0x558   : > { %690 = vst.msk [vmem:[#allocation2 + $0xa8] sm:$0xff] %vm668_vm3, %v625_v37 }
 0x559   : > { %v1473_v29 = vld [vmem:[#allocation2 + $0xb0] sm:$0xff] }
 0x55b   : > { %v1471_v53 = vld [vmem:[#allocation2 + $0xa0] sm:$0xff] }
 0x55d   : > { %v1474_v1 = vld [vmem:[#allocation2 + $0xb8] sm:$0xff] }
 0x55f   : > { %v1472_v28 = vld [vmem:[#allocation2 + $0xa8] sm:$0xff] }
 0x5b5   : > { %v1476_v40 = vpop.permute.xlu0 %1475 }
 0x5b6   : > { %2732 = vmatprep.mubr.msk.bf16.mxu1 %vm389_vm2, %v1476_v40 }
 0x5b9   : > { %v1478_v41 = vpop.permute.xlu1 %1477 }
 0x5ba   : > { %2733 = vmatmul.mubr.msk.bf16.vlgmr.msra.gmra.mxu1 %vm389_vm2, %v1478_v41 }
 0x5bb   : > { %2741 = vmatpush3.bf16.msra.mxu1 %v3270_v35 }
 0x5bd   : > { %v1480_v45 = vpop.permute.xlu0 %1479 }
 0x5be   : > { %2736 = vmatprep.mubr.msk.bf16.mxu1 %vm389_vm2, %v1480_v45 }
 0x5c1   : > { %v1482_v5 = vpop.permute.xlu1 %1481 }
 0x5c2   : > { %2737 = vmatmul.mubr.msk.bf16.gmra.mxu1 %vm389_vm2, %v1482_v5 }
 0x67a   : > { %v2734_v13 = vpop.f32.mrf.mxu1 }
 0x67b   : > { %v1562_v58 = vadd.f32 %v2734_v13, %v1469_v49 }
 0x67c   : > { %v1529_v55 = vpop.f32.mrf.mxu1 }
 0x67d   : > { %v1560_v57 = vadd.f32 %v1529_v55, %v1467_v52  ;;  %v2550_v36 = vmul.f32 -1.442695, %v1562_v58 }
 0x67e   : > { %v2735_v27 = vpop.f32.mrf.mxu1 }
 0x67f   : > { %2934 = vtanh.f32 %v1560_v57  ;;  %v1563_v35 = vadd.f32 %v2735_v27, %v1470_v4  ;;  %v2548_v34 = vmul.f32 -1.442695, %v1560_v57 }
 0x680   : > { %v1532_v2 = vpop.f32.mrf.mxu1  ;;  %2936 = vtanh.f32 %v1562_v58 }
 0x681   : > { %v1561_v3 = vadd.f32 %v1532_v2, %v1468_v60  ;;  %v2551_v40 = vmul.f32 -1.442695, %v1563_v35 }
 0x682   : > { %v2738_v10 = vpop.f32.mrf.mxu1 }
 0x683   : > { %2938 = vtanh.f32 %v1561_v3  ;;  %v1566_v11 = vadd.f32 %v2738_v10, %v1473_v29  ;;  %v2549_v37 = vmul.f32 -1.442695, %v1561_v3 }
 0x684   : > { %v1545_v31 = vpop.f32.mrf.mxu1  ;;  %2940 = vtanh.f32 %v1563_v35 }
 0x685   : > { %v1564_v42 = vadd.f32 %v1545_v31, %v1471_v53  ;;  %v2554_v45 = vmul.f32 -1.442695, %v1566_v11 }
 0x686   : > { %v2739_v15 = vpop.f32.mrf.mxu1 }
 0x687   : > { %2942 = vtanh.f32 %v1564_v42  ;;  %v1567_v22 = vadd.f32 %v2739_v15, %v1474_v1  ;;  %v2552_v41 = vmul.f32 -1.442695, %v1564_v42 }
 0x688   : > { %v1548_v59 = vpop.f32.mrf.mxu1  ;;  %2944 = vtanh.f32 %v1566_v11 }
 0x689   : > { %v1565_v20 = vadd.f32 %v1548_v59, %v1472_v28  ;;  %v2555_v13 = vmul.f32 -1.442695, %v1567_v22 }
 0x68b   : > { %2946 = vtanh.f32 %v1565_v20  ;;  %v2553_v5 = vmul.f32 -1.442695, %v1565_v20 }
 0x68c   : > { %v2935_v32 = vpop.eup %2934  ;;  %2948 = vtanh.f32 %v1567_v22 }
 0x68d   : > { %1640 = vrot.lane.b32.xlu0 %v2935_v32, %s3105_s22  ;;  %v2937_v0 = vpop.eup %2936  ;;  %2950 = vpow2.f32 %v2548_v34 }
 0x68e   : > { %2952 = vpow2.f32 %v2550_v36 }
 0x68f   : > { %2954 = vpow2.f32 %v2549_v37 }
 0x690   : > { %v2939_v24 = vpop.eup %2938  ;;  %2956 = vpow2.f32 %v2551_v40 }
 0x691   : > { %1644 = vrot.lane.b32.xlu0 %v2937_v0, %s3105_s22  ;;  %1642 = vrot.lane.b32.xlu1 %v2939_v24, %s3105_s22  ;;  %v2941_v6 = vpop.eup %2940  ;;  %2958 = vpow2.f32 %v2552_v41 }
 0x692   : > { %2960 = vpow2.f32 %v2554_v45 }
 0x693   : > { %2962 = vpow2.f32 %v2553_v5 }
 0x694   : > { %v2943_v25 = vpop.eup %2942  ;;  %2964 = vpow2.f32 %v2555_v13 }
 0x695   : > { %1646 = vrot.lane.b32.xlu1 %v2941_v6, %s3105_s22  ;;  %1648 = vrot.lane.b32.xlu0 %v2943_v25, %s3105_s22  ;;  %v2945_v26 = vpop.eup %2944 }
 0x698   : > { %v2947_v54 = vpop.eup %2946 }
 0x699   : > { %1652 = vrot.lane.b32.xlu0 %v2945_v26, %s3105_s22  ;;  %1650 = vrot.lane.b32.xlu1 %v2947_v54, %s3105_s22  ;;  %v2949_v30 = vpop.eup %2948 }
 0x69a   : > { %v2951_v49 = vpop.eup %2950 }
 0x69b   : > { %v2953_v52 = vpop.eup %2952  ;;  %v1592_v55 = vadd.f32 1.0, %v2951_v49 }
 0x69c   : > { %v2955_v27 = vpop.eup %2954  ;;  %v1594_v57 = vadd.f32 1.0, %v2953_v52 }
 0x69d   : > { %1654 = vrot.lane.b32.xlu1 %v2949_v30, %s3105_s22  ;;  %v2957_v58 = vpop.eup %2956  ;;  %2966 = vrcp.f32 %v1592_v55  ;;  %v1593_v60 = vadd.f32 1.0, %v2955_v27 }
 0x69e   : > { %v2959_v2 = vpop.eup %2958  ;;  %2968 = vrcp.f32 %v1594_v57  ;;  %v1595_v3 = vadd.f32 1.0, %v2957_v58 }
 0x69f   : > { %v2961_v4 = vpop.eup %2960  ;;  %2970 = vrcp.f32 %v1593_v60  ;;  %v1596_v10 = vadd.f32 1.0, %v2959_v2 }
 0x6a0   : > { %v2963_v35 = vpop.eup %2962  ;;  %2972 = vrcp.f32 %v1595_v3  ;;  %v1598_v29 = vadd.f32 1.0, %v2961_v4 }
 0x6a1   : > { %2974 = vrcp.f32 %v1596_v10  ;;  %v1597_v53 = vadd.f32 1.0, %v2963_v35  ;;  %v2965_v31 = vpop.eup %2964 }
 0x6a2   : > { %2976 = vrcp.f32 %v1598_v29  ;;  %v1599_v42 = vadd.f32 1.0, %v2965_v31 }
 0x6a3   : > { %2978 = vrcp.f32 %v1597_v53 }
 0x6a4   : > { %2980 = vrcp.f32 %v1599_v42 }
 0x6aa   : > { %v3666_v15 = vpop.eup %2966 }
 0x6ab   : > { %v3669_v59 = vpop.eup %2968  ;;  %v1624_v52 = vmul.f32 %v3666_v15, %v3538_v63 }
 0x6ac   : > { %v3672_v20 = vpop.eup %2970  ;;  %v1626_v58 = vmul.f32 %v3669_v59, %v3547_v9 }
 0x6ad   : > { %v3676_v24 = vpop.eup %2972  ;;  %v1625_v57 = vmul.f32 %v3672_v20, %v3545_v8 }
 0x6ae   : > { %v3680_v6 = vpop.eup %2974  ;;  %v1627_v63 = vmul.f32 %v3676_v24, %v3555_v14 }
 0x6af   : > { %v3684_v34 = vpop.eup %2976  ;;  %v1628_v10 = vmul.f32 %v3680_v6, %v3557_v48 }
 0x6b0   : > { %v3688_v36 = vpop.eup %2978  ;;  %v1630_v31 = vmul.f32 %v3684_v34, %v3567_v18 }
 0x6b1   : > { %v3694_v5 = vpop.eup %2980  ;;  %v1629_v53 = vmul.f32 %v3688_v36, %v3565_v17 }
 0x6ff   : > { %v1641_v11 = vpop.permute.xlu0 %1640 }
 0x700   : > { %v1664_v28 = vmul.f32 %v3666_v15, %v1641_v11 }
 0x702   : > { %1680 = vrot.lane.b32.xlu0 %v1664_v28, %s3106_s23  ;;  %v1631_v28 = vmul.f32 %v3694_v5, %v3573_v21 }
 0x703   : > { %v1643_v1 = vpop.permute.xlu1 %1642  ;;  %v1645_v22 = vpop.permute.xlu0 %1644 }
 0x704   : > { %v1665_v32 = vmul.f32 %v3672_v20, %v1643_v1  ;;  %v1666_v0 = vmul.f32 %v3669_v59, %v1645_v22 }
 0x706   : > { %1682 = vrot.lane.b32.xlu1 %v1665_v32, %s3106_s23  ;;  %1684 = vrot.lane.b32.xlu0 %v1666_v0, %s3106_s23  ;;  %v422_v0 = vld [vmem:[%s3280_s13 + $0xc0] sm:$0xff] }
 0x707   : > { %v1647_v25 = vpop.permute.xlu1 %1646  ;;  %v1649_v26 = vpop.permute.xlu0 %1648 }
 0x708   : > { %v1667_v54 = vmul.f32 %v3676_v24, %v1647_v25  ;;  %v1668_v30 = vmul.f32 %v3680_v6, %v1649_v26  ;;  %v423_v25 = vld [vmem:[%s3280_s13 + $0xc8] sm:$0xff]  ;;  %v424_v26 = vld [vmem:[%s3280_s13 + $0xd0] sm:$0xff] }
 0x70a   : > { %1686 = vrot.lane.b32.xlu1 %v1667_v54, %s3106_s23  ;;  %1688 = vrot.lane.b32.xlu0 %v1668_v30, %s3106_s23  ;;  %v442_v30 = vpack.c.bf16 %v423_v25, %v422_v0 }
 0x70b   : > { %v1651_v37 = vpop.permute.xlu1 %1650  ;;  %v1653_v40 = vpop.permute.xlu0 %1652 }
 0x70c   : > { %v1669_v41 = vmul.f32 %v3688_v36, %v1651_v37  ;;  %v1670_v45 = vmul.f32 %v3684_v34, %v1653_v40  ;;  %v425_v37 = vld [vmem:[%s3280_s13 + $0xd8] sm:$0xff]  ;;  %v426_v40 = vld [vmem:[%s3280_s13 + $0xe0] sm:$0xff]  ;;  %2702 = vmatprep.mubr.msk.bf16.mxu0 %vm389_vm2, %v442_v30 }
 0x70e   : > { %1690 = vrot.lane.b32.xlu1 %v1669_v41, %s3106_s23  ;;  %1692 = vrot.lane.b32.xlu0 %v1670_v45, %s3106_s23  ;;  %v427_v41 = vld [vmem:[%s3280_s13 + $0xe8] sm:$0xff]  ;;  %v443_v45 = vpack.c.bf16 %v425_v37, %v424_v26 }
 0x70f   : > { %v1655_v13 = vpop.permute.xlu1 %1654 }
 0x710   : > { %v1671_v49 = vmul.f32 %v3694_v5, %v1655_v13  ;;  %v444_v13 = vpack.c.bf16 %v427_v41, %v426_v40  ;;  %2703 = vmatmul.mubr.msk.bf16.gmra.mxu0 %vm389_vm2, %v443_v45 }
 0x712   : > { %1694 = vrot.lane.b32.xlu1 %v1671_v49, %s3106_s23  ;;  %2706 = vmatprep.mubr.msk.bf16.mxu0 %vm389_vm2, %v444_v13 }
 0x774   : > { %v1681_v55 = vpop.permute.xlu0 %1680 }
 0x775   : > { %v3700_v27 = vadd.f32 %v1681_v55, %v1624_v52  ;;  %v428_v55 = vld [vmem:[%s3280_s13 + $0xf0] sm:$0xff] }
 0x777   : > { %2982 = vtanh.f32 %v3700_v27 }
 0x778   : > { %v1683_v60 = vpop.permute.xlu1 %1682  ;;  %v1685_v2 = vpop.permute.xlu0 %1684 }
 0x779   : > { %v3707_v3 = vadd.f32 %v1683_v60, %v1625_v57  ;;  %v3709_v4 = vadd.f32 %v1685_v2, %v1626_v58  ;;  %v429_v57 = vld [vmem:[%s3280_s13 + $0xf8] sm:$0xff] }
 0x77a   : > { %v445_v60 = vpack.c.bf16 %v429_v57, %v428_v55 }
 0x77b   : > { %2984 = vtanh.f32 %v3707_v3 }
 0x77c   : > { %2986 = vtanh.f32 %v3709_v4  ;;  %v1687_v8 = vpop.permute.xlu1 %1686  ;;  %v1689_v35 = vpop.permute.xlu0 %1688  ;;  %2707 = vmatmul.mubr.msk.bf16.gmra.mxu0 %vm389_vm2, %v445_v60 }
 0x77d   : > { %v3717_v29 = vadd.f32 %v1687_v8, %v1627_v63  ;;  %v3719_v9 = vadd.f32 %v1689_v35, %v1628_v10 }
 0x77f   : > { %2988 = vtanh.f32 %v3717_v29 }
 0x780   : > { %2990 = vtanh.f32 %v3719_v9  ;;  %v1691_v14 = vpop.permute.xlu1 %1690  ;;  %v1693_v48 = vpop.permute.xlu0 %1692 }
 0x781   : > { %v3727_v42 = vadd.f32 %v1691_v14, %v1629_v53  ;;  %v3729_v11 = vadd.f32 %v1693_v48, %v1630_v31 }
 0x783   : > { %2992 = vtanh.f32 %v3727_v42 }
 0x784   : > { %v2983_v17 = vpop.eup %2982  ;;  %2994 = vtanh.f32 %v3729_v11  ;;  %v1695_v18 = vpop.permute.xlu1 %1694 }
 0x785   : > { %v3735_v1 = vadd.f32 %v1695_v18, %v1631_v28  ;;  %1728 = vrot.lane.b32.xlu0 %v2983_v17, %s3107_s26 }
 0x787   : > { %2996 = vtanh.f32 %v3735_v1 }
 0x788   : > { %v2985_v22 = vpop.eup %2984 }
 0x789   : > { %v2987_v32 = vpop.eup %2986  ;;  %1730 = vrot.lane.b32.xlu1 %v2985_v22, %s3107_s26 }
 0x78a   : > { %1732 = vrot.lane.b32.xlu0 %v2987_v32, %s3107_s26 }
 0x78c   : > { %v2989_v21 = vpop.eup %2988 }
 0x78d   : > { %v2991_v54 = vpop.eup %2990  ;;  %1734 = vrot.lane.b32.xlu1 %v2989_v21, %s3107_s26 }
 0x78e   : > { %1736 = vrot.lane.b32.xlu0 %v2991_v54, %s3107_s26 }
 0x790   : > { %v2993_v49 = vpop.eup %2992 }
 0x791   : > { %v2995_v52 = vpop.eup %2994  ;;  %1738 = vrot.lane.b32.xlu1 %v2993_v49, %s3107_s26 }
 0x792   : > { %1740 = vrot.lane.b32.xlu0 %v2995_v52, %s3107_s26 }
 0x794   : > { %v2997_v58 = vpop.eup %2996 }
 0x795   : > { %1742 = vrot.lane.b32.xlu1 %v2997_v58, %s3107_s26 }
 0x7f7   : > { %v1729_v2 = vpop.permute.xlu0 %1728 }
 0x7f8   : > { %v3759_v10 = vmul.f32 %v3666_v15, %v1729_v2 }
 0x7fb   : > { %v1731_v63 = vpop.permute.xlu1 %1730 }
 0x7fc   : > { %v3762_v8 = vmul.f32 %v3672_v20, %v1731_v63  ;;  %v1733_v35 = vpop.permute.xlu0 %1732 }
 0x7fd   : > { %v3767_v14 = vmul.f32 %v3669_v59, %v1733_v35 }
 0x7fe   : > { %v1760_v53 = vpack.c.bf16 %v3762_v8, %v3759_v10 }
 0x7ff   : > { %v1735_v31 = vpop.permute.xlu1 %1734 }
 0x800   : > { %v3770_v48 = vmul.f32 %v3676_v24, %v1735_v31  ;;  %v1737_v28 = vpop.permute.xlu0 %1736  ;;  %1826 = vrot.lane.b32.xlu0 %v1760_v53, %s3108_s27 }
 0x801   : > { %v3776_v20 = vmul.f32 %v3680_v6, %v1737_v28 }
 0x802   : > { %v1761_v15 = vpack.c.bf16 %v3770_v48, %v3767_v14 }
 0x803   : > { %v1739_v17 = vpop.permute.xlu1 %1738 }
 0x804   : > { %v3779_v18 = vmul.f32 %v3688_v36, %v1739_v17  ;;  %1828 = vrot.lane.b32.xlu1 %v1761_v15, %s3108_s27  ;;  %v1741_v59 = vpop.permute.xlu0 %1740  ;;  %v2704_v36 = vpop.f32.mrf.mxu0 }
 0x805   : > { %v3785_v32 = vmul.f32 %v3684_v34, %v1741_v59  ;;  %v646_v0 = vadd.f32 %v3641_v23, %v2704_v36 }
 0x806   : > { %v1762_v24 = vpack.c.bf16 %v3779_v18, %v3776_v20  ;;  %v637_v25 = vpop.f32.mrf.mxu0 }
 0x807   : > { %v1743_v22 = vpop.permute.xlu1 %1742  ;;  %695 = vst.msk [vmem:[#allocation2 + $0xd0] sm:$0xff] %vm668_vm3, %v646_v0  ;;  %v638_v26 = vadd.f32 %v3641_v23, %v637_v25 }
 0x808   : > { %v3788_v21 = vmul.f32 %v3694_v5, %v1743_v22  ;;  %1830 = vrot.lane.b32.xlu0 %v1762_v24, %s3108_s27  ;;  %v2705_v34 = vpop.f32.mrf.mxu0 }
 0x809   : > { %693 = vst.msk [vmem:[#allocation2 + $0xc0] sm:$0xff] %vm668_vm3, %v638_v26  ;;  %v649_v5 = vadd.f32 %v3641_v23, %v2705_v34 }
 0x80a   : > { %v1763_v6 = vpack.c.bf16 %v3788_v21, %v3785_v32  ;;  %v640_v54 = vpop.f32.mrf.mxu0 }
 0x80b   : > { %696 = vst.msk [vmem:[#allocation2 + $0xd8] sm:$0xff] %vm668_vm3, %v649_v5  ;;  %v641_v30 = vadd.f32 %v3641_v23, %v640_v54 }
 0x80c   : > { %1832 = vrot.lane.b32.xlu1 %v1763_v6, %s3108_s27 }
 0x80d   : > { %694 = vst.msk [vmem:[#allocation2 + $0xc8] sm:$0xff] %vm668_vm3, %v641_v30 }
 0x80e   : > { %v1820_v63 = vld [vmem:[#allocation2 + $0xd0] sm:$0xff] }
 0x810   : > { %v1818_v31 = vld [vmem:[#allocation2 + $0xc0] sm:$0xff] }
 0x812   : > { %v1821_v15 = vld [vmem:[#allocation2 + $0xd8] sm:$0xff] }
 0x814   : > { %v1819_v22 = vld [vmem:[#allocation2 + $0xc8] sm:$0xff] }
 0x83c   : > { %v2708_v37 = vpop.f32.mrf.mxu0 }
 0x83d   : > { %v662_v40 = vadd.f32 %v3641_v23, %v2708_v37 }
 0x83e   : > { %v653_v41 = vpop.f32.mrf.mxu0 }
 0x83f   : > { %699 = vst.msk [vmem:[#allocation2 + $0xf0] sm:$0xff] %vm668_vm3, %v662_v40  ;;  %v654_v45 = vadd.f32 %v3641_v23, %v653_v41 }
 0x840   : > { %v2709_v13 = vpop.f32.mrf.mxu0 }
 0x841   : > { %697 = vst.msk [vmem:[#allocation2 + $0xe0] sm:$0xff] %vm668_vm3, %v654_v45  ;;  %v665_v49 = vadd.f32 %v3641_v23, %v2709_v13 }
 0x842   : > { %v656_v52 = vpop.f32.mrf.mxu0 }
 0x843   : > { %700 = vst.msk [vmem:[#allocation2 + $0xf8] sm:$0xff] %vm668_vm3, %v665_v49  ;;  %v657_v55 = vadd.f32 %v3641_v23, %v656_v52 }
 0x845   : > { %698 = vst.msk [vmem:[#allocation2 + $0xe8] sm:$0xff] %vm668_vm3, %v657_v55 }
 0x846   : > { %v1824_v0 = vld [vmem:[#allocation2 + $0xf0] sm:$0xff] }
 0x848   : > { %v1822_v25 = vld [vmem:[#allocation2 + $0xe0] sm:$0xff] }
 0x84a   : > { %v1825_v45 = vld [vmem:[#allocation2 + $0xf8] sm:$0xff] }
 0x84c   : > { %v1823_v30 = vld [vmem:[#allocation2 + $0xe8] sm:$0xff] }
 0x872   : > { %v1827_v57 = vpop.permute.xlu0 %1826 }
 0x873   : > { %2742 = vmatprep.mubr.msk.bf16.mxu1 %vm389_vm2, %v1827_v57 }
 0x876   : > { %v1829_v58 = vpop.permute.xlu1 %1828 }
 0x877   : > { %2743 = vmatmul.mubr.msk.bf16.vlgmr.msra.gmra.mxu1 %vm389_vm2, %v1829_v58 }
 0x87a   : > { %v1831_v60 = vpop.permute.xlu0 %1830 }
 0x87b   : > { %2746 = vmatprep.mubr.msk.bf16.mxu1 %vm389_vm2, %v1831_v60 }
 0x87e   : > { %v1833_v2 = vpop.permute.xlu1 %1832 }
 0x87f   : > { %2747 = vmatmul.mubr.msk.bf16.gmra.mxu1 %vm389_vm2, %v1833_v2 }
 0x937   : > { %v2744_v35 = vpop.f32.mrf.mxu1 }
 0x938   : > { %v1913_v53 = vadd.f32 %v2744_v35, %v1820_v63 }
 0x939   : > { %v1880_v28 = vpop.f32.mrf.mxu1 }
 0x93a   : > { %2998 = vtanh.f32 %v1913_v53  ;;  %v1911_v23 = vadd.f32 %v1880_v28, %v1818_v31  ;;  %v2578_v63 = vmul.f32 -1.442695, %v1913_v53 }
 0x93b   : > { %v2745_v17 = vpop.f32.mrf.mxu1 }
 0x93c   : > { %v1914_v59 = vadd.f32 %v2745_v17, %v1821_v15  ;;  %3000 = vtanh.f32 %v1911_v23  ;;  %v2576_v35 = vmul.f32 -1.442695, %v1911_v23 }
 0x93d   : > { %v1883_v24 = vpop.f32.mrf.mxu1 }
 0x93e   : > { %3002 = vtanh.f32 %v1914_v59  ;;  %v1912_v6 = vadd.f32 %v1883_v24, %v1819_v22  ;;  %v2579_v31 = vmul.f32 -1.442695, %v1914_v59 }
 0x93f   : > { %v2748_v36 = vpop.f32.mrf.mxu1 }
 0x940   : > { %3004 = vtanh.f32 %v1912_v6  ;;  %v1917_v54 = vadd.f32 %v2748_v36, %v1824_v0  ;;  %v2577_v28 = vmul.f32 -1.442695, %v1912_v6 }
 0x941   : > { %v1896_v26 = vpop.f32.mrf.mxu1 }
 0x942   : > { %v1915_v34 = vadd.f32 %v1896_v26, %v1822_v25  ;;  %v2582_v17 = vmul.f32 -1.442695, %v1917_v54 }
 0x943   : > { %v2749_v5 = vpop.f32.mrf.mxu1 }
 0x944   : > { %3006 = vtanh.f32 %v1915_v34  ;;  %v1918_v13 = vadd.f32 %v2749_v5, %v1825_v45  ;;  %v2580_v15 = vmul.f32 -1.442695, %v1915_v34 }
 0x945   : > { %v1899_v37 = vpop.f32.mrf.mxu1  ;;  %3008 = vtanh.f32 %v1917_v54 }
 0x946   : > { %v1916_v40 = vadd.f32 %v1899_v37, %v1823_v30  ;;  %v2583_v36 = vmul.f32 -1.442695, %v1918_v13 }
 0x947   : > { %v2999_v41 = vpop.eup %2998 }
 0x948   : > { %1995 = vrot.lane.b32.xlu0 %v2999_v41, %s3105_s22  ;;  %3010 = vtanh.f32 %v1916_v40  ;;  %v2581_v24 = vmul.f32 -1.442695, %v1916_v40 }
 0x949   : > { %v3001_v49 = vpop.eup %3000  ;;  %3012 = vtanh.f32 %v1918_v13 }
 0x94a   : > { %3014 = vpow2.f32 %v2578_v63 }
 0x94b   : > { %v3003_v52 = vpop.eup %3002  ;;  %3016 = vpow2.f32 %v2576_v35 }
 0x94c   : > { %1991 = vrot.lane.b32.xlu0 %v3001_v49, %s3105_s22  ;;  %1997 = vrot.lane.b32.xlu1 %v3003_v52, %s3105_s22  ;;  %3018 = vpow2.f32 %v2579_v31 }
 0x94d   : > { %v3005_v55 = vpop.eup %3004  ;;  %3020 = vpow2.f32 %v2577_v28 }
 0x94e   : > { %3022 = vpow2.f32 %v2580_v15 }
 0x94f   : > { %3024 = vpow2.f32 %v2582_v17 }
 0x950   : > { %1993 = vrot.lane.b32.xlu1 %v3005_v55, %s3105_s22  ;;  %3026 = vpow2.f32 %v2581_v24 }
 0x951   : > { %v3007_v57 = vpop.eup %3006  ;;  %3028 = vpow2.f32 %v2583_v36 }
 0x952   : > { %1999 = vrot.lane.b32.xlu0 %v3007_v57, %s3105_s22  ;;  %v3009_v58 = vpop.eup %3008 }
 0x955   : > { %v3011_v60 = vpop.eup %3010 }
 0x956   : > { %2003 = vrot.lane.b32.xlu0 %v3009_v58, %s3105_s22  ;;  %2001 = vrot.lane.b32.xlu1 %v3011_v60, %s3105_s22  ;;  %v3013_v2 = vpop.eup %3012 }
 0x957   : > { %v3015_v22 = vpop.eup %3014 }
 0x958   : > { %v1945_v0 = vadd.f32 1.0, %v3015_v22  ;;  %v3017_v25 = vpop.eup %3016 }
 0x959   : > { %v3019_v26 = vpop.eup %3018  ;;  %v1943_v53 = vadd.f32 1.0, %v3017_v25 }
 0x95a   : > { %2005 = vrot.lane.b32.xlu1 %v3013_v2, %s3105_s22  ;;  %3030 = vrcp.f32 %v1945_v0  ;;  %v1946_v23 = vadd.f32 1.0, %v3019_v26  ;;  %v3021_v59 = vpop.eup %3020 }
 0x95b   : > { %v3023_v5 = vpop.eup %3022  ;;  %3032 = vrcp.f32 %v1943_v53  ;;  %v1944_v6 = vadd.f32 1.0, %v3021_v59 }
 0x95c   : > { %3034 = vrcp.f32 %v1946_v23  ;;  %v3025_v34 = vpop.eup %3024  ;;  %v1947_v54 = vadd.f32 1.0, %v3023_v5  ;;  %v2606_v5 = vpack.c.bf16 %v3438_v38, %v3438_v38  ;;  %v2610_v38 = vpack.c.bf16 %v3455_v19, %v3455_v19 }
 0x95d   : > { %v3027_v30 = vpop.eup %3026  ;;  %3036 = vrcp.f32 %v1944_v6  ;;  %v1949_v37 = vadd.f32 1.0, %v3025_v34  ;;  %v2607_v34 = vpack.c.bf16 %v3441_v39, %v3441_v39  ;;  %v2611_v39 = vpack.c.bf16 %v3458_v46, %v3458_v46 }
 0x95e   : > { %3038 = vrcp.f32 %v1947_v54  ;;  %v1948_v40 = vadd.f32 1.0, %v3027_v30  ;;  %v3029_v41 = vpop.eup %3028  ;;  %v2608_v54 = vpack.c.bf16 %v3446_v43, %v3446_v43  ;;  %v2609_v30 = vpack.c.bf16 %v3449_v44, %v3449_v44 }
 0x95f   : > { %3040 = vrcp.f32 %v1949_v37  ;;  %v1950_v52 = vadd.f32 1.0, %v3029_v41  ;;  %v2612_v43 = vpack.c.bf16 %v3464_v50, %v3464_v50  ;;  %v2613_v44 = vpack.c.bf16 %v3467_v51, %v3467_v51 }
 0x960   : > { %3042 = vrcp.f32 %v1948_v40 }
 0x961   : > { %3044 = vrcp.f32 %v1950_v52 }
 0x967   : > { %v3822_v45 = vpop.eup %3030 }
 0x968   : > { %v3826_v55 = vpop.eup %3032  ;;  %v1977_v19 = vmul.f32 %v3822_v45, %v3709_v4 }
 0x969   : > { %v3828_v58 = vpop.eup %3034  ;;  %v1975_v46 = vmul.f32 %v3826_v55, %v3700_v27 }
 0x96a   : > { %v3834_v35 = vpop.eup %3036  ;;  %v1978_v50 = vmul.f32 %v3828_v58, %v3717_v29 }
 0x96b   : > { %v3837_v15 = vpop.eup %3038  ;;  %v1976_v4 = vmul.f32 %v3834_v35, %v3707_v3 }
 0x96c   : > { %v3841_v22 = vpop.eup %3040 }
 0x96d   : > { %v3844_v36 = vpop.eup %3042  ;;  %v1981_v29 = vmul.f32 %v3841_v22, %v3729_v11 }
 0x96e   : > { %v3850_v23 = vpop.eup %3044 }
 0x96f   : > { %v1982_v3 = vmul.f32 %v3850_v23, %v3735_v1 }
 0x9ba   : > { %v1996_v13 = vpop.permute.xlu0 %1995 }
 0x9bb   : > { %v2017_v49 = vmul.f32 %v3822_v45, %v1996_v13 }
 0x9bd   : > { %2035 = vrot.lane.b32.xlu0 %v2017_v49, %s3106_s23 }
 0x9be   : > { %v1992_v57 = vpop.permute.xlu0 %1991  ;;  %v1998_v60 = vpop.permute.xlu1 %1997 }
 0x9bf   : > { %v2015_v2 = vmul.f32 %v3826_v55, %v1992_v57  ;;  %v2018_v63 = vmul.f32 %v3828_v58, %v1998_v60 }
 0x9c1   : > { %2031 = vrot.lane.b32.xlu0 %v2015_v2, %s3106_s23  ;;  %2037 = vrot.lane.b32.xlu1 %v2018_v63, %s3106_s23 }
 0x9c2   : > { %v1994_v31 = vpop.permute.xlu1 %1993 }
 0x9c3   : > { %v2016_v28 = vmul.f32 %v3834_v35, %v1994_v31 }
 0x9c4   : > { %v2000_v17 = vpop.permute.xlu0 %1999 }
 0x9c5   : > { %v2019_v24 = vmul.f32 %v3837_v15, %v2000_v17  ;;  %2033 = vrot.lane.b32.xlu1 %v2016_v28, %s3106_s23  ;;  %v1979_v28 = vmul.f32 %v3837_v15, %v3719_v9 }
 0x9c7   : > { %2039 = vrot.lane.b32.xlu0 %v2019_v24, %s3106_s23 }
 0x9c8   : > { %v2002_v0 = vpop.permute.xlu1 %2001  ;;  %v2004_v25 = vpop.permute.xlu0 %2003 }
 0x9c9   : > { %v2020_v26 = vmul.f32 %v3844_v36, %v2002_v0  ;;  %v2021_v53 = vmul.f32 %v3841_v22, %v2004_v25  ;;  %v1980_v25 = vmul.f32 %v3844_v36, %v3727_v42 }
 0x9cb   : > { %2041 = vrot.lane.b32.xlu1 %v2020_v26, %s3106_s23  ;;  %2043 = vrot.lane.b32.xlu0 %v2021_v53, %s3106_s23 }
 0x9cc   : > { %v2006_v59 = vpop.permute.xlu1 %2005 }
 0x9cd   : > { %v2022_v6 = vmul.f32 %v3850_v23, %v2006_v59 }
 0x9cf   : > { %2045 = vrot.lane.b32.xlu1 %v2022_v6, %s3106_s23  ;;  %1082 = vrot.lane.b32.xlu0 %v2606_v5, %s3108_s27 }
 0x9d3   : > { %1084 = vrot.lane.b32.xlu1 %v2607_v34, %s3108_s27  ;;  %1086 = vrot.lane.b32.xlu0 %v2608_v54, %s3108_s27 }
 0x9d7   : > { %1088 = vrot.lane.b32.xlu1 %v2609_v30, %s3108_s27  ;;  %1090 = vrot.lane.b32.xlu0 %v2610_v38, %s3108_s27 }
 0x9db   : > { %1092 = vrot.lane.b32.xlu1 %v2611_v39, %s3108_s27  ;;  %1094 = vrot.lane.b32.xlu0 %v2612_v43, %s3108_s27 }
 0x9df   : > { %1096 = vrot.lane.b32.xlu1 %v2613_v44, %s3108_s27 }
 0xa2f   : > { %v2036_v37 = vpop.permute.xlu0 %2035 }
 0xa30   : > { %v3880_v40 = vadd.f32 %v2036_v37, %v1977_v19  ;;  %v2614_v19 = vpack.c.bf16 %v3597_v61, %v3597_v61  ;;  %v2615_v37 = vpack.c.bf16 %v3600_v62, %v3600_v62  ;;  %v2618_v61 = vpack.c.bf16 %v3614_v33, %v3614_v33 }
 0xa31   : > { %v2619_v62 = vpack.c.bf16 %v3617_v12, %v3617_v12  ;;  %v2622_v33 = vpack.c.bf16 %v3759_v10, %v3759_v10  ;;  %v2623_v12 = vpack.c.bf16 %v3762_v8, %v3762_v8  ;;  %v2626_v10 = vpack.c.bf16 %v3776_v20, %v3776_v20 }
 0xa32   : > { %3046 = vtanh.f32 %v3880_v40  ;;  %v2627_v8 = vpack.c.bf16 %v3779_v18, %v3779_v18 }
 0xa33   : > { %v2032_v41 = vpop.permute.xlu0 %2031  ;;  %v2038_v13 = vpop.permute.xlu1 %2037 }
 0xa34   : > { %v3887_v51 = vadd.f32 %v2032_v41, %v1975_v46  ;;  %v3889_v49 = vadd.f32 %v2038_v13, %v1978_v50  ;;  %v2616_v46 = vpack.c.bf16 %v3605_v7, %v3605_v7  ;;  %v2617_v50 = vpack.c.bf16 %v3608_v47, %v3608_v47 }
 0xa35   : > { %v2620_v7 = vpack.c.bf16 %v3623_v16, %v3623_v16  ;;  %v2621_v47 = vpack.c.bf16 %v3626_v56, %v3626_v56  ;;  %v2624_v16 = vpack.c.bf16 %v3767_v14, %v3767_v14  ;;  %v2625_v56 = vpack.c.bf16 %v3770_v48, %v3770_v48 }
 0xa36   : > { %3048 = vtanh.f32 %v3887_v51  ;;  %v2628_v14 = vpack.c.bf16 %v3785_v32, %v3785_v32  ;;  %v2629_v48 = vpack.c.bf16 %v3788_v21, %v3788_v21 }
 0xa37   : > { %3050 = vtanh.f32 %v3889_v49  ;;  %v2034_v52 = vpop.permute.xlu1 %2033 }
 0xa38   : > { %v3895_v57 = vadd.f32 %v2034_v52, %v1976_v4 }
 0xa39   : > { %v2040_v27 = vpop.permute.xlu0 %2039 }
 0xa3a   : > { %3052 = vtanh.f32 %v3895_v57  ;;  %v3909_v17 = vadd.f32 %v2040_v27, %v1979_v28 }
 0xa3d   : > { %v2042_v60 = vpop.permute.xlu1 %2041  ;;  %v2044_v2 = vpop.permute.xlu0 %2043 }
 0xa3e   : > { %v3902_v31 = vadd.f32 %v2044_v2, %v1981_v29  ;;  %v3921_v1 = vadd.f32 %v2042_v60, %v1980_v25 }
 0xa3f   : > { %v3047_v63 = vpop.eup %3046 }
 0xa40   : > { %2083 = vrot.lane.b32.xlu0 %v3047_v63, %s3107_s26  ;;  %3054 = vtanh.f32 %v3902_v31 }
 0xa41   : > { %v2046_v11 = vpop.permute.xlu1 %2045  ;;  %v1083_v24 = vpop.permute.xlu0 %1082 }
 0xa42   : > { %v3914_v26 = vadd.f32 %v2046_v11, %v1982_v3  ;;  %1107 = vst.msk [vmem:[%s3916_s15] sm:$0xf] %vm380_vm1, %v1083_v24 }
 0xa43   : > { %v3049_v0 = vpop.eup %3048 }
 0xa44   : > { %v3051_v9 = vpop.eup %3050  ;;  %2079 = vrot.lane.b32.xlu0 %v3049_v0, %s3107_s26  ;;  %3056 = vtanh.f32 %v3914_v26 }
 0xa45   : > { %2085 = vrot.lane.b32.xlu1 %v3051_v9, %s3107_s26  ;;  %3058 = vtanh.f32 %v3909_v17  ;;  %v1085_v42 = vpop.permute.xlu1 %1084  ;;  %v1087_v53 = vpop.permute.xlu0 %1086 }
 0xa46   : > { %1108 = vst.msk [vmem:[%s3916_s15 + $0x4] sm:$0xf] %vm380_vm1, %v1085_v42  ;;  %1109 = vst.msk [vmem:[%s3916_s15 + $0x8] sm:$0xf] %vm380_vm1, %v1087_v53  ;;  %3060 = vtanh.f32 %v3921_v1 }
 0xa47   : > { %v3053_v59 = vpop.eup %3052 }
 0xa49   : > { %2081 = vrot.lane.b32.xlu1 %v3053_v59, %s3107_s26  ;;  %v1089_v5 = vpop.permute.xlu1 %1088  ;;  %v1091_v6 = vpop.permute.xlu0 %1090 }
 0xa4a   : > { %1110 = vst.msk [vmem:[%s3916_s15 + $0xc] sm:$0xf] %vm380_vm1, %v1089_v5  ;;  %1111 = vst.msk [vmem:[%s3916_s15 + $0x10] sm:$0xf] %vm380_vm1, %v1091_v6 }
 0xa4d   : > { %v1093_v34 = vpop.permute.xlu1 %1092  ;;  %v1095_v54 = vpop.permute.xlu0 %1094 }
 0xa4e   : > { %v3055_v30 = vpop.eup %3054  ;;  %1112 = vst.msk [vmem:[%s3916_s15 + $0x14] sm:$0xf] %vm380_vm1, %v1093_v34  ;;  %1113 = vst.msk [vmem:[%s3916_s15 + $0x18] sm:$0xf] %vm380_vm1, %v1095_v54 }
 0xa4f   : > { %2091 = vrot.lane.b32.xlu0 %v3055_v30, %s3107_s26 }
 0xa51   : > { %v3057_v38 = vpop.eup %3056  ;;  %v1097_v39 = vpop.permute.xlu1 %1096 }
 0xa52   : > { %v3059_v43 = vpop.eup %3058  ;;  %1114 = vst.msk [vmem:[%s3916_s15 + $0x1c] sm:$0xf] %vm380_vm1, %v1097_v39  ;;  %2093 = vrot.lane.b32.xlu1 %v3057_v38, %s3107_s26 }
 0xa53   : > { %2087 = vrot.lane.b32.xlu0 %v3059_v43, %s3107_s26  ;;  %v3061_v44 = vpop.eup %3060 }
 0xa56   : > { %2089 = vrot.lane.b32.xlu1 %v3061_v44, %s3107_s26 }
 0xa57   : > { %1433 = vrot.lane.b32.xlu0 %v2614_v19, %s3108_s27 }
 0xa5a   : > { %1435 = vrot.lane.b32.xlu1 %v2615_v37, %s3108_s27 }
 0xa5b   : > { %1437 = vrot.lane.b32.xlu0 %v2616_v46, %s3108_s27 }
 0xa5e   : > { %1439 = vrot.lane.b32.xlu1 %v2617_v50, %s3108_s27 }
 0xa5f   : > { %1441 = vrot.lane.b32.xlu0 %v2618_v61, %s3108_s27 }
 0xa62   : > { %1443 = vrot.lane.b32.xlu1 %v2619_v62, %s3108_s27 }
 0xa63   : > { %1445 = vrot.lane.b32.xlu0 %v2620_v7, %s3108_s27 }
 0xa66   : > { %1447 = vrot.lane.b32.xlu1 %v2621_v47, %s3108_s27 }
 0xa67   : > { %1784 = vrot.lane.b32.xlu0 %v2622_v33, %s3108_s27  ;;  %v2245_v33 = vld [vmem:[%s3916_s15] sm:$0xff] (%p3170_p6)  }
 0xa68   : > { %2246 = vst [vmem:[%s2228_s9] sm:$0xff] (%p3170_p6), %v2245_v33  }
 0xa6a   : > { %1786 = vrot.lane.b32.xlu1 %v2623_v12, %s3108_s27  ;;  %v2249_v12 = vld [vmem:[%s3916_s15 + $0x8] sm:$0xff] (%p3170_p6)  }
 0xa6b   : > { %1788 = vrot.lane.b32.xlu0 %v2624_v16, %s3108_s27  ;;  %v2253_v16 = vld [vmem:[%s3916_s15 + $0x10] sm:$0xff] (%p3170_p6)   ;;  %2250 = vst [vmem:[%s2228_s9 + $0x8] sm:$0xff] (%p3170_p6), %v2249_v12  }
 0xa6c   : > { %2254 = vst [vmem:[%s2228_s9 + $0x10] sm:$0xff] (%p3170_p6), %v2253_v16  }
 0xa6e   : > { %1790 = vrot.lane.b32.xlu1 %v2625_v56, %s3108_s27  ;;  %v2257_v56 = vld [vmem:[%s3916_s15 + $0x18] sm:$0xff] (%p3170_p6)  }
 0xa6f   : > { %1792 = vrot.lane.b32.xlu0 %v2626_v10, %s3108_s27  ;;  %2258 = vst [vmem:[%s2228_s9 + $0x18] sm:$0xff] (%p3170_p6), %v2257_v56  }
 0xa72   : > { %1794 = vrot.lane.b32.xlu1 %v2627_v8, %s3108_s27 }
 0xa73   : > { %1796 = vrot.lane.b32.xlu0 %v2628_v14, %s3108_s27 }
 0xa76   : > { %1798 = vrot.lane.b32.xlu1 %v2629_v48, %s3108_s27 }
 0xa77   : > { %2184 = vrot.lane.b32.xlu0 %v3887_v51, %s3109_s5 }
 0xa7a   : > { %2186 = vrot.lane.b32.xlu1 %v3895_v57, %s3109_s5 }
 0xa7b   : > { %2188 = vrot.lane.b32.xlu0 %v3880_v40, %s3109_s5 }
 0xa7e   : > { %2190 = vrot.lane.b32.xlu1 %v3889_v49, %s3109_s5 }
 0xa7f   : > { %2192 = vrot.lane.b32.xlu0 %v3909_v17, %s3109_s5 }
 0xa82   : > { %2194 = vrot.lane.b32.xlu1 %v3921_v1, %s3109_s5 }
 0xab2   : > { %v2084_v20 = vpop.permute.xlu0 %2083 }
 0xab3   : > { %v2105_v18 = vmul.f32 %v3822_v45, %v2084_v20 }
 0xab5   : > { %v2632_v32 = vpack.c.bf16 %v2105_v18, %v2105_v18 }
 0xab6   : > { %v2080_v21 = vpop.permute.xlu0 %2079 }
 0xab7   : > { %v2086_v41 = vpop.permute.xlu1 %2085  ;;  %v2103_v13 = vmul.f32 %v3826_v55, %v2080_v21  ;;  %2139 = vrot.lane.b32.xlu0 %v2632_v32, %s3108_s27 }
 0xab8   : > { %v2106_v40 = vmul.f32 %v3828_v58, %v2086_v41 }
 0xab9   : > { %v2630_v51 = vpack.c.bf16 %v2103_v13, %v2103_v13 }
 0xaba   : > { %v2633_v49 = vpack.c.bf16 %v2106_v40, %v2106_v40 }
 0xabb   : > { %v2082_v4 = vpop.permute.xlu1 %2081  ;;  %2135 = vrot.lane.b32.xlu0 %v2630_v51, %s3108_s27 }
 0xabc   : > { %v2104_v52 = vmul.f32 %v3834_v35, %v2082_v4  ;;  %2141 = vrot.lane.b32.xlu1 %v2633_v49, %s3108_s27 }
 0xabe   : > { %v2631_v57 = vpack.c.bf16 %v2104_v52, %v2104_v52 }
 0xac0   : > { %2137 = vrot.lane.b32.xlu1 %v2631_v57, %s3108_s27 }
 0xac1   : > { %v2092_v45 = vpop.permute.xlu0 %2091 }
 0xac2   : > { %v2109_v55 = vmul.f32 %v3841_v22, %v2092_v45 }
 0xac4   : > { %v2636_v27 = vpack.c.bf16 %v2109_v55, %v2109_v55  ;;  %v2094_v29 = vpop.permute.xlu1 %2093 }
 0xac5   : > { %v2110_v58 = vmul.f32 %v3850_v23, %v2094_v29  ;;  %v2088_v60 = vpop.permute.xlu0 %2087 }
 0xac6   : > { %v2107_v2 = vmul.f32 %v3837_v15, %v2088_v60  ;;  %2147 = vrot.lane.b32.xlu0 %v2636_v27, %s3108_s27 }
 0xac7   : > { %v2637_v35 = vpack.c.bf16 %v2110_v58, %v2110_v58 }
 0xac8   : > { %v2634_v63 = vpack.c.bf16 %v2107_v2, %v2107_v2  ;;  %v2090_v28 = vpop.permute.xlu1 %2089 }
 0xac9   : > { %v2108_v3 = vmul.f32 %v3844_v36, %v2090_v28  ;;  %v1434_v17 = vpop.permute.xlu0 %1433  ;;  %2149 = vrot.lane.b32.xlu1 %v2637_v35, %s3108_s27 }
 0xaca   : > { %2536 = vst.msk [vmem:[%s3916_s15 + $0x20] sm:$0xf] %vm380_vm1, %v1434_v17  ;;  %2143 = vrot.lane.b32.xlu0 %v2634_v63, %s3108_s27 }
 0xacb   : > { %v2635_v22 = vpack.c.bf16 %v2108_v3, %v2108_v3 }
 0xacc   : > { %v1436_v15 = vpop.permute.xlu1 %1435 }
 0xacd   : > { %2537 = vst.msk [vmem:[%s3916_s15 + $0x24] sm:$0xf] %vm380_vm1, %v1436_v15  ;;  %v1438_v23 = vpop.permute.xlu0 %1437  ;;  %2145 = vrot.lane.b32.xlu1 %v2635_v22, %s3108_s27 }
 0xace   : > { %2538 = vst.msk [vmem:[%s3916_s15 + $0x28] sm:$0xf] %vm380_vm1, %v1438_v23  ;;  %2196 = vrot.lane.b32.xlu0 %v3902_v31, %s3109_s5 }
 0xad0   : > { %v1440_v36 = vpop.permute.xlu1 %1439 }
 0xad1   : > { %2539 = vst.msk [vmem:[%s3916_s15 + $0x2c] sm:$0xf] %vm380_vm1, %v1440_v36  ;;  %v1442_v11 = vpop.permute.xlu0 %1441  ;;  %2198 = vrot.lane.b32.xlu1 %v3914_v26, %s3109_s5 }
 0xad2   : > { %2540 = vst.msk [vmem:[%s3916_s15 + $0x30] sm:$0xf] %vm380_vm1, %v1442_v11 }
 0xad4   : > { %v1444_v24 = vpop.permute.xlu1 %1443  ;;  %v2261_v10 = vld [vmem:[%s3916_s15 + $0x20] sm:$0xff] (%p3170_p6)  }
 0xad5   : > { %2541 = vst.msk [vmem:[%s3916_s15 + $0x34] sm:$0xf] %vm380_vm1, %v1444_v24  ;;  %v1446_v0 = vpop.permute.xlu0 %1445  ;;  %2262 = vst [vmem:[%s2228_s9 + $0x40] sm:$0xff] (%p3170_p6), %v2261_v10  }
 0xad6   : > { %2542 = vst.msk [vmem:[%s3916_s15 + $0x38] sm:$0xf] %vm380_vm1, %v1446_v0 }
 0xad8   : > { %v1448_v31 = vpop.permute.xlu1 %1447  ;;  %v2265_v8 = vld [vmem:[%s3916_s15 + $0x28] sm:$0xff] (%p3170_p6)  }
 0xad9   : > { %2543 = vst.msk [vmem:[%s3916_s15 + $0x3c] sm:$0xf] %vm380_vm1, %v1448_v31  ;;  %v1785_v25 = vpop.permute.xlu0 %1784  ;;  %2266 = vst [vmem:[%s2228_s9 + $0x48] sm:$0xff] (%p3170_p6), %v2265_v8  }
 0xada   : > { %2564 = vst.msk [vmem:[%s3916_s15 + $0x40] sm:$0xf] %vm380_vm1, %v1785_v25 }
 0xadc   : > { %v1787_v9 = vpop.permute.xlu1 %1786  ;;  %v2269_v14 = vld [vmem:[%s3916_s15 + $0x30] sm:$0xff] (%p3170_p6)  }
 0xadd   : > { %2565 = vst.msk [vmem:[%s3916_s15 + $0x44] sm:$0xf] %vm380_vm1, %v1787_v9  ;;  %v1789_v26 = vpop.permute.xlu0 %1788  ;;  %2270 = vst [vmem:[%s2228_s9 + $0x50] sm:$0xff] (%p3170_p6), %v2269_v14  }
 0xade   : > { %2566 = vst.msk [vmem:[%s3916_s15 + $0x48] sm:$0xf] %vm380_vm1, %v1789_v26 }
 0xae0   : > { %v1791_v1 = vpop.permute.xlu1 %1790  ;;  %v2273_v48 = vld [vmem:[%s3916_s15 + $0x38] sm:$0xff] (%p3170_p6)  }
 0xae1   : > { %2567 = vst.msk [vmem:[%s3916_s15 + $0x4c] sm:$0xf] %vm380_vm1, %v1791_v1  ;;  %v1793_v42 = vpop.permute.xlu0 %1792  ;;  %2274 = vst [vmem:[%s2228_s9 + $0x58] sm:$0xff] (%p3170_p6), %v2273_v48  }
 0xae2   : > { %2568 = vst.msk [vmem:[%s3916_s15 + $0x50] sm:$0xf] %vm380_vm1, %v1793_v42 }
 0xae4   : > { %v1795_v53 = vpop.permute.xlu1 %1794  ;;  %v2277_v20 = vld [vmem:[%s3916_s15 + $0x40] sm:$0xff] (%p3170_p6)  }
 0xae5   : > { %2569 = vst.msk [vmem:[%s3916_s15 + $0x54] sm:$0xf] %vm380_vm1, %v1795_v53  ;;  %v1797_v59 = vpop.permute.xlu0 %1796  ;;  %2278 = vst [vmem:[%s2228_s9 + $0x80] sm:$0xff] (%p3170_p6), %v2277_v20  }
 0xae6   : > { %2570 = vst.msk [vmem:[%s3916_s15 + $0x58] sm:$0xf] %vm380_vm1, %v1797_v59 }
 0xae8   : > { %v1799_v5 = vpop.permute.xlu1 %1798  ;;  %v2281_v18 = vld [vmem:[%s3916_s15 + $0x48] sm:$0xff] (%p3170_p6)  }
 0xae9   : > { %2571 = vst.msk [vmem:[%s3916_s15 + $0x5c] sm:$0xf] %vm380_vm1, %v1799_v5  ;;  %v2185_v6 = vpop.permute.xlu0 %2184  ;;  %2282 = vst [vmem:[%s2228_s9 + $0x88] sm:$0xff] (%p3170_p6), %v2281_v18  }
 0xaea   : > { %2208 = vst.msk [vmem:[#allocation4] sm:$0xff] %vm389_vm2, %v2185_v6 }
 0xaec   : > { %v2187_v34 = vpop.permute.xlu1 %2186  ;;  %v2285_v32 = vld [vmem:[%s3916_s15 + $0x50] sm:$0xff] (%p3170_p6)  }
 0xaed   : > { %2209 = vst.msk [vmem:[#allocation4 + $0x8] sm:$0xff] %vm389_vm2, %v2187_v34  ;;  %v2189_v54 = vpop.permute.xlu0 %2188  ;;  %2286 = vst [vmem:[%s2228_s9 + $0x90] sm:$0xff] (%p3170_p6), %v2285_v32  }
 0xaee   : > { %2210 = vst.msk [vmem:[#allocation4 + $0x10] sm:$0xff] %vm389_vm2, %v2189_v54 }
 0xaf0   : > { %v2191_v30 = vpop.permute.xlu1 %2190  ;;  %v2289_v21 = vld [vmem:[%s3916_s15 + $0x58] sm:$0xff] (%p3170_p6)  }
 0xaf1   : > { %2211 = vst.msk [vmem:[#allocation4 + $0x18] sm:$0xff] %vm389_vm2, %v2191_v30  ;;  %v2193_v38 = vpop.permute.xlu0 %2192  ;;  %2290 = vst [vmem:[%s2228_s9 + $0x98] sm:$0xff] (%p3170_p6), %v2289_v21  }
 0xaf2   : > { %2212 = vst.msk [vmem:[#allocation4 + $0x20] sm:$0xff] %vm389_vm2, %v2193_v38 }
 0xaf4   : > { %v2195_v39 = vpop.permute.xlu1 %2194 }
 0xaf5   : > { %2213 = vst.msk [vmem:[#allocation4 + $0x28] sm:$0xff] %vm389_vm2, %v2195_v39 }
 0xb29   : > { %v2140_v43 = vpop.permute.xlu0 %2139 }
 0xb2a   : > { %2594 = vst.msk [vmem:[%s3916_s15 + $0x68] sm:$0xf] %vm380_vm1, %v2140_v43  ;;  %2170 = vst.msk [vmem:[#allocation3 + $0x8] sm:$0xf] %vm380_vm1, %v2140_v43 }
 0xb2d   : > { %v2136_v44 = vpop.permute.xlu0 %2135 }
 0xb2e   : > { %v2142_v19 = vpop.permute.xlu1 %2141  ;;  %2592 = vst.msk [vmem:[%s3916_s15 + $0x60] sm:$0xf] %vm380_vm1, %v2136_v44  ;;  %2168 = vst.msk [vmem:[#allocation3] sm:$0xf] %vm380_vm1, %v2136_v44 }
 0xb2f   : > { %2595 = vst.msk [vmem:[%s3916_s15 + $0x6c] sm:$0xf] %vm380_vm1, %v2142_v19  ;;  %2171 = vst.msk [vmem:[#allocation3 + $0xc] sm:$0xf] %vm380_vm1, %v2142_v19 }
 0xb32   : > { %v2138_v37 = vpop.permute.xlu1 %2137 }
 0xb33   : > { %2593 = vst.msk [vmem:[%s3916_s15 + $0x64] sm:$0xf] %vm380_vm1, %v2138_v37  ;;  %2169 = vst.msk [vmem:[#allocation3 + $0x4] sm:$0xf] %vm380_vm1, %v2138_v37 }
 0xb36   : > { %v2297_v13 = vld [vmem:[%s3916_s15 + $0x68] sm:$0xff] (%p3170_p6)  }
 0xb37   : > { %2298 = vst [vmem:[%s2228_s9 + $0xc8] sm:$0xff] (%p3170_p6), %v2297_v13  }
 0xb38   : > { %v2148_v46 = vpop.permute.xlu0 %2147 }
 0xb39   : > { %2598 = vst.msk [vmem:[%s3916_s15 + $0x78] sm:$0xf] %vm380_vm1, %v2148_v46  ;;  %2174 = vst.msk [vmem:[#allocation3 + $0x18] sm:$0xf] %vm380_vm1, %v2148_v46 }
 0xb3a   : > { %v2293_v41 = vld [vmem:[%s3916_s15 + $0x60] sm:$0xff] (%p3170_p6)  }
 0xb3b   : > { %v2150_v50 = vpop.permute.xlu1 %2149  ;;  %2294 = vst [vmem:[%s2228_s9 + $0xc0] sm:$0xff] (%p3170_p6), %v2293_v41  }
 0xb3c   : > { %2599 = vst.msk [vmem:[%s3916_s15 + $0x7c] sm:$0xf] %vm380_vm1, %v2150_v50  ;;  %2175 = vst.msk [vmem:[#allocation3 + $0x1c] sm:$0xf] %vm380_vm1, %v2150_v50  ;;  %v2144_v61 = vpop.permute.xlu0 %2143 }
 0xb3d   : > { %2596 = vst.msk [vmem:[%s3916_s15 + $0x70] sm:$0xf] %vm380_vm1, %v2144_v61  ;;  %2172 = vst.msk [vmem:[#allocation3 + $0x10] sm:$0xf] %vm380_vm1, %v2144_v61 }
 0xb3f   : > { %v2146_v62 = vpop.permute.xlu1 %2145 }
 0xb40   : > { %2597 = vst.msk [vmem:[%s3916_s15 + $0x74] sm:$0xf] %vm380_vm1, %v2146_v62  ;;  %2173 = vst.msk [vmem:[#allocation3 + $0x14] sm:$0xf] %vm380_vm1, %v2146_v62  ;;  %v2197_v7 = vpop.permute.xlu0 %2196  ;;  %2222 = sbr.rel (!%p3170_p6) target bundleno = 2889 (0xb49), region = 82 }
 0xb41   : > { %2214 = vst.msk [vmem:[#allocation4 + $0x30] sm:$0xff] %vm389_vm2, %v2197_v7 }
 0xb43   : > { %v2199_v47 = vpop.permute.xlu1 %2198  ;;  %v2305_v51 = vld [vmem:[%s3916_s15 + $0x78] sm:$0xff] (%p3170_p6)  }
 0xb44   : > { %2215 = vst.msk [vmem:[#allocation4 + $0x38] sm:$0xff] %vm389_vm2, %v2199_v47  ;;  %2306 = vst [vmem:[%s2228_s9 + $0xd8] sm:$0xff] (%p3170_p6), %v2305_v51  }
 0xb47   : > { %v2301_v40 = vld [vmem:[%s3916_s15 + $0x70] sm:$0xff]  }
 0xb48   : > { %2302 = vst [vmem:[%s2228_s9 + $0xd0] sm:$0xff] %v2301_v40  }
 0xb49 PF: > { %s14_s19 = sadd.s32 1, %s3101_s19   ;;  %s4133_s15 = smov %s3089_s16 }
 0xb4a   : > { %p11_p11 = scmp.ge.s32.totalorder %s14_s19, 4   ;;  %s4134_s16 = smov %s3175_s25 }
 0xb4b   : > { %s4135_s17 = smov %s3097_s18  ;;  %s4136_s18 = smov %s4138_s20 }
 0xb4c   :  { %13 = sbr.rel (!%p11_p11) target bundleno = 3 (0x3), region = 160 }

// kernel: dprnn_forward.27
= control target key start
LH: loop header
LB: loop body
LE: loop exit
PB: predicated region body
PF: predicated region fallthrough
CT: control target
= control target key end

     0   :  { %vm25_vm0 = vcmask 130048   ;;  %vm22_vm1 = vcmask 125952   ;;  %v1468_v1 = vmov 0.0   ;;  %vm1469_vm2 = vmmov 0   ;;  %s1471_s26 = smov 16   ;;  %s1473_s28 = smov 32   ;;  %s1875_s1 = inlined_call_operand.vmem [shape: bf16[16,64], index: 1, kind: input, shape index: {}]   ;;  %s1876_s0 = inlined_call_operand.vmem [shape: f32[8,16,16], index: 0, kind: input, shape index: {}]   ;;  %s1877_s3 = inlined_call_operand.vmem [shape: bf16[16,64], index: 3, kind: input, shape index: {}]   ;;  %s1878_s2 = inlined_call_operand.vmem [shape: f32[1,64], index: 2, kind: input, shape index: {}]   ;;  %s1879_s4 = inlined_call_operand.vmem [shape: bf16[8,16,16], index: 4, kind: output, shape index: {}]  }
   0x1   :  { %v1337_v0 = vld [vmem:[%s1875_s1] sm:$0xff]   ;;  %1281 = vmatprep.subr.bf16.mxu1 %v1468_v1  ;;  %26 = vst.msk [vmem:[#allocation4] sm:$0xff] %vm25_vm0, %v1468_v1  ;;  %27 = vst.msk [vmem:[#allocation4 + $0x8] sm:$0xff] %vm25_vm0, %v1468_v1  ;;  %1283 = vmatprep.mubr.msk.bf16.mxu1 %vm1469_vm2, %v1468_v1  ;;  %v29_v3 = vld [vmem:[%s1876_s0 + $0x8] sm:$0xff]  ;;  %v1470_v5 = vmov 0   ;;  %vm189_vm3 = vcmask 523264  }
   0x2   :  { %v28_v2 = vld [vmem:[%s1876_s0] sm:$0xff]  ;;  %v30_v4 = vld [vmem:[%s1876_s0 + $0x10] sm:$0xff]  ;;  %23 = vst.msk [vmem:[#allocation3] sm:$0xf] %vm22_vm1, %v1470_v5  ;;  %24 = vst.msk [vmem:[#allocation3 + $0x4] sm:$0xf] %vm22_vm1, %v1470_v5  ;;  %1263 = vmatprep.subr.bf16.mxu0 %v1337_v0 }
   0x3   :  { %v44_v6 = vpack.c.bf16 %v29_v3, %v28_v2  ;;  %v31_v7 = vld [vmem:[%s1876_s0 + $0x18] sm:$0xff]  ;;  %1264 = vmatpush3.bf16.msra.mxu0 %v1337_v0  ;;  %v1528_v9 = vld [vmem:[%s1877_s3] sm:$0xff]   ;;  %s1474_s29 = smov 80   ;;  %s1475_s5 = smov 112  }
   0x4   :  { %v45_v8 = vpack.c.bf16 %v31_v7, %v30_v4  ;;  %1305 = vmatprep.subr.bf16.mxu0 %v1468_v1  ;;  %1282 = vmatpush3.bf16.msra.mxu1 %v1528_v9  ;;  %v1547_v13 = vld [vmem:[%s1878_s2] ss:$0 sm:$0xff]  ;;  %s1472_s2 = smov 96  }
   0x5   :  { %1265 = vmatprep.mubr.msk.bf16.mxu0 %vm25_vm0, %v44_v6  ;;  %1287 = vmatprep.subr.bf16.mxu1 %v1468_v1 }
   0x6   :  { %1266 = vmatmul.mubr.msk.bf16.vlgmr.msra.gmra.mxu0 %vm25_vm0, %v45_v8 }
   0x7   :  { %1306 = vmatpush3.bf16.msra.mxu0 %v1528_v9 }
   0x8   :  { %v210_v10 = vld [vmem:[#allocation4] sm:$0xff]  ;;  %1317 = vmatprep.subr.bf16.mxu0 %v1468_v1  ;;  %v211_v12 = vld [vmem:[#allocation4 + $0x8] sm:$0xff] }
   0x9   :  { %v1339_v11 = vld [vmem:[#allocation3] sm:$0xff]   ;;  %287 = vrot.lane.b32.xlu1 %v210_v10, %s1471_s26 }
   0xa   :  { %1284 = vmatmul.mubr.msk.bf16.vlgmr.msra.gmra.mxu1 %vm25_vm0, %v1339_v11 }
   0xb   :  { %1288 = vmatpush3.bf16.msra.mxu1 %v1528_v9  ;;  %1289 = vmatprep.mubr.msk.bf16.mxu1 %vm1469_vm2, %v1468_v1 }
   0xc   :  { %1293 = vmatprep.subr.bf16.mxu1 %v1468_v1 }
   0xd   :  { %289 = vrot.lane.b32.xlu1 %v211_v12, %s1471_s26 }
  0x7b   :  { %v288_v44 = vpop.permute.xlu1 %287 }
  0x7f   :  { %v290_v46 = vpop.permute.xlu1 %289 }
  0xc6   :  { %v1267_v14 = vpop.f32.mrf.mxu0 }
  0xc7   :  { %v135_v15 = vadd.f32 %v1267_v14, %v1547_v13 }
  0xc8   :  { %v126_v16 = vpop.f32.mrf.mxu0 }
  0xc9   :  { %192 = vst.msk [vmem:[#allocation2 + $0x10] sm:$0xff] %vm189_vm3, %v135_v15  ;;  %v127_v17 = vadd.f32 %v1547_v13, %v126_v16 }
  0xca   :  { %v1268_v18 = vpop.f32.mrf.mxu0  ;;  %v262_v19 = vpop.f32.mrf.mxu1 }
  0xcb   :  { %190 = vst.msk [vmem:[#allocation2] sm:$0xff] %vm189_vm3, %v127_v17  ;;  %v138_v20 = vadd.f32 %v1268_v18, %v1547_v13 }
  0xcc   :  { %v129_v21 = vpop.f32.mrf.mxu0  ;;  %v1285_v22 = vpop.f32.mrf.mxu1 }
  0xcd   :  { %193 = vst.msk [vmem:[#allocation2 + $0x18] sm:$0xff] %vm189_vm3, %v138_v20  ;;  %v130_v23 = vadd.f32 %v1547_v13, %v129_v21 }
  0xce   :  { %v265_v24 = vpop.f32.mrf.mxu1 }
  0xcf   :  { %191 = vst.msk [vmem:[#allocation2 + $0x8] sm:$0xff] %vm189_vm3, %v130_v23 }
  0xd0   :  { %v1286_v25 = vpop.f32.mrf.mxu1  ;;  %v343_v60 = vld [vmem:[#allocation2 + $0x10] sm:$0xff] }
  0xd2   :  { %v212_v26 = vld [vmem:[#allocation2] sm:$0xff] }
  0xd3   :  { %v269_v27 = vadd.f32 %v262_v19, %v212_v26 }
  0xd4   :  { %v344_v0 = vld [vmem:[#allocation2 + $0x18] sm:$0xff] }
  0xd5   :  { %1340 = vtanh.f32 %v269_v27  ;;  %v1169_v32 = vmul.f32 -1.442695, %v269_v27  ;;  %v32_v27 = vld [vmem:[%s1876_s0 + $0x20] sm:$0xff] }
  0xd6   :  { %v213_v28 = vld [vmem:[#allocation2 + $0x8] sm:$0xff] }
  0xd7   :  { %v270_v29 = vadd.f32 %v265_v24, %v213_v28  ;;  %v33_v28 = vld [vmem:[%s1876_s0 + $0x28] sm:$0xff] }
  0xd9   :  { %1342 = vtanh.f32 %v270_v29  ;;  %v1170_v33 = vmul.f32 -1.442695, %v270_v29  ;;  %v34_v29 = vld [vmem:[%s1876_s0 + $0x30] sm:$0xff] }
  0xda   :  { %1344 = vpow2.f32 %v1169_v32 }
  0xdb   :  { %1346 = vpow2.f32 %v1170_v33 }
  0xe2   :  { %v1341_v30 = vpop.eup %1340 }
  0xe3   :  { %297 = vrot.lane.b32.xlu0 %v1341_v30, %s1472_s2  ;;  %v46_v30 = vpack.c.bf16 %v33_v28, %v32_v27 }
  0xe5   :  { %1269 = vmatprep.mubr.msk.bf16.mxu0 %vm25_vm0, %v46_v30 }
  0xe6   :  { %v1343_v31 = vpop.eup %1342 }
  0xe7   :  { %299 = vrot.lane.b32.xlu0 %v1343_v31, %s1472_s2  ;;  %v1345_v34 = vpop.eup %1344  ;;  %v35_v31 = vld [vmem:[%s1876_s0 + $0x38] sm:$0xff] }
  0xe8   :  { %v277_v35 = vadd.f32 1.0, %v1345_v34  ;;  %v1347_v36 = vpop.eup %1346  ;;  %v47_v32 = vpack.c.bf16 %v35_v31, %v34_v29 }
  0xe9   :  { %v278_v37 = vadd.f32 1.0, %v1347_v36 }
  0xea   :  { %1348 = vrcp.f32 %v277_v35  ;;  %1270 = vmatmul.mubr.msk.bf16.gmra.mxu0 %vm25_vm0, %v47_v32 }
  0xeb   :  { %1350 = vrcp.f32 %v278_v37 }
  0xf7   :  { %v1349_v38 = vpop.eup %1348 }
  0xf8   :  { %v1351_v41 = vpop.eup %1350  ;;  %v293_v45 = vmul.f32 %v1349_v38, %v288_v44 }
  0xf9   :  { %v294_v49 = vmul.f32 %v1351_v41, %v290_v46 }
 0x155   :  { %v298_v39 = vpop.permute.xlu0 %297 }
 0x156   :  { %v303_v40 = vmul.f32 %v1349_v38, %v298_v39 }
 0x158   :  { %307 = vrot.lane.b32.xlu0 %v303_v40, %s1471_s26 }
 0x159   :  { %v300_v42 = vpop.permute.xlu0 %299 }
 0x15a   :  { %v304_v43 = vmul.f32 %v1351_v41, %v300_v42 }
 0x15c   :  { %309 = vrot.lane.b32.xlu1 %v304_v43, %s1471_s26 }
 0x1aa   :  { %v1271_v40 = vpop.f32.mrf.mxu0 }
 0x1ac   :  { %v142_v42 = vpop.f32.mrf.mxu0 }
 0x1ad   :  { %v143_v43 = vadd.f32 %v1547_v13, %v142_v42 }
 0x1ae   :  { %v1272_v44 = vpop.f32.mrf.mxu0 }
 0x1af   :  { %194 = vst.msk [vmem:[#allocation2 + $0x20] sm:$0xff] %vm189_vm3, %v143_v43 }
 0x1b0   :  { %v145_v46 = vpop.f32.mrf.mxu0 }
 0x1ca   :  { %v308_v47 = vpop.permute.xlu0 %307 }
 0x1cb   :  { %v313_v48 = vadd.f32 %v308_v47, %v293_v45  ;;  %v154_v45 = vadd.f32 %v1272_v44, %v1547_v13  ;;  %v146_v47 = vadd.f32 %v1547_v13, %v145_v46 }
 0x1cd   :  { %1352 = vtanh.f32 %v313_v48  ;;  %197 = vst.msk [vmem:[#allocation2 + $0x38] sm:$0xff] %vm189_vm3, %v154_v45  ;;  %195 = vst.msk [vmem:[#allocation2 + $0x28] sm:$0xff] %vm189_vm3, %v146_v47 }
 0x1ce   :  { %v310_v50 = vpop.permute.xlu1 %309 }
 0x1cf   :  { %v314_v51 = vadd.f32 %v310_v50, %v294_v49  ;;  %v457_v49 = vld [vmem:[#allocation2 + $0x20] sm:$0xff] }
 0x1d1   :  { %1354 = vtanh.f32 %v314_v51 }
 0x1d4   :  { %v572_v30 = vld [vmem:[#allocation2 + $0x38] sm:$0xff] }
 0x1da   :  { %v1353_v52 = vpop.eup %1352 }
 0x1db   :  { %319 = vrot.lane.b32.xlu0 %v1353_v52, %s1473_s28 }
 0x1de   :  { %v1355_v53 = vpop.eup %1354 }
 0x1df   :  { %321 = vrot.lane.b32.xlu1 %v1355_v53, %s1473_s28  ;;  %v458_v53 = vld [vmem:[#allocation2 + $0x28] sm:$0xff] }
 0x24d   :  { %v320_v54 = vpop.permute.xlu0 %319 }
 0x24e   :  { %v1563_v56 = vmul.f32 %v1349_v38, %v320_v54 }
 0x251   :  { %v322_v55 = vpop.permute.xlu1 %321 }
 0x252   :  { %v1565_v57 = vmul.f32 %v1351_v41, %v322_v55  ;;  %v151_v41 = vadd.f32 %v1271_v40, %v1547_v13 }
 0x254   :  { %v327_v58 = vpack.c.bf16 %v1565_v57, %v1563_v56  ;;  %196 = vst.msk [vmem:[#allocation2 + $0x30] sm:$0xff] %vm189_vm3, %v151_v41 }
 0x256   :  { %345 = vrot.lane.b32.xlu0 %v327_v58, %s1474_s29 }
 0x2c8   :  { %v346_v59 = vpop.permute.xlu0 %345 }
 0x2c9   :  { %1290 = vmatmul.mubr.msk.bf16.vlgmr.msra.gmra.mxu1 %vm25_vm0, %v346_v59 }
 0x2ca   :  { %1294 = vmatpush3.bf16.msra.mxu1 %v1528_v9  ;;  %1295 = vmatprep.mubr.msk.bf16.mxu1 %vm1469_vm2, %v1468_v1 }
 0x2cb   :  { %1299 = vmatprep.subr.bf16.mxu1 %v1468_v1 }
 0x389   :  { %v384_v61 = vpop.f32.mrf.mxu1 }
 0x38a   :  { %v391_v62 = vadd.f32 %v384_v61, %v343_v60 }
 0x38b   :  { %v1291_v63 = vpop.f32.mrf.mxu1 }
 0x38c   :  { %1356 = vtanh.f32 %v391_v62  ;;  %v1174_v7 = vmul.f32 -1.442695, %v391_v62 }
 0x38d   :  { %v387_v2 = vpop.f32.mrf.mxu1 }
 0x38e   :  { %v392_v3 = vadd.f32 %v387_v2, %v344_v0 }
 0x38f   :  { %v1292_v4 = vpop.f32.mrf.mxu1 }
 0x390   :  { %1358 = vtanh.f32 %v392_v3  ;;  %v1175_v8 = vmul.f32 -1.442695, %v392_v3 }
 0x391   :  { %1360 = vpow2.f32 %v1174_v7 }
 0x392   :  { %1362 = vpow2.f32 %v1175_v8 }
 0x399   :  { %v1357_v5 = vpop.eup %1356 }
 0x39a   :  { %411 = vrot.lane.b32.xlu1 %v1357_v5, %s1472_s2 }
 0x39d   :  { %v1359_v6 = vpop.eup %1358 }
 0x39e   :  { %413 = vrot.lane.b32.xlu0 %v1359_v6, %s1472_s2  ;;  %v1361_v10 = vpop.eup %1360 }
 0x39f   :  { %v399_v11 = vadd.f32 1.0, %v1361_v10  ;;  %v1363_v12 = vpop.eup %1362 }
 0x3a0   :  { %v400_v14 = vadd.f32 1.0, %v1363_v12 }
 0x3a1   :  { %1364 = vrcp.f32 %v399_v11 }
 0x3a2   :  { %1366 = vrcp.f32 %v400_v14 }
 0x3ae   :  { %v1365_v15 = vpop.eup %1364 }
 0x3af   :  { %v1367_v18 = vpop.eup %1366  ;;  %v407_v21 = vmul.f32 %v1365_v15, %v313_v48 }
 0x3b0   :  { %v408_v24 = vmul.f32 %v1367_v18, %v314_v51 }
 0x40c   :  { %v412_v16 = vpop.permute.xlu1 %411 }
 0x40d   :  { %v417_v17 = vmul.f32 %v1365_v15, %v412_v16 }
 0x40f   :  { %421 = vrot.lane.b32.xlu1 %v417_v17, %s1471_s26 }
 0x410   :  { %v414_v19 = vpop.permute.xlu0 %413 }
 0x411   :  { %v418_v20 = vmul.f32 %v1367_v18, %v414_v19 }
 0x413   :  { %423 = vrot.lane.b32.xlu0 %v418_v20, %s1471_s26 }
 0x481   :  { %v422_v22 = vpop.permute.xlu1 %421 }
 0x482   :  { %v1579_v23 = vadd.f32 %v422_v22, %v407_v21 }
 0x484   :  { %1368 = vtanh.f32 %v1579_v23 }
 0x485   :  { %v424_v25 = vpop.permute.xlu0 %423 }
 0x486   :  { %v1582_v26 = vadd.f32 %v424_v25, %v408_v24 }
 0x488   :  { %1370 = vtanh.f32 %v1582_v26 }
 0x491   :  { %v1369_v33 = vpop.eup %1368 }
 0x492   :  { %433 = vrot.lane.b32.xlu1 %v1369_v33, %s1473_s28 }
 0x495   :  { %v1371_v34 = vpop.eup %1370 }
 0x496   :  { %435 = vrot.lane.b32.xlu0 %v1371_v34, %s1473_s28 }
 0x504   :  { %v434_v35 = vpop.permute.xlu1 %433 }
 0x505   :  { %v1601_v37 = vmul.f32 %v1365_v15, %v434_v35 }
 0x508   :  { %v436_v36 = vpop.permute.xlu0 %435 }
 0x509   :  { %v1603_v38 = vmul.f32 %v1367_v18, %v436_v36 }
 0x50b   :  { %v441_v39 = vpack.c.bf16 %v1603_v38, %v1601_v37 }
 0x50d   :  { %459 = vrot.lane.b32.xlu1 %v441_v39, %s1474_s29 }
 0x57f   :  { %v460_v48 = vpop.permute.xlu1 %459 }
 0x580   :  { %1296 = vmatmul.mubr.msk.bf16.vlgmr.msra.gmra.mxu1 %vm25_vm0, %v460_v48 }
 0x581   :  { %1300 = vmatpush3.bf16.msra.mxu1 %v1528_v9  ;;  %1301 = vmatprep.mubr.msk.bf16.mxu1 %vm1469_vm2, %v1468_v1 }
 0x582   :  { %1311 = vmatprep.subr.bf16.mxu1 %v1468_v1 }
 0x640   :  { %v498_v50 = vpop.f32.mrf.mxu1 }
 0x641   :  { %v505_v51 = vadd.f32 %v498_v50, %v457_v49 }
 0x642   :  { %v1297_v52 = vpop.f32.mrf.mxu1 }
 0x643   :  { %1372 = vtanh.f32 %v505_v51  ;;  %v1181_v61 = vmul.f32 -1.442695, %v505_v51 }
 0x644   :  { %v501_v54 = vpop.f32.mrf.mxu1 }
 0x645   :  { %v506_v55 = vadd.f32 %v501_v54, %v458_v53 }
 0x646   :  { %v1298_v58 = vpop.f32.mrf.mxu1 }
 0x647   :  { %1374 = vtanh.f32 %v506_v55  ;;  %v1182_v62 = vmul.f32 -1.442695, %v506_v55  ;;  %v36_v58 = vld [vmem:[%s1876_s0 + $0x40] sm:$0xff] }
 0x648   :  { %1376 = vpow2.f32 %v1181_v61 }
 0x649   :  { %1378 = vpow2.f32 %v1182_v62  ;;  %v39_v62 = vld [vmem:[%s1876_s0 + $0x58] sm:$0xff] }
 0x650   :  { %v1373_v59 = vpop.eup %1372 }
 0x651   :  { %525 = vrot.lane.b32.xlu0 %v1373_v59, %s1472_s2  ;;  %v37_v59 = vld [vmem:[%s1876_s0 + $0x48] sm:$0xff] }
 0x652   :  { %v48_v61 = vpack.c.bf16 %v37_v59, %v36_v58 }
 0x654   :  { %v1375_v60 = vpop.eup %1374  ;;  %1273 = vmatprep.mubr.msk.bf16.mxu0 %vm25_vm0, %v48_v61 }
 0x655   :  { %527 = vrot.lane.b32.xlu1 %v1375_v60, %s1472_s2  ;;  %v1377_v63 = vpop.eup %1376  ;;  %v38_v60 = vld [vmem:[%s1876_s0 + $0x50] sm:$0xff] }
 0x656   :  { %v513_v0 = vadd.f32 1.0, %v1377_v63  ;;  %v1379_v2 = vpop.eup %1378  ;;  %v40_v63 = vld [vmem:[%s1876_s0 + $0x60] sm:$0xff] }
 0x657   :  { %v514_v3 = vadd.f32 1.0, %v1379_v2  ;;  %v49_v2 = vpack.c.bf16 %v39_v62, %v38_v60 }
 0x658   :  { %1380 = vrcp.f32 %v513_v0  ;;  %v41_v0 = vld [vmem:[%s1876_s0 + $0x68] sm:$0xff] }
 0x659   :  { %1382 = vrcp.f32 %v514_v3  ;;  %v50_v3 = vpack.c.bf16 %v41_v0, %v40_v63  ;;  %1274 = vmatmul.mubr.msk.bf16.gmra.mxu0 %vm25_vm0, %v49_v2 }
 0x65b   :  { %1277 = vmatprep.mubr.msk.bf16.mxu0 %vm25_vm0, %v50_v3 }
 0x665   :  { %v1381_v4 = vpop.eup %1380 }
 0x666   :  { %v1383_v7 = vpop.eup %1382  ;;  %v521_v11 = vmul.f32 %v1381_v4, %v1579_v23 }
 0x667   :  { %v522_v15 = vmul.f32 %v1383_v7, %v1582_v26  ;;  %v571_v26 = vld [vmem:[#allocation2 + $0x30] sm:$0xff] }
 0x6c3   :  { %v526_v5 = vpop.permute.xlu0 %525 }
 0x6c4   :  { %v531_v6 = vmul.f32 %v1381_v4, %v526_v5  ;;  %v42_v5 = vld [vmem:[%s1876_s0 + $0x70] sm:$0xff] }
 0x6c6   :  { %535 = vrot.lane.b32.xlu0 %v531_v6, %s1471_s26  ;;  %v43_v6 = vld [vmem:[%s1876_s0 + $0x78] sm:$0xff] }
 0x6c7   :  { %v528_v8 = vpop.permute.xlu1 %527 }
 0x6c8   :  { %v532_v10 = vmul.f32 %v1383_v7, %v528_v8  ;;  %v51_v8 = vpack.c.bf16 %v43_v6, %v42_v5 }
 0x6ca   :  { %537 = vrot.lane.b32.xlu1 %v532_v10, %s1471_s26  ;;  %1278 = vmatmul.mubr.msk.bf16.gmra.mxu0 %vm25_vm0, %v51_v8 }
 0x6cb   :  { %1307 = vmatprep.mubr.msk.bf16.mxu0 %vm1469_vm2, %v1468_v1 }
 0x738   :  { %v536_v12 = vpop.permute.xlu0 %535 }
 0x739   :  { %v541_v14 = vadd.f32 %v536_v12, %v521_v11 }
 0x73b   :  { %1384 = vtanh.f32 %v541_v14 }
 0x73c   :  { %v538_v16 = vpop.permute.xlu1 %537 }
 0x73d   :  { %v542_v17 = vadd.f32 %v538_v16, %v522_v15  ;;  %v1275_v16 = vpop.f32.mrf.mxu0 }
 0x73f   :  { %1386 = vtanh.f32 %v542_v17 }
 0x748   :  { %v1385_v18 = vpop.eup %1384 }
 0x749   :  { %547 = vrot.lane.b32.xlu0 %v1385_v18, %s1473_s28  ;;  %v158_v18 = vpop.f32.mrf.mxu0 }
 0x74c   :  { %v1387_v19 = vpop.eup %1386 }
 0x74d   :  { %549 = vrot.lane.b32.xlu1 %v1387_v19, %s1473_s28  ;;  %v159_v19 = vadd.f32 %v1547_v13, %v158_v18 }
 0x74f   :  { %198 = vst.msk [vmem:[#allocation2 + $0x40] sm:$0xff] %vm189_vm3, %v159_v19 }
 0x7bb   :  { %v548_v20 = vpop.permute.xlu0 %547 }
 0x7bc   :  { %v1629_v22 = vmul.f32 %v1381_v4, %v548_v20  ;;  %v1276_v20 = vpop.f32.mrf.mxu0 }
 0x7bf   :  { %v550_v21 = vpop.permute.xlu1 %549 }
 0x7c0   :  { %v1631_v24 = vmul.f32 %v1383_v7, %v550_v21  ;;  %v170_v21 = vadd.f32 %v1276_v20, %v1547_v13 }
 0x7c2   :  { %v555_v23 = vpack.c.bf16 %v1631_v24, %v1629_v22  ;;  %201 = vst.msk [vmem:[#allocation2 + $0x58] sm:$0xff] %vm189_vm3, %v170_v21 }
 0x7c4   :  { %573 = vrot.lane.b32.xlu0 %v555_v23, %s1474_s29  ;;  %v161_v23 = vpop.f32.mrf.mxu0 }
 0x7c9   :  { %v800_v19 = vld [vmem:[#allocation2 + $0x58] sm:$0xff] }
 0x836   :  { %v574_v25 = vpop.permute.xlu0 %573 }
 0x837   :  { %1302 = vmatmul.mubr.msk.bf16.vlgmr.msra.gmra.mxu1 %vm25_vm0, %v574_v25  ;;  %v162_v25 = vadd.f32 %v1547_v13, %v161_v23 }
 0x838   :  { %1312 = vmatpush3.bf16.msra.mxu1 %v1528_v9  ;;  %1313 = vmatprep.mubr.msk.bf16.mxu1 %vm1469_vm2, %v1468_v1 }
 0x839   :  { %1323 = vmatprep.subr.bf16.mxu1 %v1468_v1  ;;  %199 = vst.msk [vmem:[#allocation2 + $0x48] sm:$0xff] %vm189_vm3, %v162_v25 }
 0x8f7   :  { %v612_v27 = vpop.f32.mrf.mxu1 }
 0x8f8   :  { %v619_v28 = vadd.f32 %v612_v27, %v571_v26  ;;  %v1279_v26 = vpop.f32.mrf.mxu0 }
 0x8f9   :  { %v1303_v29 = vpop.f32.mrf.mxu1  ;;  %v183_v27 = vadd.f32 %v1279_v26, %v1547_v13 }
 0x8fa   :  { %1388 = vtanh.f32 %v619_v28  ;;  %v1188_v36 = vmul.f32 -1.442695, %v619_v28  ;;  %v174_v28 = vpop.f32.mrf.mxu0 }
 0x8fb   :  { %v615_v31 = vpop.f32.mrf.mxu1  ;;  %204 = vst.msk [vmem:[#allocation2 + $0x70] sm:$0xff] %vm189_vm3, %v183_v27  ;;  %v175_v29 = vadd.f32 %v1547_v13, %v174_v28 }
 0x8fc   :  { %v620_v32 = vadd.f32 %v615_v31, %v572_v30  ;;  %v1280_v30 = vpop.f32.mrf.mxu0 }
 0x8fd   :  { %v1304_v33 = vpop.f32.mrf.mxu1  ;;  %202 = vst.msk [vmem:[#allocation2 + $0x60] sm:$0xff] %vm189_vm3, %v175_v29  ;;  %v186_v31 = vadd.f32 %v1280_v30, %v1547_v13 }
 0x8fe   :  { %1390 = vtanh.f32 %v620_v32  ;;  %v1189_v39 = vmul.f32 -1.442695, %v620_v32  ;;  %v177_v32 = vpop.f32.mrf.mxu0 }
 0x8ff   :  { %1392 = vpow2.f32 %v1188_v36  ;;  %205 = vst.msk [vmem:[#allocation2 + $0x78] sm:$0xff] %vm189_vm3, %v186_v31  ;;  %v178_v33 = vadd.f32 %v1547_v13, %v177_v32 }
 0x900   :  { %1394 = vpow2.f32 %v1189_v39 }
 0x901   :  { %203 = vst.msk [vmem:[#allocation2 + $0x68] sm:$0xff] %vm189_vm3, %v178_v33 }
 0x907   :  { %v1389_v34 = vpop.eup %1388 }
 0x908   :  { %639 = vrot.lane.b32.xlu1 %v1389_v34, %s1472_s2 }
 0x90b   :  { %v1391_v35 = vpop.eup %1390 }
 0x90c   :  { %641 = vrot.lane.b32.xlu0 %v1391_v35, %s1472_s2  ;;  %v1393_v40 = vpop.eup %1392  ;;  %v685_v35 = vld [vmem:[#allocation2 + $0x40] sm:$0xff] }
 0x90d   :  { %v627_v41 = vadd.f32 1.0, %v1393_v40  ;;  %v1395_v42 = vpop.eup %1394 }
 0x90e   :  { %v628_v43 = vadd.f32 1.0, %v1395_v42 }
 0x90f   :  { %1396 = vrcp.f32 %v627_v41  ;;  %v686_v41 = vld [vmem:[#allocation2 + $0x48] sm:$0xff] }
 0x910   :  { %1398 = vrcp.f32 %v628_v43 }
 0x91c   :  { %v1397_v44 = vpop.eup %1396 }
 0x91d   :  { %v1399_v47 = vpop.eup %1398  ;;  %v635_v50 = vmul.f32 %v1397_v44, %v541_v14 }
 0x91e   :  { %v636_v53 = vmul.f32 %v1399_v47, %v542_v17  ;;  %v167_v17 = vadd.f32 %v1275_v16, %v1547_v13 }
 0x920   :  { %200 = vst.msk [vmem:[#allocation2 + $0x50] sm:$0xff] %vm189_vm3, %v167_v17 }
 0x97a   :  { %v640_v45 = vpop.permute.xlu1 %639 }
 0x97b   :  { %v645_v46 = vmul.f32 %v1397_v44, %v640_v45 }
 0x97d   :  { %649 = vrot.lane.b32.xlu1 %v645_v46, %s1471_s26 }
 0x97e   :  { %v642_v48 = vpop.permute.xlu0 %641 }
 0x97f   :  { %v646_v49 = vmul.f32 %v1399_v47, %v642_v48 }
 0x981   :  { %651 = vrot.lane.b32.xlu0 %v646_v49, %s1471_s26 }
 0x9ef   :  { %v650_v51 = vpop.permute.xlu1 %649 }
 0x9f0   :  { %v1645_v52 = vadd.f32 %v650_v51, %v635_v50 }
 0x9f2   :  { %1400 = vtanh.f32 %v1645_v52 }
 0x9f3   :  { %v652_v54 = vpop.permute.xlu0 %651 }
 0x9f4   :  { %v1648_v55 = vadd.f32 %v652_v54, %v636_v53 }
 0x9f6   :  { %1402 = vtanh.f32 %v1648_v55 }
 0x9ff   :  { %v1401_v4 = vpop.eup %1400 }
 0xa00   :  { %661 = vrot.lane.b32.xlu1 %v1401_v4, %s1473_s28 }
 0xa03   :  { %v1403_v7 = vpop.eup %1402 }
 0xa04   :  { %663 = vrot.lane.b32.xlu0 %v1403_v7, %s1473_s28 }
 0xa72   :  { %v662_v10 = vpop.permute.xlu1 %661 }
 0xa73   :  { %v1683_v12 = vmul.f32 %v1397_v44, %v662_v10 }
 0xa76   :  { %v664_v11 = vpop.permute.xlu0 %663 }
 0xa77   :  { %v1685_v14 = vmul.f32 %v1399_v47, %v664_v11 }
 0xa79   :  { %v669_v15 = vpack.c.bf16 %v1685_v14, %v1683_v12 }
 0xa7b   :  { %687 = vrot.lane.b32.xlu1 %v669_v15, %s1474_s29  ;;  %v799_v15 = vld [vmem:[#allocation2 + $0x50] sm:$0xff] }
 0xaed   :  { %v688_v34 = vpop.permute.xlu1 %687 }
 0xaee   :  { %1308 = vmatmul.mubr.msk.bf16.vlgmr.msra.gmra.mxu0 %vm25_vm0, %v688_v34 }
 0xaef   :  { %1318 = vmatpush3.bf16.msra.mxu0 %v1528_v9  ;;  %1319 = vmatprep.mubr.msk.bf16.mxu0 %vm1469_vm2, %v1468_v1 }
 0xbae   :  { %v726_v36 = vpop.f32.mrf.mxu0 }
 0xbaf   :  { %v733_v39 = vadd.f32 %v726_v36, %v685_v35 }
 0xbb0   :  { %v1309_v40 = vpop.f32.mrf.mxu0 }
 0xbb1   :  { %1404 = vtanh.f32 %v733_v39  ;;  %v1195_v46 = vmul.f32 -1.442695, %v733_v39 }
 0xbb2   :  { %v729_v42 = vpop.f32.mrf.mxu0 }
 0xbb3   :  { %v734_v43 = vadd.f32 %v729_v42, %v686_v41 }
 0xbb4   :  { %v1310_v44 = vpop.f32.mrf.mxu0 }
 0xbb5   :  { %1406 = vtanh.f32 %v734_v43  ;;  %v1196_v47 = vmul.f32 -1.442695, %v734_v43 }
 0xbb6   :  { %1408 = vpow2.f32 %v1195_v46 }
 0xbb7   :  { %1410 = vpow2.f32 %v1196_v47 }
 0xbbe   :  { %v1405_v13 = vpop.eup %1404 }
 0xbbf   :  { %753 = vrot.lane.b32.xlu0 %v1405_v13, %s1472_s2 }
 0xbc2   :  { %v1407_v45 = vpop.eup %1406 }
 0xbc3   :  { %755 = vrot.lane.b32.xlu1 %v1407_v45, %s1472_s2  ;;  %v1409_v48 = vpop.eup %1408 }
 0xbc4   :  { %v741_v49 = vadd.f32 1.0, %v1409_v48  ;;  %v1411_v50 = vpop.eup %1410 }
 0xbc5   :  { %v742_v51 = vadd.f32 1.0, %v1411_v50 }
 0xbc6   :  { %1412 = vrcp.f32 %v741_v49 }
 0xbc7   :  { %1414 = vrcp.f32 %v742_v51 }
 0xbd3   :  { %v1413_v53 = vpop.eup %1412 }
 0xbd4   :  { %v1415_v59 = vpop.eup %1414  ;;  %v749_v62 = vmul.f32 %v1413_v53, %v1645_v52 }
 0xbd5   :  { %v750_v2 = vmul.f32 %v1415_v59, %v1648_v55 }
 0xc31   :  { %v754_v54 = vpop.permute.xlu0 %753 }
 0xc32   :  { %v759_v58 = vmul.f32 %v1413_v53, %v754_v54 }
 0xc34   :  { %763 = vrot.lane.b32.xlu0 %v759_v58, %s1471_s26 }
 0xc35   :  { %v756_v60 = vpop.permute.xlu1 %755 }
 0xc36   :  { %v760_v61 = vmul.f32 %v1415_v59, %v756_v60  ;;  %v914_v60 = vld [vmem:[#allocation2 + $0x68] sm:$0xff] }
 0xc38   :  { %765 = vrot.lane.b32.xlu1 %v760_v61, %s1471_s26 }
 0xca6   :  { %v764_v63 = vpop.permute.xlu0 %763 }
 0xca7   :  { %v769_v0 = vadd.f32 %v764_v63, %v749_v62 }
 0xca9   :  { %1416 = vtanh.f32 %v769_v0 }
 0xcaa   :  { %v766_v3 = vpop.permute.xlu1 %765 }
 0xcab   :  { %v770_v4 = vadd.f32 %v766_v3, %v750_v2 }
 0xcad   :  { %1418 = vtanh.f32 %v770_v4 }
 0xcb6   :  { %v1417_v5 = vpop.eup %1416 }
 0xcb7   :  { %775 = vrot.lane.b32.xlu0 %v1417_v5, %s1473_s28 }
 0xcba   :  { %v1419_v6 = vpop.eup %1418 }
 0xcbb   :  { %777 = vrot.lane.b32.xlu1 %v1419_v6, %s1473_s28 }
 0xd29   :  { %v776_v7 = vpop.permute.xlu0 %775 }
 0xd2a   :  { %v1718_v10 = vmul.f32 %v1413_v53, %v776_v7  ;;  %v913_v53 = vld [vmem:[#allocation2 + $0x60] sm:$0xff] }
 0xd2d   :  { %v778_v8 = vpop.permute.xlu1 %777 }
 0xd2e   :  { %v1720_v11 = vmul.f32 %v1415_v59, %v778_v8 }
 0xd30   :  { %v783_v52 = vpack.c.bf16 %v1720_v11, %v1718_v10 }
 0xd32   :  { %801 = vrot.lane.b32.xlu0 %v783_v52, %s1474_s29 }
 0xda4   :  { %v802_v55 = vpop.permute.xlu0 %801 }
 0xda5   :  { %1314 = vmatmul.mubr.msk.bf16.vlgmr.msra.gmra.mxu1 %vm25_vm0, %v802_v55 }
 0xda6   :  { %1324 = vmatpush3.bf16.msra.mxu1 %v1528_v9  ;;  %1325 = vmatprep.mubr.msk.bf16.mxu1 %vm1469_vm2, %v1468_v1 }
 0xe65   :  { %v840_v16 = vpop.f32.mrf.mxu1 }
 0xe66   :  { %v847_v17 = vadd.f32 %v840_v16, %v799_v15 }
 0xe67   :  { %v1315_v18 = vpop.f32.mrf.mxu1 }
 0xe68   :  { %1420 = vtanh.f32 %v847_v17  ;;  %v1202_v9 = vmul.f32 -1.442695, %v847_v17 }
 0xe69   :  { %v843_v20 = vpop.f32.mrf.mxu1 }
 0xe6a   :  { %v848_v21 = vadd.f32 %v843_v20, %v800_v19 }
 0xe6b   :  { %v1316_v23 = vpop.f32.mrf.mxu1 }
 0xe6c   :  { %1422 = vtanh.f32 %v848_v21  ;;  %v1203_v27 = vmul.f32 -1.442695, %v848_v21 }
 0xe6d   :  { %1424 = vpow2.f32 %v1202_v9 }
 0xe6e   :  { %1426 = vpow2.f32 %v1203_v27 }
 0xe75   :  { %v1421_v25 = vpop.eup %1420 }
 0xe76   :  { %867 = vrot.lane.b32.xlu1 %v1421_v25, %s1472_s2 }
 0xe79   :  { %v1423_v26 = vpop.eup %1422 }
 0xe7a   :  { %869 = vrot.lane.b32.xlu0 %v1423_v26, %s1472_s2  ;;  %v1425_v1 = vpop.eup %1424 }
 0xe7b   :  { %v855_v28 = vadd.f32 1.0, %v1425_v1  ;;  %v1427_v29 = vpop.eup %1426 }
 0xe7c   :  { %v856_v30 = vadd.f32 1.0, %v1427_v29 }
 0xe7d   :  { %1428 = vrcp.f32 %v855_v28 }
 0xe7e   :  { %1430 = vrcp.f32 %v856_v30 }
 0xe8a   :  { %v1429_v31 = vpop.eup %1428 }
 0xe8b   :  { %v1431_v34 = vpop.eup %1430  ;;  %v863_v39 = vmul.f32 %v1429_v31, %v769_v0 }
 0xe8c   :  { %v864_v42 = vmul.f32 %v1431_v34, %v770_v4 }
 0xee8   :  { %v868_v32 = vpop.permute.xlu1 %867 }
 0xee9   :  { %v873_v33 = vmul.f32 %v1429_v31, %v868_v32 }
 0xeeb   :  { %877 = vrot.lane.b32.xlu1 %v873_v33, %s1471_s26  ;;  %v1027_v33 = vld [vmem:[#allocation2 + $0x70] sm:$0xff] }
 0xeec   :  { %v870_v35 = vpop.permute.xlu0 %869 }
 0xeed   :  { %v874_v36 = vmul.f32 %v1431_v34, %v870_v35 }
 0xeef   :  { %879 = vrot.lane.b32.xlu0 %v874_v36, %s1471_s26 }
 0xf5d   :  { %v878_v40 = vpop.permute.xlu1 %877 }
 0xf5e   :  { %v883_v41 = vadd.f32 %v878_v40, %v863_v39  ;;  %v1028_v39 = vld [vmem:[#allocation2 + $0x78] sm:$0xff] }
 0xf60   :  { %1432 = vtanh.f32 %v883_v41 }
 0xf61   :  { %v880_v43 = vpop.permute.xlu0 %879 }
 0xf62   :  { %v884_v44 = vadd.f32 %v880_v43, %v864_v42 }
 0xf64   :  { %1434 = vtanh.f32 %v884_v44 }
 0xf6d   :  { %v1433_v13 = vpop.eup %1432 }
 0xf6e   :  { %889 = vrot.lane.b32.xlu1 %v1433_v13, %s1473_s28 }
 0xf71   :  { %v1435_v45 = vpop.eup %1434 }
 0xf72   :  { %891 = vrot.lane.b32.xlu0 %v1435_v45, %s1473_s28 }
 0xfe0   :  { %v890_v46 = vpop.permute.xlu1 %889 }
 0xfe1   :  { %v1735_v48 = vmul.f32 %v1429_v31, %v890_v46 }
 0xfe4   :  { %v892_v47 = vpop.permute.xlu0 %891 }
 0xfe5   :  { %v1737_v49 = vmul.f32 %v1431_v34, %v892_v47 }
 0xfe7   :  { %v897_v50 = vpack.c.bf16 %v1737_v49, %v1735_v48 }
 0xfe9   :  { %915 = vrot.lane.b32.xlu1 %v897_v50, %s1474_s29 }
0x105b   :  { %v916_v51 = vpop.permute.xlu1 %915 }
0x105c   :  { %1320 = vmatmul.mubr.msk.bf16.vlgmr.msra.gmra.mxu0 %vm25_vm0, %v916_v51 }
0x111c   :  { %v954_v54 = vpop.f32.mrf.mxu0 }
0x111d   :  { %v961_v58 = vadd.f32 %v954_v54, %v913_v53 }
0x111e   :  { %v1321_v59 = vpop.f32.mrf.mxu0 }
0x111f   :  { %1436 = vtanh.f32 %v961_v58  ;;  %v1209_v3 = vmul.f32 -1.442695, %v961_v58 }
0x1120   :  { %v957_v61 = vpop.f32.mrf.mxu0 }
0x1121   :  { %v962_v62 = vadd.f32 %v957_v61, %v914_v60 }
0x1122   :  { %v1322_v63 = vpop.f32.mrf.mxu0 }
0x1123   :  { %1438 = vtanh.f32 %v962_v62  ;;  %v1210_v4 = vmul.f32 -1.442695, %v962_v62 }
0x1124   :  { %1440 = vpow2.f32 %v1209_v3 }
0x1125   :  { %1442 = vpow2.f32 %v1210_v4 }
0x112c   :  { %v1437_v0 = vpop.eup %1436 }
0x112d   :  { %981 = vrot.lane.b32.xlu0 %v1437_v0, %s1472_s2 }
0x1130   :  { %v1439_v2 = vpop.eup %1438 }
0x1131   :  { %983 = vrot.lane.b32.xlu1 %v1439_v2, %s1472_s2  ;;  %v1441_v5 = vpop.eup %1440 }
0x1132   :  { %v969_v6 = vadd.f32 1.0, %v1441_v5  ;;  %v1443_v7 = vpop.eup %1442 }
0x1133   :  { %v970_v8 = vadd.f32 1.0, %v1443_v7 }
0x1134   :  { %1444 = vrcp.f32 %v969_v6  ;;  %v1222_v6 = vpack.c.bf16 %v1563_v56, %v1563_v56  ;;  %v1226_v56 = vpack.c.bf16 %v1629_v22, %v1629_v22  ;;  %v1230_v22 = vpack.c.bf16 %v1718_v10, %v1718_v10 }
0x1135   :  { %1446 = vrcp.f32 %v970_v8  ;;  %v1223_v8 = vpack.c.bf16 %v1565_v57, %v1565_v57  ;;  %v1227_v57 = vpack.c.bf16 %v1631_v24, %v1631_v24  ;;  %v1231_v24 = vpack.c.bf16 %v1720_v11, %v1720_v11 }
0x1141   :  { %v1445_v52 = vpop.eup %1444 }
0x1142   :  { %v1447_v16 = vpop.eup %1446  ;;  %v977_v19 = vmul.f32 %v1445_v52, %v883_v41 }
0x1143   :  { %v978_v23 = vmul.f32 %v1447_v16, %v884_v44 }
0x119f   :  { %v982_v55 = vpop.permute.xlu0 %981 }
0x11a0   :  { %v987_v15 = vmul.f32 %v1445_v52, %v982_v55  ;;  %v1225_v55 = vpack.c.bf16 %v1603_v38, %v1603_v38  ;;  %v1229_v38 = vpack.c.bf16 %v1685_v14, %v1685_v14  ;;  %v1233_v14 = vpack.c.bf16 %v1737_v49, %v1737_v49 }
0x11a2   :  { %991 = vrot.lane.b32.xlu0 %v987_v15, %s1471_s26 }
0x11a3   :  { %v984_v17 = vpop.permute.xlu1 %983 }
0x11a4   :  { %v988_v18 = vmul.f32 %v1447_v16, %v984_v17 }
0x11a6   :  { %993 = vrot.lane.b32.xlu1 %v988_v18, %s1471_s26 }
0x1214   :  { %v992_v20 = vpop.permute.xlu0 %991 }
0x1215   :  { %v997_v21 = vadd.f32 %v992_v20, %v977_v19 }
0x1217   :  { %1448 = vtanh.f32 %v997_v21 }
0x1218   :  { %v994_v25 = vpop.permute.xlu1 %993 }
0x1219   :  { %v998_v26 = vadd.f32 %v994_v25, %v978_v23 }
0x121b   :  { %1450 = vtanh.f32 %v998_v26 }
0x1224   :  { %v1449_v9 = vpop.eup %1448 }
0x1225   :  { %1003 = vrot.lane.b32.xlu0 %v1449_v9, %s1473_s28 }
0x1228   :  { %v1451_v27 = vpop.eup %1450 }
0x1229   :  { %1005 = vrot.lane.b32.xlu1 %v1451_v27, %s1473_s28 }
0x1297   :  { %v1004_v1 = vpop.permute.xlu0 %1003 }
0x1298   :  { %v1749_v29 = vmul.f32 %v1445_v52, %v1004_v1  ;;  %v1224_v52 = vpack.c.bf16 %v1601_v37, %v1601_v37  ;;  %v1228_v37 = vpack.c.bf16 %v1683_v12, %v1683_v12  ;;  %v1232_v12 = vpack.c.bf16 %v1735_v48, %v1735_v48 }
0x129a   :  { %v1234_v10 = vpack.c.bf16 %v1749_v29, %v1749_v29 }
0x129b   :  { %v1006_v28 = vpop.permute.xlu1 %1005 }
0x129c   :  { %v1751_v30 = vmul.f32 %v1447_v16, %v1006_v28 }
0x129e   :  { %v1011_v31 = vpack.c.bf16 %v1751_v30, %v1749_v29  ;;  %v1235_v11 = vpack.c.bf16 %v1751_v30, %v1751_v30 }
0x12a0   :  { %1029 = vrot.lane.b32.xlu0 %v1011_v31, %s1474_s29 }
0x1312   :  { %v1030_v32 = vpop.permute.xlu0 %1029 }
0x1313   :  { %1326 = vmatmul.mubr.msk.bf16.vlgmr.msra.gmra.mxu1 %vm25_vm0, %v1030_v32 }
0x13d3   :  { %v1068_v34 = vpop.f32.mrf.mxu1 }
0x13d4   :  { %v1075_v35 = vadd.f32 %v1068_v34, %v1027_v33 }
0x13d5   :  { %v1327_v36 = vpop.f32.mrf.mxu1 }
0x13d6   :  { %1452 = vtanh.f32 %v1075_v35  ;;  %v1216_v13 = vmul.f32 -1.442695, %v1075_v35 }
0x13d7   :  { %v1071_v40 = vpop.f32.mrf.mxu1 }
0x13d8   :  { %v1076_v41 = vadd.f32 %v1071_v40, %v1028_v39 }
0x13d9   :  { %v1328_v42 = vpop.f32.mrf.mxu1 }
0x13da   :  { %1454 = vtanh.f32 %v1076_v41  ;;  %v1217_v45 = vmul.f32 -1.442695, %v1076_v41 }
0x13db   :  { %1456 = vpow2.f32 %v1216_v13 }
0x13dc   :  { %1458 = vpow2.f32 %v1217_v45 }
0x13e3   :  { %v1453_v43 = vpop.eup %1452 }
0x13e4   :  { %1095 = vrot.lane.b32.xlu1 %v1453_v43, %s1472_s2 }
0x13e7   :  { %v1455_v44 = vpop.eup %1454 }
0x13e8   :  { %1097 = vrot.lane.b32.xlu0 %v1455_v44, %s1472_s2  ;;  %v1457_v46 = vpop.eup %1456 }
0x13e9   :  { %v1083_v47 = vadd.f32 1.0, %v1457_v46  ;;  %v1459_v50 = vpop.eup %1458 }
0x13ea   :  { %v1084_v51 = vadd.f32 1.0, %v1459_v50 }
0x13eb   :  { %1460 = vrcp.f32 %v1083_v47 }
0x13ec   :  { %1462 = vrcp.f32 %v1084_v51 }
0x13f8   :  { %v1461_v53 = vpop.eup %1460 }
0x13f9   :  { %v1463_v59 = vpop.eup %1462  ;;  %v1091_v62 = vmul.f32 %v1461_v53, %v997_v21 }
0x13fa   :  { %v1092_v2 = vmul.f32 %v1463_v59, %v998_v26 }
0x1456   :  { %v1096_v54 = vpop.permute.xlu1 %1095 }
0x1457   :  { %v1101_v58 = vmul.f32 %v1461_v53, %v1096_v54 }
0x1459   :  { %1105 = vrot.lane.b32.xlu1 %v1101_v58, %s1471_s26 }
0x145a   :  { %v1098_v60 = vpop.permute.xlu0 %1097 }
0x145b   :  { %v1102_v61 = vmul.f32 %v1463_v59, %v1098_v60 }
0x145d   :  { %1107 = vrot.lane.b32.xlu0 %v1102_v61, %s1471_s26 }
0x14cb   :  { %v1106_v63 = vpop.permute.xlu1 %1105 }
0x14cc   :  { %v1111_v0 = vadd.f32 %v1106_v63, %v1091_v62 }
0x14ce   :  { %1464 = vtanh.f32 %v1111_v0 }
0x14cf   :  { %v1108_v3 = vpop.permute.xlu0 %1107 }
0x14d0   :  { %v1112_v4 = vadd.f32 %v1108_v3, %v1092_v2 }
0x14d2   :  { %1466 = vtanh.f32 %v1112_v4 }
0x14db   :  { %v1465_v5 = vpop.eup %1464 }
0x14dc   :  { %1117 = vrot.lane.b32.xlu1 %v1465_v5, %s1473_s28 }
0x14df   :  { %v1467_v7 = vpop.eup %1466 }
0x14e0   :  { %333 = vrot.lane.b32.xlu1 %v1222_v6, %s1474_s29  ;;  %1119 = vrot.lane.b32.xlu0 %v1467_v7, %s1473_s28 }
0x14e4   :  { %447 = vrot.lane.b32.xlu1 %v1224_v52, %s1474_s29  ;;  %335 = vrot.lane.b32.xlu0 %v1223_v8, %s1474_s29 }
0x14e8   :  { %561 = vrot.lane.b32.xlu1 %v1226_v56, %s1474_s29  ;;  %449 = vrot.lane.b32.xlu0 %v1225_v55, %s1474_s29 }
0x14ec   :  { %675 = vrot.lane.b32.xlu1 %v1228_v37, %s1474_s29  ;;  %563 = vrot.lane.b32.xlu0 %v1227_v57, %s1474_s29 }
0x14f0   :  { %789 = vrot.lane.b32.xlu1 %v1230_v22, %s1474_s29  ;;  %677 = vrot.lane.b32.xlu0 %v1229_v38, %s1474_s29 }
0x14f4   :  { %903 = vrot.lane.b32.xlu1 %v1232_v12, %s1474_s29  ;;  %791 = vrot.lane.b32.xlu0 %v1231_v24, %s1474_s29 }
0x14f8   :  { %1017 = vrot.lane.b32.xlu1 %v1234_v10, %s1474_s29  ;;  %905 = vrot.lane.b32.xlu0 %v1233_v14, %s1474_s29 }
0x14fc   :  { %1019 = vrot.lane.b32.xlu0 %v1235_v11, %s1474_s29 }
0x154e   :  { %v1118_v48 = vpop.permute.xlu1 %1117 }
0x154f   :  { %v1123_v15 = vmul.f32 %v1461_v53, %v1118_v48 }
0x1551   :  { %v1236_v16 = vpack.c.bf16 %v1123_v15, %v1123_v15 }
0x1552   :  { %v334_v17 = vpop.permute.xlu1 %333  ;;  %v1120_v18 = vpop.permute.xlu0 %1119 }
0x1553   :  { %340 = vst.msk [vmem:[%s1879_s4] sm:$0xf] %vm22_vm1, %v334_v17  ;;  %v1124_v49 = vmul.f32 %v1463_v59, %v1120_v18  ;;  %1131 = vrot.lane.b32.xlu1 %v1236_v16, %s1474_s29 }
0x1555   :  { %v1237_v19 = vpack.c.bf16 %v1124_v49, %v1124_v49 }
0x1556   :  { %v448_v20 = vpop.permute.xlu1 %447  ;;  %v336_v21 = vpop.permute.xlu0 %335 }
0x1557   :  { %1178 = vst.msk [vmem:[%s1879_s4 + $0x8] sm:$0xf] %vm22_vm1, %v448_v20  ;;  %341 = vst.msk [vmem:[%s1879_s4 + $0x4] sm:$0xf] %vm22_vm1, %v336_v21  ;;  %1144 = vrot.lane.b32.xlu1 %v1111_v0, %s1475_s5  ;;  %1133 = vrot.lane.b32.xlu0 %v1237_v19, %s1474_s29 }
0x155a   :  { %v562_v23 = vpop.permute.xlu1 %561  ;;  %v450_v25 = vpop.permute.xlu0 %449 }
0x155b   :  { %1185 = vst.msk [vmem:[%s1879_s4 + $0x10] sm:$0xf] %vm22_vm1, %v562_v23  ;;  %1179 = vst.msk [vmem:[%s1879_s4 + $0xc] sm:$0xf] %vm22_vm1, %v450_v25  ;;  %1146 = vrot.lane.b32.xlu0 %v1112_v4, %s1475_s5 }
0x155e   :  { %v676_v26 = vpop.permute.xlu1 %675  ;;  %v564_v9 = vpop.permute.xlu0 %563 }
0x155f   :  { %1192 = vst.msk [vmem:[%s1879_s4 + $0x18] sm:$0xf] %vm22_vm1, %v676_v26  ;;  %1186 = vst.msk [vmem:[%s1879_s4 + $0x14] sm:$0xf] %vm22_vm1, %v564_v9 }
0x1562   :  { %v790_v27 = vpop.permute.xlu1 %789  ;;  %v678_v1 = vpop.permute.xlu0 %677 }
0x1563   :  { %1199 = vst.msk [vmem:[%s1879_s4 + $0x20] sm:$0xf] %vm22_vm1, %v790_v27  ;;  %1193 = vst.msk [vmem:[%s1879_s4 + $0x1c] sm:$0xf] %vm22_vm1, %v678_v1 }
0x1566   :  { %v904_v28 = vpop.permute.xlu1 %903  ;;  %v792_v29 = vpop.permute.xlu0 %791 }
0x1567   :  { %1206 = vst.msk [vmem:[%s1879_s4 + $0x28] sm:$0xf] %vm22_vm1, %v904_v28  ;;  %1200 = vst.msk [vmem:[%s1879_s4 + $0x24] sm:$0xf] %vm22_vm1, %v792_v29 }
0x156a   :  { %v1018_v30 = vpop.permute.xlu1 %1017  ;;  %v906_v31 = vpop.permute.xlu0 %905 }
0x156b   :  { %1213 = vst.msk [vmem:[%s1879_s4 + $0x30] sm:$0xf] %vm22_vm1, %v1018_v30  ;;  %1207 = vst.msk [vmem:[%s1879_s4 + $0x2c] sm:$0xf] %vm22_vm1, %v906_v31 }
0x156e   :  { %v1020_v32 = vpop.permute.xlu0 %1019 }
0x156f   :  { %1214 = vst.msk [vmem:[%s1879_s4 + $0x34] sm:$0xf] %vm22_vm1, %v1020_v32 }
0x15c5   :  { %v1132_v33 = vpop.permute.xlu1 %1131 }
0x15c6   :  { %1220 = vst.msk [vmem:[%s1879_s4 + $0x38] sm:$0xf] %vm22_vm1, %v1132_v33  ;;  %1140 = vst.msk [vmem:[#allocation3] sm:$0xf] %vm22_vm1, %v1132_v33 }
0x15c9   :  { %v1145_v34 = vpop.permute.xlu1 %1144  ;;  %v1134_v35 = vpop.permute.xlu0 %1133 }
0x15ca   :  { %1150 = vst.msk [vmem:[#allocation4] sm:$0xff] %vm25_vm0, %v1145_v34 }
0x15cb   :  { %1221 = vst.msk [vmem:[%s1879_s4 + $0x3c] sm:$0xf] %vm22_vm1, %v1134_v35  ;;  %1141 = vst.msk [vmem:[#allocation3 + $0x4] sm:$0xf] %vm22_vm1, %v1134_v35 }
0x15cd   :  { %v1147_v36 = vpop.permute.xlu0 %1146 }
0x15ce   :  { %1151 = vst.msk [vmem:[#allocation4 + $0x8] sm:$0xff] %vm25_vm0, %v1147_v36 }

// kernel: dprnn_forward.42
= control target key start
LH: loop header
LB: loop body
LE: loop exit
PB: predicated region body
PF: predicated region fallthrough
CT: control target
= control target key end

     0   :  { %s713_s17 = smov 0   ;;  %s715_s18 = smov 0   ;;  %s804_s0 = inlined_call_operand.vmem [shape: f32[2,64,16], index: 0, kind: input, shape index: {}]   ;;  %s805_s1 = inlined_call_operand.<no memory space> [shape: f32[1,1], index: 1, kind: input, shape index: {}]   ;;  %s806_s2 = inlined_call_operand.vmem [shape: bf16[2,16,16], index: 2, kind: input, shape index: {}]   ;;  %s807_s3 = inlined_call_operand.vmem [shape: f32[2,1,16], index: 3, kind: input, shape index: {}]   ;;  %s808_s4 = inlined_call_operand.vmem [shape: f32[4,64,16], index: 4, kind: output, shape index: {}]  }
   0x1   :  { %v9_v0 = vstv %s805_s1  ;;  %s717_s19 = smov 0   ;;  %s719_s20 = smov 0  }
   0x2   :  { %10 = vst [vmem:[#allocation2] sm:$0x1] %v9_v0  ;;  %s721_s21 = smov 0  }
   0x3 LB: > { %s31_s1 = sadd.s32 1, %s674_s19  ;;  %s35_s22 = sadd.s32 1, %s678_s20  ;;  %s682_s21 = sphi %s721_s21, %s16_s21   ;;  %s678_s20 = sphi %s719_s20, %s812_s20   ;;  %s674_s19 = sphi %s717_s19, %s811_s19   ;;  %s670_s18 = sphi %s715_s18, %s810_s18   ;;  %s666_s17 = sphi %s713_s17, %s809_s17  }
   0x4   : > { %p33_p0 = scmp.ge.s32.totalorder %s31_s1, 2  ;;  %p564_p1 = scmp.ge.s32.totalorder %s682_s21, 1 }
   0x5   : > { %p214_p2 = scmp.lt.s32.totalorder %s682_s21, 5 }
   0x6   : > { %s814_s1 = smov (%p33_p0, %s31_s1), 0  ;;  %s816_s22 = smov (!%p33_p0, %s35_s22), %s678_s20 }
   0x7   : > { %p215_p3 = pnand %p564_p1, %p214_p2  ;;  %p37_p4 = scmp.ge.s32.totalorder %s816_s22, 2 }
   0x8   : > { %p268_p5 = scmp.lt.s32.totalorder (!%p215_p3), %s666_s17, 1  ;;  %p259_p6 = scmp.lt.s32.totalorder (!%p215_p3), %s670_s18, 1 }
   0x9   : > { %s818_s22 = smov (%p37_p4, %s816_s22), 0  ;;  %218 = sbr.rel (%p215_p3) target bundleno = 349 (0x15d), region = 36 }
   0xa   : > { %s569_s7 = sshll.u32 (!%p215_p3), %s670_s18, 1 }
   0xb   : > { %s277_s8 = sadd.s32 (!%p215_p3), %s666_s17, %s569_s7 }
   0xc   : > { %p279_p7 = scmp.lt.s32.totalorder (!%p215_p3), %s277_s8, 3 }
   0xe   : > { %v572_v1 = vld [vmem:[#allocation2] ss:$0 sm:$0xff]  ;;  %v684_v2 = vmov 0   ;;  %s749_s23 = scalar_select %p268_p5, %s666_s17, 1  ;;  %vm352_vm0 = vcmask 130048  }
   0xf   : > { %642 = vset.pattern.permute.xlu0 %v684_v2  ;;  %s260_s28 = scalar_select %p259_p6, %s670_s18, 1 }
  0x10   : > { %314 = vperm.xlu0 %642, %v572_v1   ;;  %s582_s24 = sshll.u32 %s749_s23, 3  ;;  %s820_s8 = smov (!%p279_p7, %s277_s8), 3 }
  0x11   : > { %s272_s27 = scalar_lea.vmem %s806_s2, %s582_s24  ;;  %s581_s29 = sshll.u32 %s260_s28, 6 }
  0x12   : > { %v643_v3 = vld [vmem:[%s272_s27] sm:$0xff]   ;;  %s266_s6 = scalar_lea.vmem %s804_s0, %s581_s29  ;;  %s275_s11 = scalar_lea.vmem %s807_s3, %s749_s23 }
  0x13   : > { %589 = vmatprep.subr.bf16.mxu0 %v643_v3  ;;  %599 = vmatprep.subr.bf16.mxu1 %v643_v3  ;;  %v291_v4 = vld [vmem:[%s266_s6] sm:$0xff]  ;;  %v292_v5 = vld [vmem:[%s266_s6 + $0x8] sm:$0xff]  ;;  %v293_v8 = vld [vmem:[%s266_s6 + $0x10] sm:$0xff]  ;;  %s583_s12 = sshll.u32 %s820_s8, 6 }
  0x14   : > { %590 = vmatpush3.bf16.msra.mxu0 %v643_v3  ;;  %600 = vmatpush3.bf16.msra.mxu1 %v643_v3  ;;  %v295_v6 = vld [vmem:[%s266_s6 + $0x20] sm:$0xff]  ;;  %v296_v7 = vld [vmem:[%s266_s6 + $0x28] sm:$0xff]  ;;  %v294_v9 = vld [vmem:[%s266_s6 + $0x18] sm:$0xff]  ;;  %vm300_vm1 = vcmp.ge.f32.partialorder %v291_v4, 0.0  ;;  %vm301_vm2 = vcmp.ge.f32.partialorder %v292_v5, 0.0  ;;  %vm302_vm5 = vcmp.ge.f32.partialorder %v293_v8, 0.0  ;;  %s286_s15 = scalar_lea.vmem %s808_s4, %s583_s12 }
  0x15   : > { %v297_v10 = vld [vmem:[%s266_s6 + $0x30] sm:$0xff]  ;;  %v298_v11 = vld [vmem:[%s266_s6 + $0x38] sm:$0xff]  ;;  %vm304_vm3 = vcmp.ge.f32.partialorder %v295_v6, 0.0  ;;  %vm305_vm4 = vcmp.ge.f32.partialorder %v296_v7, 0.0  ;;  %vm303_vm6 = vcmp.ge.f32.partialorder %v294_v9, 0.0 }
  0x16   : > { %vm306_vm7 = vcmp.ge.f32.partialorder %v297_v10, 0.0  ;;  %vm307_vm8 = vcmp.ge.f32.partialorder %v298_v11, 0.0  ;;  %v573_v33 = vld [vmem:[%s275_s11] ss:$0 sm:$0xff] }
  0x8b   : > { %v315_v12 = vpop.permute.xlu0 %314 }
  0x8c   : > { %v317_v13 = vmul.f32 %v315_v12, %v291_v4  ;;  %v318_v14 = vmul.f32 %v315_v12, %v292_v5  ;;  %v321_v15 = vmul.f32 %v315_v12, %v295_v6  ;;  %v322_v16 = vmul.f32 %v315_v12, %v296_v7 }
  0x8d   : > { %v319_v17 = vmul.f32 %v315_v12, %v293_v8  ;;  %v320_v18 = vmul.f32 %v315_v12, %v294_v9  ;;  %v323_v19 = vmul.f32 %v315_v12, %v297_v10  ;;  %v324_v20 = vmul.f32 %v315_v12, %v298_v11 }
  0x8e   : > { %v325_v21 = vsel %vm300_vm1, %v291_v4, %v317_v13  ;;  %v326_v22 = vsel %vm301_vm2, %v292_v5, %v318_v14  ;;  %v329_v23 = vsel %vm304_vm3, %v295_v6, %v321_v15  ;;  %v330_v24 = vsel %vm305_vm4, %v296_v7, %v322_v16 }
  0x8f   : > { %v333_v25 = vpack.c.bf16 %v326_v22, %v325_v21  ;;  %v335_v26 = vpack.c.bf16 %v330_v24, %v329_v23  ;;  %v327_v27 = vsel %vm302_vm5, %v293_v8, %v319_v17  ;;  %v328_v28 = vsel %vm303_vm6, %v294_v9, %v320_v18 }
  0x90   : > { %v334_v29 = vpack.c.bf16 %v328_v28, %v327_v27  ;;  %v331_v30 = vsel %vm306_vm7, %v297_v10, %v323_v19  ;;  %v332_v31 = vsel %vm307_vm8, %v298_v11, %v324_v20 }
  0x91   : > { %591 = vmatprep.mubr.msk.bf16.mxu0 %vm352_vm0, %v333_v25  ;;  %595 = vmatprep.mubr.msk.bf16.mxu1 %vm352_vm0, %v335_v26  ;;  %v336_v32 = vpack.c.bf16 %v332_v31, %v331_v30 }
  0x92   : > { %592 = vmatmul.mubr.msk.bf16.vlgmr.msra.gmra.mxu0 %vm352_vm0, %v334_v29 }
  0x93   : > { %596 = vmatmul.mubr.msk.bf16.vlgmr.msra.gmra.mxu1 %vm352_vm0, %v336_v32 }
 0x152   : > { %v593_v34 = vpop.f32.mrf.mxu0 }
 0x153   : > { %v408_v35 = vadd.f32 %v593_v34, %v573_v33  ;;  %v597_v36 = vpop.f32.mrf.mxu1 }
 0x154   : > { %v424_v37 = vadd.f32 %v597_v36, %v573_v33  ;;  %v399_v38 = vpop.f32.mrf.mxu0 }
 0x155   : > { %432 = vst.msk [vmem:[%s286_s15 + $0x10] sm:$0xff] %vm352_vm0, %v408_v35  ;;  %v400_v39 = vadd.f32 %v573_v33, %v399_v38  ;;  %v415_v40 = vpop.f32.mrf.mxu1 }
 0x156   : > { %436 = vst.msk [vmem:[%s286_s15 + $0x30] sm:$0xff] %vm352_vm0, %v424_v37  ;;  %v416_v41 = vadd.f32 %v573_v33, %v415_v40  ;;  %v594_v42 = vpop.f32.mrf.mxu0 }
 0x157   : > { %430 = vst.msk [vmem:[%s286_s15] sm:$0xff] %vm352_vm0, %v400_v39  ;;  %v411_v43 = vadd.f32 %v594_v42, %v573_v33  ;;  %v598_v44 = vpop.f32.mrf.mxu1 }
 0x158   : > { %434 = vst.msk [vmem:[%s286_s15 + $0x20] sm:$0xff] %vm352_vm0, %v416_v41  ;;  %v427_v45 = vadd.f32 %v598_v44, %v573_v33  ;;  %v402_v46 = vpop.f32.mrf.mxu0 }
 0x159   : > { %433 = vst.msk [vmem:[%s286_s15 + $0x18] sm:$0xff] %vm352_vm0, %v411_v43  ;;  %v403_v47 = vadd.f32 %v573_v33, %v402_v46  ;;  %v418_v48 = vpop.f32.mrf.mxu1 }
 0x15a   : > { %437 = vst.msk [vmem:[%s286_s15 + $0x38] sm:$0xff] %vm352_vm0, %v427_v45  ;;  %v419_v49 = vadd.f32 %v573_v33, %v418_v48 }
 0x15b   : > { %431 = vst.msk [vmem:[%s286_s15 + $0x8] sm:$0xff] %vm352_vm0, %v403_v47 }
 0x15c   : > { %435 = vst.msk [vmem:[%s286_s15 + $0x28] sm:$0xff] %vm352_vm0, %v419_v49 }
 0x15d PF: > { %s16_s21 = sadd.s32 1, %s682_s21   ;;  %s809_s17 = smov %s674_s19 }
 0x15e   : > { %p13_p8 = scmp.ge.s32.totalorder %s16_s21, 6   ;;  %s810_s18 = smov %s678_s20 }
 0x15f   : > { %s811_s19 = smov %s814_s1  ;;  %s812_s20 = smov %s818_s22 }
 0x160   :  { %15 = sbr.rel (!%p13_p8) target bundleno = 3 (0x3), region = 72 }

// kernel: dprnn_forward.43
= control target key start
LH: loop header
LB: loop body
LE: loop exit
PB: predicated region body
PF: predicated region fallthrough
CT: control target
= control target key end

     0   :  { %v527_v0 = vmov 0.0   ;;  %vm528_vm0 = vmmov 0   ;;  %vm48_vm1 = vcmask 130048   ;;  %vm368_vm2 = vcmask 64512   ;;  %s728_s1 = inlined_call_operand.vmem [shape: bf16[16,32], index: 1, kind: input, shape index: {}]   ;;  %s729_s0 = inlined_call_operand.vmem [shape: f32[80,16], index: 0, kind: input, shape index: {}]   ;;  %s730_s2 = inlined_call_operand.vmem [shape: f32[1,32], index: 2, kind: input, shape index: {}]   ;;  %s731_s3 = inlined_call_operand.vmem [shape: bf16[16,8], index: 3, kind: input, shape index: {}]   ;;  %s732_s4 = inlined_call_operand.vmem [shape: f32[80,8], index: 4, kind: output, shape index: {}]  }
   0x1   :  { %418 = vmatprep.subr.bf16.mxu0 %v527_v0  ;;  %v465_v1 = vld [vmem:[%s728_s1] sm:$0xff]   ;;  %420 = vmatprep.mubr.msk.bf16.mxu0 %vm528_vm0, %v527_v0  ;;  %v19_v3 = vld [vmem:[%s729_s0 + $0x8] sm:$0xff]  ;;  %v20_v5 = vld [vmem:[%s729_s0 + $0x10] sm:$0xff] }
   0x2   :  { %v18_v2 = vld [vmem:[%s729_s0] sm:$0xff]  ;;  %440 = vmatprep.subr.bf16.mxu1 %v527_v0  ;;  %442 = vmatprep.mubr.msk.bf16.mxu1 %vm528_vm0, %v527_v0  ;;  %v21_v6 = vld [vmem:[%s729_s0 + $0x18] sm:$0xff]  ;;  %v23_v9 = vld [vmem:[%s729_s0 + $0x28] sm:$0xff] }
   0x3   :  { %419 = vmatpush3.bf16.msra.mxu0 %v465_v1  ;;  %v28_v4 = vpack.c.bf16 %v19_v3, %v18_v2  ;;  %v29_v7 = vpack.c.bf16 %v21_v6, %v20_v5  ;;  %v22_v8 = vld [vmem:[%s729_s0 + $0x20] sm:$0xff]  ;;  %v24_v11 = vld [vmem:[%s729_s0 + $0x30] sm:$0xff]  ;;  %v25_v12 = vld [vmem:[%s729_s0 + $0x38] sm:$0xff] }
   0x4   :  { %v30_v10 = vpack.c.bf16 %v23_v9, %v22_v8  ;;  %v31_v13 = vpack.c.bf16 %v25_v12, %v24_v11  ;;  %v26_v14 = vld [vmem:[%s729_s0 + $0x40] sm:$0xff]  ;;  %v27_v15 = vld [vmem:[%s729_s0 + $0x48] sm:$0xff] }
   0x5   :  { %v32_v16 = vpack.c.bf16 %v27_v15, %v26_v14  ;;  %v610_v17 = vld [vmem:[%s730_s2] ss:$0 sm:$0xff] }
   0x6   :  { %421 = vmatmul.mubr.msk.bf16.vlgmr.msra.gmra.mxu0 %vm48_vm1, %v28_v4  ;;  %v466_v50 = vld [vmem:[%s731_s3] sm:$0xff]   ;;  %s529_s3 = smov 112  }
   0x7   :  { %424 = vmatprep.mubr.msk.bf16.mxu0 %vm528_vm0, %v527_v0  ;;  %441 = vmatpush3.bf16.msra.mxu1 %v466_v50 }
   0xe   :  { %425 = vmatmul.mubr.msk.bf16.gmra.mxu0 %vm48_vm1, %v29_v7 }
   0xf   :  { %428 = vmatprep.mubr.msk.bf16.mxu0 %vm528_vm0, %v527_v0 }
  0x16   :  { %429 = vmatmul.mubr.msk.bf16.gmra.mxu0 %vm48_vm1, %v30_v10 }
  0x17   :  { %432 = vmatprep.mubr.msk.bf16.mxu0 %vm528_vm0, %v527_v0 }
  0x1e   :  { %433 = vmatmul.mubr.msk.bf16.gmra.mxu0 %vm48_vm1, %v31_v13 }
  0x1f   :  { %436 = vmatprep.mubr.msk.bf16.mxu0 %vm528_vm0, %v527_v0 }
  0x26   :  { %437 = vmatmul.mubr.msk.bf16.gmra.mxu0 %vm48_vm1, %v32_v16 }
  0xc6   :  { %v98_v18 = vpop.f32.mrf.mxu0 }
  0xc7   :  { %v613_v19 = vadd.f32 %v610_v17, %v98_v18 }
  0xc8   :  { %v422_v20 = vpop.f32.mrf.mxu0 }
  0xc9   :  { %v390_v21 = vmul.f32 -1.442695, %v613_v19 }
  0xca   :  { %v101_v22 = vpop.f32.mrf.mxu0 }
  0xcb   :  { %467 = vpow2.f32 %v390_v21  ;;  %v617_v23 = vadd.f32 %v610_v17, %v101_v22 }
  0xcc   :  { %v423_v24 = vpop.f32.mrf.mxu0 }
  0xcd   :  { %v391_v25 = vmul.f32 -1.442695, %v617_v23 }
  0xce   :  { %v106_v26 = vpop.f32.mrf.mxu0 }
  0xcf   :  { %469 = vpow2.f32 %v391_v25  ;;  %v621_v27 = vadd.f32 %v610_v17, %v106_v26 }
  0xd0   :  { %v426_v28 = vpop.f32.mrf.mxu0 }
  0xd1   :  { %v392_v29 = vmul.f32 -1.442695, %v621_v27 }
  0xd2   :  { %v109_v30 = vpop.f32.mrf.mxu0 }
  0xd3   :  { %471 = vpow2.f32 %v392_v29  ;;  %v625_v31 = vadd.f32 %v610_v17, %v109_v30 }
  0xd4   :  { %v427_v32 = vpop.f32.mrf.mxu0 }
  0xd5   :  { %v393_v33 = vmul.f32 -1.442695, %v625_v31 }
  0xd6   :  { %v114_v34 = vpop.f32.mrf.mxu0 }
  0xd7   :  { %473 = vpow2.f32 %v393_v33  ;;  %v629_v35 = vadd.f32 %v610_v17, %v114_v34 }
  0xd8   :  { %v468_v36 = vpop.eup %467  ;;  %v430_v37 = vpop.f32.mrf.mxu0 }
  0xd9   :  { %v177_v38 = vadd.f32 1.0, %v468_v36  ;;  %v394_v39 = vmul.f32 -1.442695, %v629_v35 }
  0xda   :  { %v117_v40 = vpop.f32.mrf.mxu0 }
  0xdb   :  { %475 = vrcp.f32 %v177_v38  ;;  %v633_v41 = vadd.f32 %v610_v17, %v117_v40 }
  0xdc   :  { %v470_v42 = vpop.eup %469  ;;  %477 = vpow2.f32 %v394_v39  ;;  %v431_v43 = vpop.f32.mrf.mxu0 }
  0xdd   :  { %v178_v44 = vadd.f32 1.0, %v470_v42  ;;  %v395_v45 = vmul.f32 -1.442695, %v633_v41 }
  0xde   :  { %v122_v46 = vpop.f32.mrf.mxu0 }
  0xdf   :  { %479 = vrcp.f32 %v178_v44  ;;  %v637_v47 = vadd.f32 %v610_v17, %v122_v46 }
  0xe0   :  { %v472_v48 = vpop.eup %471  ;;  %481 = vpow2.f32 %v395_v45  ;;  %v434_v49 = vpop.f32.mrf.mxu0 }
  0xe1   :  { %v179_v51 = vadd.f32 1.0, %v472_v48  ;;  %v396_v52 = vmul.f32 -1.442695, %v637_v47 }
  0xe2   :  { %v125_v53 = vpop.f32.mrf.mxu0 }
  0xe3   :  { %483 = vrcp.f32 %v179_v51  ;;  %v644_v54 = vadd.f32 %v610_v17, %v125_v53 }
  0xe4   :  { %v474_v55 = vpop.eup %473  ;;  %485 = vpow2.f32 %v396_v52  ;;  %v435_v56 = vpop.f32.mrf.mxu0 }
  0xe5   :  { %v180_v57 = vadd.f32 1.0, %v474_v55  ;;  %v397_v58 = vmul.f32 -1.442695, %v644_v54 }
  0xe6   :  { %v130_v59 = vpop.f32.mrf.mxu0 }
  0xe7   :  { %487 = vrcp.f32 %v180_v57  ;;  %v648_v60 = vadd.f32 %v610_v17, %v130_v59 }
  0xe8   :  { %v476_v61 = vpop.eup %475  ;;  %489 = vpow2.f32 %v397_v58  ;;  %v438_v62 = vpop.f32.mrf.mxu0 }
  0xe9   :  { %v478_v63 = vpop.eup %477  ;;  %v398_v1 = vmul.f32 -1.442695, %v648_v60  ;;  %217 = vrot.lane.b32.xlu0 %v476_v61, %s529_s3 }
  0xea   :  { %v181_v2 = vadd.f32 1.0, %v478_v63  ;;  %v133_v3 = vpop.f32.mrf.mxu0 }
  0xeb   :  { %491 = vpow2.f32 %v398_v1  ;;  %v653_v4 = vadd.f32 %v610_v17, %v133_v3 }
  0xec   :  { %v480_v5 = vpop.eup %479  ;;  %493 = vrcp.f32 %v181_v2  ;;  %v439_v6 = vpop.f32.mrf.mxu0 }
  0xed   :  { %v482_v7 = vpop.eup %481  ;;  %v399_v8 = vmul.f32 -1.442695, %v653_v4  ;;  %219 = vrot.lane.b32.xlu0 %v480_v5, %s529_s3 }
  0xee   :  { %v182_v9 = vadd.f32 1.0, %v482_v7 }
  0xef   :  { %495 = vpow2.f32 %v399_v8 }
  0xf0   :  { %v484_v10 = vpop.eup %483  ;;  %497 = vrcp.f32 %v182_v9 }
  0xf1   :  { %v486_v11 = vpop.eup %485  ;;  %221 = vrot.lane.b32.xlu1 %v484_v10, %s529_s3 }
  0xf2   :  { %v183_v12 = vadd.f32 1.0, %v486_v11 }
  0xf4   :  { %v488_v13 = vpop.eup %487  ;;  %499 = vrcp.f32 %v183_v12 }
  0xf5   :  { %v490_v14 = vpop.eup %489  ;;  %223 = vrot.lane.b32.xlu1 %v488_v13, %s529_s3 }
  0xf6   :  { %v184_v15 = vadd.f32 1.0, %v490_v14 }
  0xf8   :  { %v492_v16 = vpop.eup %491  ;;  %501 = vrcp.f32 %v184_v15 }
  0xf9   :  { %v494_v17 = vpop.eup %493  ;;  %v185_v18 = vadd.f32 1.0, %v492_v16 }
  0xfa   :  { %225 = vrot.lane.b32.xlu0 %v494_v17, %s529_s3 }
  0xfb   :  { %503 = vrcp.f32 %v185_v18 }
  0xfc   :  { %v496_v20 = vpop.eup %495 }
  0xfd   :  { %v498_v21 = vpop.eup %497  ;;  %v186_v22 = vadd.f32 1.0, %v496_v20 }
  0xfe   :  { %227 = vrot.lane.b32.xlu1 %v498_v21, %s529_s3 }
  0xff   :  { %505 = vrcp.f32 %v186_v22 }
 0x100   :  { %507 = vtanh.f32 %v613_v19 }
 0x101   :  { %v500_v24 = vpop.eup %499  ;;  %509 = vtanh.f32 %v617_v23 }
 0x102   :  { %229 = vrot.lane.b32.xlu0 %v500_v24, %s529_s3  ;;  %511 = vtanh.f32 %v621_v27 }
 0x103   :  { %513 = vtanh.f32 %v625_v31 }
 0x104   :  { %515 = vtanh.f32 %v629_v35 }
 0x105   :  { %v502_v25 = vpop.eup %501  ;;  %517 = vtanh.f32 %v633_v41 }
 0x106   :  { %231 = vrot.lane.b32.xlu1 %v502_v25, %s529_s3  ;;  %519 = vtanh.f32 %v637_v47 }
 0x107   :  { %521 = vtanh.f32 %v644_v54 }
 0x108   :  { %v504_v26 = vpop.eup %503  ;;  %523 = vtanh.f32 %v648_v60 }
 0x109   :  { %233 = vrot.lane.b32.xlu0 %v504_v26, %s529_s3  ;;  %525 = vtanh.f32 %v653_v4 }
 0x10c   :  { %v506_v28 = vpop.eup %505 }
 0x10d   :  { %235 = vrot.lane.b32.xlu1 %v506_v28, %s529_s3  ;;  %v508_v30 = vpop.eup %507 }
 0x10e   :  { %v510_v32 = vpop.eup %509 }
 0x10f   :  { %v512_v19 = vpop.eup %511 }
 0x110   :  { %v514_v23 = vpop.eup %513 }
 0x111   :  { %v516_v41 = vpop.eup %515 }
 0x112   :  { %v518_v42 = vpop.eup %517 }
 0x113   :  { %v520_v48 = vpop.eup %519 }
 0x114   :  { %v522_v49 = vpop.eup %521 }
 0x115   :  { %v524_v55 = vpop.eup %523 }
 0x116   :  { %v526_v56 = vpop.eup %525 }
 0x15b   :  { %v218_v29 = vpop.permute.xlu0 %217 }
 0x15c   :  { %v247_v34 = vmul.f32 %v508_v30, %v218_v29 }
 0x15f   :  { %v220_v33 = vpop.permute.xlu0 %219 }
 0x160   :  { %v248_v36 = vmul.f32 %v510_v32, %v220_v33 }
 0x162   :  { %v257_v37 = vpack.c.bf16 %v248_v36, %v247_v34 }
 0x163   :  { %v222_v38 = vpop.permute.xlu1 %221 }
 0x164   :  { %443 = vmatmul.mubr.msk.bf16.vlgmr.msra.gmra.mxu1 %vm48_vm1, %v257_v37  ;;  %v249_v31 = vmul.f32 %v512_v19, %v222_v38 }
 0x165   :  { %446 = vmatprep.mubr.msk.bf16.mxu1 %vm528_vm0, %v527_v0 }
 0x167   :  { %v224_v27 = vpop.permute.xlu1 %223 }
 0x168   :  { %v250_v39 = vmul.f32 %v514_v23, %v224_v27 }
 0x16a   :  { %v258_v40 = vpack.c.bf16 %v250_v39, %v249_v31 }
 0x16c   :  { %447 = vmatmul.mubr.msk.bf16.gmra.mxu1 %vm48_vm1, %v258_v40  ;;  %v226_v35 = vpop.permute.xlu0 %225 }
 0x16d   :  { %450 = vmatprep.mubr.msk.bf16.mxu1 %vm528_vm0, %v527_v0  ;;  %v251_v44 = vmul.f32 %v516_v41, %v226_v35 }
 0x170   :  { %v228_v43 = vpop.permute.xlu1 %227 }
 0x171   :  { %v252_v45 = vmul.f32 %v518_v42, %v228_v43 }
 0x173   :  { %v259_v46 = vpack.c.bf16 %v252_v45, %v251_v44 }
 0x174   :  { %v230_v47 = vpop.permute.xlu0 %229 }
 0x175   :  { %451 = vmatmul.mubr.msk.bf16.gmra.mxu1 %vm48_vm1, %v259_v46  ;;  %v253_v51 = vmul.f32 %v520_v48, %v230_v47 }
 0x176   :  { %454 = vmatprep.mubr.msk.bf16.mxu1 %vm528_vm0, %v527_v0 }
 0x178   :  { %v232_v50 = vpop.permute.xlu1 %231 }
 0x179   :  { %v254_v52 = vmul.f32 %v522_v49, %v232_v50 }
 0x17b   :  { %v260_v53 = vpack.c.bf16 %v254_v52, %v253_v51  ;;  %v234_v54 = vpop.permute.xlu0 %233 }
 0x17c   :  { %v255_v58 = vmul.f32 %v524_v55, %v234_v54 }
 0x17d   :  { %455 = vmatmul.mubr.msk.bf16.gmra.mxu1 %vm48_vm1, %v260_v53 }
 0x17e   :  { %458 = vmatprep.mubr.msk.bf16.mxu1 %vm528_vm0, %v527_v0 }
 0x17f   :  { %v236_v57 = vpop.permute.xlu1 %235 }
 0x180   :  { %v256_v59 = vmul.f32 %v526_v56, %v236_v57 }
 0x182   :  { %v261_v60 = vpack.c.bf16 %v256_v59, %v255_v58 }
 0x185   :  { %459 = vmatmul.mubr.msk.bf16.gmra.mxu1 %vm48_vm1, %v261_v60 }
 0x224   :  { %v319_v61 = vpop.f32.mrf.mxu1 }
 0x225   :  { %v358_v62 = vmax.f32 %v319_v61, 0.0 }
 0x226   :  { %v444_v63 = vpop.f32.mrf.mxu1 }
 0x227   :  { %369 = vst.msk [vmem:[%s732_s4] sm:$0xff] %vm368_vm2, %v358_v62 }
 0x228   :  { %v322_v1 = vpop.f32.mrf.mxu1 }
 0x229   :  { %v359_v2 = vmax.f32 %v322_v1, 0.0 }
 0x22a   :  { %v445_v3 = vpop.f32.mrf.mxu1 }
 0x22b   :  { %370 = vst.msk [vmem:[%s732_s4 + $0x8] sm:$0xff] %vm368_vm2, %v359_v2 }
 0x22c   :  { %v327_v0 = vpop.f32.mrf.mxu1 }
 0x22d   :  { %v360_v4 = vmax.f32 %v327_v0, 0.0 }
 0x22e   :  { %v448_v5 = vpop.f32.mrf.mxu1 }
 0x22f   :  { %371 = vst.msk [vmem:[%s732_s4 + $0x10] sm:$0xff] %vm368_vm2, %v360_v4 }
 0x230   :  { %v330_v6 = vpop.f32.mrf.mxu1 }
 0x231   :  { %v361_v7 = vmax.f32 %v330_v6, 0.0 }
 0x232   :  { %v449_v8 = vpop.f32.mrf.mxu1 }
 0x233   :  { %372 = vst.msk [vmem:[%s732_s4 + $0x18] sm:$0xff] %vm368_vm2, %v361_v7 }
 0x235   :  { %v335_v9 = vpop.f32.mrf.mxu1 }
 0x236   :  { %v362_v10 = vmax.f32 %v335_v9, 0.0 }
 0x237   :  { %v452_v11 = vpop.f32.mrf.mxu1 }
 0x238   :  { %373 = vst.msk [vmem:[%s732_s4 + $0x20] sm:$0xff] %vm368_vm2, %v362_v10 }
 0x239   :  { %v338_v12 = vpop.f32.mrf.mxu1 }
 0x23a   :  { %v363_v13 = vmax.f32 %v338_v12, 0.0 }
 0x23b   :  { %v453_v14 = vpop.f32.mrf.mxu1 }
 0x23c   :  { %374 = vst.msk [vmem:[%s732_s4 + $0x28] sm:$0xff] %vm368_vm2, %v363_v13 }
 0x23d   :  { %v343_v15 = vpop.f32.mrf.mxu1 }
 0x23e   :  { %v364_v16 = vmax.f32 %v343_v15, 0.0 }
 0x23f   :  { %v456_v17 = vpop.f32.mrf.mxu1 }
 0x240   :  { %375 = vst.msk [vmem:[%s732_s4 + $0x30] sm:$0xff] %vm368_vm2, %v364_v16 }
 0x241   :  { %v346_v18 = vpop.f32.mrf.mxu1 }
 0x242   :  { %v365_v20 = vmax.f32 %v346_v18, 0.0 }
 0x243   :  { %v457_v21 = vpop.f32.mrf.mxu1 }
 0x244   :  { %376 = vst.msk [vmem:[%s732_s4 + $0x38] sm:$0xff] %vm368_vm2, %v365_v20 }
 0x245   :  { %v351_v22 = vpop.f32.mrf.mxu1 }
 0x246   :  { %v366_v24 = vmax.f32 %v351_v22, 0.0 }
 0x247   :  { %v460_v25 = vpop.f32.mrf.mxu1 }
 0x248   :  { %377 = vst.msk [vmem:[%s732_s4 + $0x40] sm:$0xff] %vm368_vm2, %v366_v24 }
 0x249   :  { %v354_v26 = vpop.f32.mrf.mxu1 }
 0x24a   :  { %v367_v28 = vmax.f32 %v354_v26, 0.0 }
 0x24b   :  { %v461_v29 = vpop.f32.mrf.mxu1 }
 0x24c   :  { %378 = vst.msk [vmem:[%s732_s4 + $0x48] sm:$0xff] %vm368_vm2, %v367_v28 }

</bundles_post_ra>
